<compile_context>
chip_gen: v6e
topology: v6e:2x2x1
jax: 0.10.0
libtpu: 0.0.40
codegen_flags: <defaults>
</compile_context>

<pallas_src>
import functools

import jax
import jax.numpy as jnp
from jax.experimental import pallas as pl
from jax.experimental.pallas import tpu as pltpu


def mlp3_kernel(x_ref, w1_ref, b1_ref, w2_ref, b2_ref, w3_ref, b3_ref, o_ref):
    # layer 1: (TB, F) bf16 @ (F, H1) bf16 -> f32 acc; bias + ReLU in f32 (VPU)
    h1 = jnp.dot(x_ref[...], w1_ref[...], preferred_element_type=jnp.float32)
    h1 = jnp.maximum(h1 + b1_ref[...], 0.0)
    # layer 2: (TB, H1) bf16 @ (H1, H2) bf16 -> f32 acc; bias + ReLU in f32
    h2 = jnp.dot(h1.astype(jnp.bfloat16), w2_ref[...],
                 preferred_element_type=jnp.float32)
    h2 = jnp.maximum(h2 + b2_ref[...], 0.0)
    # layer 3: output width is 1, so skip the MXU entirely (an (TB,H2)@(H2,1)
    # matmul would use 1/128..1/256 of the MXU output columns): VPU multiply
    # against the broadcast W3 row + XLU lane-reduce (otherwise-idle slots).
    logits = jnp.sum(h2 * w3_ref[...], axis=-1)                 # (TB,)
    # lane-dense store: batch lands on the lane axis, (1, TB) with TB % 128 == 0
    o_ref[...] = (logits.reshape(1, -1) + b3_ref[...]).astype(o_ref.dtype)


def _round_up(n: int, m: int) -> int:
    return ((n + m - 1) // m) * m


def _pad_2d(a, rows: int, cols: int):
    pr, pc = rows - a.shape[0], cols - a.shape[1]
    if pr or pc:
        a = jnp.pad(a, ((0, pr), (0, pc)))
    return a


@functools.partial(jax.jit, static_argnames=("tile_b",))
def neural_network_forward(x, params, *, tile_b=256):
    """Pallas forward pass of the 'basic' NeuralNetwork.

    x: (B, F) float32 (already-flat features; nn.Flatten on 2-D input is identity)
    params: dict with w1 (F,H1), b1 (H1,), w2 (H1,H2), b2 (H2,), w3 (H2,1), b3 (1,)
    returns logits of shape (B, 1) float32
    """
    B, F = x.shape
    w1, b1 = params["w1"], params["b1"]
    w2, b2 = params["w2"], params["b2"]
    w3, b3 = params["w3"], params["b3"]
    H1, H2 = w1.shape[1], w2.shape[1]

    # pad every contraction / lane dim to a multiple of 128 (covers both the f32
    # (8,128) and bf16 (16,128) tile constraints) and the batch to tile_b.
    Fp, H1p, H2p = _round_up(F, 128), _round_up(H1, 128), _round_up(H2, 128)
    Bp = _round_up(B, tile_b)
    n_tiles = Bp // tile_b

    # bf16 weights / activations for the MXU matmuls (f32 accumulation in-kernel);
    # biases and the tiny layer-3 row stay f32 for the VPU epilogue.
    xp = _pad_2d(x, Bp, Fp).astype(jnp.bfloat16)
    w1p = _pad_2d(w1, Fp, H1p).astype(jnp.bfloat16)
    w2p = _pad_2d(w2, H1p, H2p).astype(jnp.bfloat16)
    b1r = _pad_2d(b1.reshape(1, H1), 1, H1p)
    b2r = _pad_2d(b2.reshape(1, H2), 1, H2p)
    w3r = _pad_2d(w3.reshape(1, H2), 1, H2p)      # (H2,1) -> lane row (1, H2p)
    b3r = b3.reshape(1, 1)

    out = pl.pallas_call(
        mlp3_kernel,
        out_shape=jax.ShapeDtypeStruct((1, Bp), jnp.float32),
        grid_spec=pltpu.PrefetchScalarGridSpec(
            num_scalar_prefetch=0,
            grid=(n_tiles,),
            in_specs=[
                pl.BlockSpec((tile_b, Fp), lambda i: (i, 0)),   # x tile (streams)
                # resident parameters (constant block index every grid step)
                # TODO(synk): at real sizes (F=5000, H1=1000, H2=700) mark these
                # specs pipeline_mode=pl.Buffered(1) so the ~11 MB of resident
                # bf16 weights are not double-buffered (v7x 64 MiB VMEM budget).
                pl.BlockSpec((Fp, H1p), lambda i: (0, 0)),      # W1
                pl.BlockSpec((1, H1p), lambda i: (0, 0)),       # b1
                pl.BlockSpec((H1p, H2p), lambda i: (0, 0)),     # W2
                pl.BlockSpec((1, H2p), lambda i: (0, 0)),       # b2
                pl.BlockSpec((1, H2p), lambda i: (0, 0)),       # W3 as a lane row
                pl.BlockSpec((1, 1), lambda i: (0, 0)),         # b3
            ],
            # lane-dense output: each grid step writes one full (1, tile_b) lane
            # slab of the single output row (unmasked vst), batch on the lane axis.
            out_specs=pl.BlockSpec((1, tile_b), lambda i: (0, i)),
        ),
        compiler_params=pltpu.CompilerParams(
            dimension_semantics=("parallel",),   # batch tiles shard across TCs
            vmem_limit_bytes=64 * 1024 * 1024,
        ),
    )(xp, w1p, b1r, w2p, b2r, w3r, b3r)

    # (1, Bp) lane-major logits row -> (B, 1)
    return out.reshape(-1)[:B].reshape(B, 1)


def init_params(key, F, H1, H2):
    """Deterministic init mimicking PyTorch nn.Linear default:
    U(-1/sqrt(fan_in), 1/sqrt(fan_in)) for both weight and bias."""
    ks = jax.random.split(key, 6)

    def lin(kw, kb, fan_in, fan_out):
        bound = 1.0 / jnp.sqrt(jnp.float32(fan_in))
        w = jax.random.uniform(kw, (fan_in, fan_out), jnp.float32, -bound, bound)
        b = jax.random.uniform(kb, (fan_out,), jnp.float32, -bound, bound)
        return w, b

    w1, b1 = lin(ks[0], ks[1], F, H1)
    w2, b2 = lin(ks[2], ks[3], H1, H2)
    w3, b3 = lin(ks[4], ks[5], H2, 1)
    return {"w1": w1, "b1": b1, "w2": w2, "b2": b2, "w3": w3, "b3": b3}


if __name__ == "__main__":
    # Small stand-ins for chosen_num_of_features=5000, second_layer_size=1000,
    # middle_layer_size=700.  Deliberately NOT multiples of 128 / tile_b so the
    # padding path is exercised; tile_b=256 gives a 4-step parallel batch grid.
    B, F, H1, H2 = 1000, 600, 250, 120
    TILE_B = 256

    key = jax.random.PRNGKey(0)
    kx, kp = jax.random.split(key)
    x = jax.random.normal(kx, (B, F), jnp.float32)   # nn.Flatten of (B, F) is identity
    params = init_params(kp, F, H1, H2)

    logits = neural_network_forward(x, params, tile_b=TILE_B)
    logits = jax.block_until_ready(logits)
    assert logits.shape == (B, 1)

    # pure-JAX reference with the same matmul precision (bf16 inputs, f32 acc)
    xb = x.astype(jnp.bfloat16)
    w1b = params["w1"].astype(jnp.bfloat16)
    w2b = params["w2"].astype(jnp.bfloat16)
    h1 = jnp.maximum(
        jnp.dot(xb, w1b, preferred_element_type=jnp.float32) + params["b1"], 0.0)
    h2 = jnp.maximum(
        jnp.dot(h1.astype(jnp.bfloat16), w2b, preferred_element_type=jnp.float32)
        + params["b2"], 0.0)
    ref = h2 @ params["w3"] + params["b3"]

    max_err = float(jnp.max(jnp.abs(logits - ref)))
    assert jnp.allclose(logits, ref, atol=5e-3, rtol=5e-3), max_err

    print("KERNEL_OK")
</pallas_src>

<mosaic_0001>
module attributes {stable_mosaic.version = 11 : i64} {
  func.func @mlp3_kernel(%arg0: i32, %arg1: memref<256x640xbf16, #tpu.memory_space<vmem>>, %arg2: memref<640x256xbf16, #tpu.memory_space<vmem>>, %arg3: memref<1x256xf32, #tpu.memory_space<vmem>>, %arg4: memref<256x128xbf16, #tpu.memory_space<vmem>>, %arg5: memref<1x128xf32, #tpu.memory_space<vmem>>, %arg6: memref<1x128xf32, #tpu.memory_space<vmem>>, %arg7: memref<1x1xf32, #tpu.memory_space<vmem>>, %arg8: memref<1x256xf32, #tpu.memory_space<vmem>>) attributes {dimension_semantics = [#tpu.dimension_semantics<parallel>], iteration_bounds = array<i64: 4>, scalar_prefetch = 0 : i64, scratch_operands = 0 : i64, tpu.core_type = #tpu.core_type<tc>, window_params = [{transform_indices = @transform_0, window_bounds = array<i64: 256, 640>}, {pipeline_mode = #tpu.pipeline_mode<synchronous>, transform_indices = @transform_1, window_bounds = array<i64: 640, 256>}, {pipeline_mode = #tpu.pipeline_mode<synchronous>, transform_indices = @transform_2, window_bounds = array<i64: 1, 256>}, {pipeline_mode = #tpu.pipeline_mode<synchronous>, transform_indices = @transform_3, window_bounds = array<i64: 256, 128>}, {pipeline_mode = #tpu.pipeline_mode<synchronous>, transform_indices = @transform_4, window_bounds = array<i64: 1, 128>}, {pipeline_mode = #tpu.pipeline_mode<synchronous>, transform_indices = @transform_5, window_bounds = array<i64: 1, 128>}, {pipeline_mode = #tpu.pipeline_mode<synchronous>, transform_indices = @transform_6, window_bounds = array<i64: 1, 1>}, {transform_indices = @transform_7, window_bounds = array<i64: 1, 256>}]} {
    %c0 = arith.constant 0 : index
    %c0_0 = arith.constant 0 : index
    %0 = vector.load %arg1[%c0, %c0_0] : memref<256x640xbf16, #tpu.memory_space<vmem>>, vector<256x640xbf16>
    %c0_1 = arith.constant 0 : index
    %c0_2 = arith.constant 0 : index
    %1 = vector.load %arg2[%c0_1, %c0_2] : memref<640x256xbf16, #tpu.memory_space<vmem>>, vector<640x256xbf16>
    %cst = arith.constant dense<0.000000e+00> : vector<256x256xf32>
    %2 = tpu.matmul %0, %1, %cst {dimension_numbers = #tpu.dot_dimension_numbers<[1], [0], [0], [1], [0, 0, 1, 1], [], []>} : vector<256x640xbf16>, vector<640x256xbf16>, vector<256x256xf32> -> vector<256x256xf32>
    %c0_3 = arith.constant 0 : index
    %c0_4 = arith.constant 0 : index
    %3 = vector.load %arg3[%c0_3, %c0_4] : memref<1x256xf32, #tpu.memory_space<vmem>>, vector<1x256xf32>
    %4 = vector.broadcast %3 : vector<1x256xf32> to vector<256x256xf32>
    %5 = arith.addf %2, %4 : vector<256x256xf32>
    %cst_5 = arith.constant 0.000000e+00 : f32
    %6 = vector.broadcast %cst_5 : f32 to vector<256x256xf32>
    %7 = arith.maximumf %5, %6 : vector<256x256xf32>
    %8 = arith.truncf %7 : vector<256x256xf32> to vector<256x256xbf16>
    %c0_6 = arith.constant 0 : index
    %c0_7 = arith.constant 0 : index
    %9 = vector.load %arg4[%c0_6, %c0_7] : memref<256x128xbf16, #tpu.memory_space<vmem>>, vector<256x128xbf16>
    %cst_8 = arith.constant dense<0.000000e+00> : vector<256x128xf32>
    %10 = tpu.matmul %8, %9, %cst_8 {dimension_numbers = #tpu.dot_dimension_numbers<[1], [0], [0], [1], [0, 0, 1, 1], [], []>} : vector<256x256xbf16>, vector<256x128xbf16>, vector<256x128xf32> -> vector<256x128xf32>
    %c0_9 = arith.constant 0 : index
    %c0_10 = arith.constant 0 : index
    %11 = vector.load %arg5[%c0_9, %c0_10] : memref<1x128xf32, #tpu.memory_space<vmem>>, vector<1x128xf32>
    %12 = vector.broadcast %11 : vector<1x128xf32> to vector<256x128xf32>
    %13 = arith.addf %10, %12 : vector<256x128xf32>
    %cst_11 = arith.constant 0.000000e+00 : f32
    %14 = vector.broadcast %cst_11 : f32 to vector<256x128xf32>
    %15 = arith.maximumf %13, %14 : vector<256x128xf32>
    %c0_12 = arith.constant 0 : index
    %c0_13 = arith.constant 0 : index
    %16 = vector.load %arg6[%c0_12, %c0_13] : memref<1x128xf32, #tpu.memory_space<vmem>>, vector<1x128xf32>
    %17 = vector.broadcast %16 : vector<1x128xf32> to vector<256x128xf32>
    %18 = arith.mulf %15, %17 : vector<256x128xf32>
    %cst_14 = arith.constant dense<0.000000e+00> : vector<256xf32>
    %19 = vector.multi_reduction <add>, %18, %cst_14 [1] : vector<256x128xf32> to vector<256xf32>
    %20 = vector.shape_cast %19 : vector<256xf32> to vector<1x256xf32>
    %c0_15 = arith.constant 0 : index
    %c0_16 = arith.constant 0 : index
    %21 = vector.load %arg7[%c0_15, %c0_16] : memref<1x1xf32, #tpu.memory_space<vmem>>, vector<1x1xf32>
    %22 = vector.broadcast %21 : vector<1x1xf32> to vector<1x256xf32>
    %23 = arith.addf %20, %22 : vector<1x256xf32>
    %c0_17 = arith.constant 0 : index
    %c0_18 = arith.constant 0 : index
    %24 = vector.load %arg8[%c0_17, %c0_18] : memref<1x256xf32, #tpu.memory_space<vmem>>, vector<1x256xf32>
    tpu.vector_store %arg8[%c0_17, %c0_18], %23 {strides = array<i32>} : memref<1x256xf32, #tpu.memory_space<vmem>>, vector<1x256xf32>,
    return
  }
  func.func @transform_0(%arg0: i32) -> (i32, i32) {
    %c0_i32 = arith.constant 0 : i32
    %c0_i32_0 = arith.constant 0 : i32
    return %arg0, %c0_i32 : i32, i32
  }
  func.func @transform_1(%arg0: i32) -> (i32, i32) {
    %c0_i32 = arith.constant 0 : i32
    %c0_i32_0 = arith.constant 0 : i32
    %c0_i32_1 = arith.constant 0 : i32
    return %c0_i32, %c0_i32_0 : i32, i32
  }
  func.func @transform_2(%arg0: i32) -> (i32, i32) {
    %c0_i32 = arith.constant 0 : i32
    %c0_i32_0 = arith.constant 0 : i32
    %c0_i32_1 = arith.constant 0 : i32
    return %c0_i32, %c0_i32_0 : i32, i32
  }
  func.func @transform_3(%arg0: i32) -> (i32, i32) {
    %c0_i32 = arith.constant 0 : i32
    %c0_i32_0 = arith.constant 0 : i32
    %c0_i32_1 = arith.constant 0 : i32
    return %c0_i32, %c0_i32_0 : i32, i32
  }
  func.func @transform_4(%arg0: i32) -> (i32, i32) {
    %c0_i32 = arith.constant 0 : i32
    %c0_i32_0 = arith.constant 0 : i32
    %c0_i32_1 = arith.constant 0 : i32
    return %c0_i32, %c0_i32_0 : i32, i32
  }
  func.func @transform_5(%arg0: i32) -> (i32, i32) {
    %c0_i32 = arith.constant 0 : i32
    %c0_i32_0 = arith.constant 0 : i32
    %c0_i32_1 = arith.constant 0 : i32
    return %c0_i32, %c0_i32_0 : i32, i32
  }
  func.func @transform_6(%arg0: i32) -> (i32, i32) {
    %c0_i32 = arith.constant 0 : i32
    %c0_i32_0 = arith.constant 0 : i32
    %c0_i32_1 = arith.constant 0 : i32
    return %c0_i32, %c0_i32_0 : i32, i32
  }
  func.func @transform_7(%arg0: i32) -> (i32, i32) {
    %c0_i32 = arith.constant 0 : i32
    %c0_i32_0 = arith.constant 0 : i32
    return %c0_i32, %arg0 : i32, i32
  }
}

</mosaic_0001>

<bundles_post_ra>
// kernel: neural_network_forward.1
= control target key start
LH: loop header
LB: loop body
LE: loop exit
PB: predicated region body
PF: predicated region fallthrough
CT: control target
= control target key end

     0   :  { %s6033_s26 = smov 0   ;;  %s7839_s0 = inlined_call_operand.vmem [shape: bf16[1024,640], index: 0, kind: input, shape index: {}]   ;;  %s7840_s1 = inlined_call_operand.vmem [shape: bf16[640,256], index: 1, kind: input, shape index: {}]   ;;  %s7841_s2 = inlined_call_operand.vmem [shape: f32[1,256], index: 2, kind: input, shape index: {}]   ;;  %s7842_s3 = inlined_call_operand.vmem [shape: bf16[256,128], index: 3, kind: input, shape index: {}]   ;;  %s7843_s4 = inlined_call_operand.vmem [shape: f32[1,128], index: 4, kind: input, shape index: {}]   ;;  %s7844_s5 = inlined_call_operand.vmem [shape: f32[1,128], index: 5, kind: input, shape index: {}]   ;;  %s7845_s6 = inlined_call_operand.<no memory space> [shape: f32[1,1], index: 6, kind: input, shape index: {}]   ;;  %s7846_s7 = inlined_call_operand.vmem [shape: f32[1,1024], index: 7, kind: output, shape index: {}]  }
   0x1   :  { %v12_v0 = vstv %s7845_s6 }
   0x2   :  { %13 = vst [vmem:[#allocation2] sm:$0x1] %v12_v0 }
   0x3 LB: > { %s5419_s27 = sadd.s32 4294967295, %s5986_s26   ;;  %p5423_p0 = scmp.ge.s32.totalorder %s5986_s26, 1  ;;  %s5986_s26 = sphi %s6033_s26, %s19_s26  }
   0x4   : > { %p241_p1 = scmp.lt.s32.totalorder %s5986_s26, 5 }
   0x6   : > { %p242_p2 = pnand %p5423_p0, %p241_p1 }
   0x8   : > { %245 = sbr.rel (%p242_p2) target bundleno = 1073 (0x431), region = 48 }
   0xd   : > { %v5732_v1 = vld [vmem:[%s7840_s1 + $0x74] ss:$8 sps:$4 sm:$0xff]   ;;  %v5734_v2 = vld [vmem:[%s7840_s1 + $0x70] ss:$8 sps:$4 sm:$0xff]   ;;  %v5738_v5 = vld [vmem:[%s7840_s1 + $0x64] ss:$8 sps:$4 sm:$0xff]  }
   0xe   : > { %1290 = vmatprep.subr.bf16.mxu0 %v5732_v1  ;;  %v5735_v3 = vld [vmem:[%s7840_s1 + $0x174] ss:$8 sps:$4 sm:$0xff]   ;;  %v5737_v4 = vld [vmem:[%s7840_s1 + $0x170] ss:$8 sps:$4 sm:$0xff]   ;;  %v5740_v6 = vld [vmem:[%s7840_s1 + $0x60] ss:$8 sps:$4 sm:$0xff]  }
   0xf   : > { %1291 = vmatpush1.bf16.msra.mxu0 %v5734_v2  ;;  %1483 = vmatprep.subr.bf16.mxu1 %v5735_v3  ;;  %v5741_v7 = vld [vmem:[%s7840_s1 + $0x164] ss:$8 sps:$4 sm:$0xff]   ;;  %v5743_v8 = vld [vmem:[%s7840_s1 + $0x160] ss:$8 sps:$4 sm:$0xff]   ;;  %v5744_v9 = vld [vmem:[%s7840_s1 + $0x54] ss:$8 sps:$4 sm:$0xff]  }
  0x10   : > { %1484 = vmatpush1.bf16.msra.mxu1 %v5737_v4  ;;  %1292 = vmatprep.subr.bf16.mxu0 %v5738_v5  ;;  %v5746_v10 = vld [vmem:[%s7840_s1 + $0x50] ss:$8 sps:$4 sm:$0xff]   ;;  %v5747_v11 = vld [vmem:[%s7840_s1 + $0x154] ss:$8 sps:$4 sm:$0xff]   ;;  %v5750_v12 = vld [vmem:[%s7840_s1 + $0x44] ss:$8 sps:$4 sm:$0xff]  }
  0x11   : > { %1485 = vmatprep.subr.bf16.mxu1 %v5741_v7  ;;  %v5749_v13 = vld [vmem:[%s7840_s1 + $0x150] ss:$8 sps:$4 sm:$0xff]   ;;  %v5753_v14 = vld [vmem:[%s7840_s1 + $0x144] ss:$8 sps:$4 sm:$0xff]   ;;  %v5752_v15 = vld [vmem:[%s7840_s1 + $0x40] ss:$8 sps:$4 sm:$0xff]  }
  0x12   : > { %v5756_v16 = vld [vmem:[%s7840_s1 + $0x34] ss:$8 sps:$4 sm:$0xff]   ;;  %v5755_v17 = vld [vmem:[%s7840_s1 + $0x140] ss:$8 sps:$4 sm:$0xff]   ;;  %v5758_v19 = vld [vmem:[%s7840_s1 + $0x30] ss:$8 sps:$4 sm:$0xff]  }
  0x13   : > { %1293 = vmatpush1.bf16.msra.mxu0 %v5740_v6  ;;  %v5759_v18 = vld [vmem:[%s7840_s1 + $0x134] ss:$8 sps:$4 sm:$0xff]   ;;  %v5762_v20 = vld [vmem:[%s7840_s1 + $0x24] ss:$8 sps:$4 sm:$0xff]   ;;  %v5761_v21 = vld [vmem:[%s7840_s1 + $0x130] ss:$8 sps:$4 sm:$0xff]  }
  0x14   : > { %1294 = vmatprep.subr.bf16.mxu0 %v5744_v9  ;;  %1486 = vmatpush1.bf16.msra.mxu1 %v5743_v8  ;;  %v5765_v22 = vld [vmem:[%s7840_s1 + $0x124] ss:$8 sps:$4 sm:$0xff]   ;;  %v5764_v23 = vld [vmem:[%s7840_s1 + $0x20] ss:$8 sps:$4 sm:$0xff]   ;;  %v5768_v24 = vld [vmem:[%s7840_s1 + $0x14] ss:$8 sps:$4 sm:$0xff]  }
  0x15   : > { %1487 = vmatprep.subr.bf16.mxu1 %v5747_v11  ;;  %v5767_v25 = vld [vmem:[%s7840_s1 + $0x120] ss:$8 sps:$4 sm:$0xff]   ;;  %v5771_v26 = vld [vmem:[%s7840_s1 + $0x114] ss:$8 sps:$4 sm:$0xff]   ;;  %v5770_v27 = vld [vmem:[%s7840_s1 + $0x10] ss:$8 sps:$4 sm:$0xff]  }
  0x16   : > { %v5774_v28 = vld [vmem:[%s7840_s1 + $0x4] ss:$8 sps:$4 sm:$0xff]   ;;  %v5773_v29 = vld [vmem:[%s7840_s1 + $0x110] ss:$8 sps:$4 sm:$0xff]   ;;  %s5424_s18 = sshll.u32 %s5419_s27, 5  ;;  %v5988_v4 = vmov 0  }
  0x17   : > { %1295 = vmatpush1.bf16.msra.mxu0 %v5746_v10  ;;  %v5777_v30 = vld [vmem:[%s7840_s1 + $0x104] ss:$8 sps:$4 sm:$0xff]   ;;  %v5776_v31 = vld [vmem:[%s7840_s1] ss:$8 sps:$4 sm:$0xff]   ;;  %v5780_v32 = vld [vmem:[%s7840_s1 + $0xf4] ss:$8 sps:$4 sm:$0xff]   ;;  %5730 = vset.pattern.permute.xlu1 %v5988_v4 }
  0x18   : > { %1296 = vmatprep.subr.bf16.mxu0 %v5750_v12  ;;  %1488 = vmatpush1.bf16.msra.mxu1 %v5749_v13  ;;  %p274_p3 = scmp.lt.s32.totalorder %s5424_s18, 127  ;;  %v5779_v33 = vld [vmem:[%s7840_s1 + $0x100] ss:$8 sps:$4 sm:$0xff]   ;;  %v5783_v34 = vld [vmem:[%s7840_s1 + $0x1f4] ss:$8 sps:$4 sm:$0xff]   ;;  %vm5169_vm0 = vcmask 130112  }
  0x19   : > { %1489 = vmatprep.subr.bf16.mxu1 %v5753_v14  ;;  %v5782_v35 = vld [vmem:[%s7840_s1 + $0xf0] ss:$8 sps:$4 sm:$0xff]   ;;  %v5786_v36 = vld [vmem:[%s7840_s1 + $0xe4] ss:$8 sps:$4 sm:$0xff]   ;;  %v5788_v39 = vld [vmem:[%s7840_s1 + $0xe0] ss:$8 sps:$4 sm:$0xff]   ;;  %5731 = vset.pattern.permute.xlu0 %v5988_v4 }
  0x1a   : > { %s7961_s18 = smov (!%p274_p3, %s5424_s18), 127  ;;  %v5785_v37 = vld [vmem:[%s7840_s1 + $0x1f0] ss:$8 sps:$4 sm:$0xff]   ;;  %v5789_v38 = vld [vmem:[%s7840_s1 + $0x1e4] ss:$8 sps:$4 sm:$0xff]   ;;  %vm5176_vm1 = vcmask 195712  }
  0x1b   : > { %1297 = vmatpush1.bf16.msra.mxu0 %v5752_v15  ;;  %v5792_v40 = vld [vmem:[%s7840_s1 + $0xd4] ss:$8 sps:$4 sm:$0xff]   ;;  %s5719_s20 = smul.u32 20, %s7961_s18  ;;  %v5791_v41 = vld [vmem:[%s7840_s1 + $0x1e0] ss:$8 sps:$4 sm:$0xff]   ;;  %vm5183_vm2 = vcmask 261312  }
  0x1c   : > { %1298 = vmatprep.subr.bf16.mxu0 %v5756_v16  ;;  %1490 = vmatpush1.bf16.msra.mxu1 %v5755_v17  ;;  %v5795_v42 = vld [vmem:[%s7840_s1 + $0x1d4] ss:$8 sps:$4 sm:$0xff]   ;;  %v5794_v43 = vld [vmem:[%s7840_s1 + $0xd0] ss:$8 sps:$4 sm:$0xff]   ;;  %v5798_v44 = vld [vmem:[%s7840_s1 + $0xc4] ss:$8 sps:$4 sm:$0xff]  }
  0x1d   : > { %1491 = vmatprep.subr.bf16.mxu1 %v5759_v18  ;;  %s6178_s8 = scalar_lea.vmem %s7839_s0, %s5719_s20  ;;  %v5797_v45 = vld [vmem:[%s7840_s1 + $0x1d0] ss:$8 sps:$4 sm:$0xff]   ;;  %v5801_v46 = vld [vmem:[%s7840_s1 + $0x1c4] ss:$8 sps:$4 sm:$0xff]   ;;  %v5800_v47 = vld [vmem:[%s7840_s1 + $0xc0] ss:$8 sps:$4 sm:$0xff]  }
  0x1e   : > { %v5829_v48 = vld [vmem:[%s6178_s8 + $0x4] ss:$20 sps:$4 sm:$0xff]   ;;  %v5804_v49 = vld [vmem:[%s7840_s1 + $0xb4] ss:$8 sps:$4 sm:$0xff]   ;;  %v5803_v50 = vld [vmem:[%s7840_s1 + $0x1c0] ss:$8 sps:$4 sm:$0xff]  }
  0x1f   : > { %1299 = vmatpush1.bf16.msra.mxu0 %v5758_v19  ;;  %1322 = vmatprep.mubr.bf16.mxu0 %v5829_v48  ;;  %v5807_v51 = vld [vmem:[%s7840_s1 + $0x1b4] ss:$8 sps:$4 sm:$0xff]   ;;  %v5836_v52 = vld [vmem:[%s6178_s8 + $0xc] ss:$20 sps:$4 sm:$0xff]   ;;  %v5806_v53 = vld [vmem:[%s7840_s1 + $0xb0] ss:$8 sps:$4 sm:$0xff]  }
  0x20   : > { %1300 = vmatprep.subr.bf16.mxu0 %v5762_v20  ;;  %1492 = vmatpush1.bf16.msra.mxu1 %v5761_v21  ;;  %v5810_v54 = vld [vmem:[%s7840_s1 + $0xa4] ss:$8 sps:$4 sm:$0xff]   ;;  %v5809_v55 = vld [vmem:[%s7840_s1 + $0x1b0] ss:$8 sps:$4 sm:$0xff]   ;;  %v5812_v57 = vld [vmem:[%s7840_s1 + $0xa0] ss:$8 sps:$4 sm:$0xff]  }
  0x21   : > { %1493 = vmatprep.subr.bf16.mxu1 %v5765_v22  ;;  %1515 = vmatprep.mubr.bf16.mxu1 %v5836_v52  ;;  %v5813_v56 = vld [vmem:[%s7840_s1 + $0x1a4] ss:$8 sps:$4 sm:$0xff]   ;;  %v5816_v58 = vld [vmem:[%s7840_s1 + $0x94] ss:$8 sps:$4 sm:$0xff]   ;;  %v5815_v59 = vld [vmem:[%s7840_s1 + $0x1a0] ss:$8 sps:$4 sm:$0xff]  }
  0x22   : > { %v5819_v60 = vld [vmem:[%s7840_s1 + $0x194] ss:$8 sps:$4 sm:$0xff]   ;;  %v5818_v61 = vld [vmem:[%s7840_s1 + $0x90] ss:$8 sps:$4 sm:$0xff]   ;;  %v5822_v62 = vld [vmem:[%s7840_s1 + $0x84] ss:$8 sps:$4 sm:$0xff]  }
  0x23   : > { %1301 = vmatpush1.bf16.msra.mxu0 %v5764_v23  ;;  %v5821_v63 = vld [vmem:[%s7840_s1 + $0x190] ss:$8 sps:$4 sm:$0xff]   ;;  %v5825_v0 = vld [vmem:[%s7840_s1 + $0x184] ss:$8 sps:$4 sm:$0xff]   ;;  %v5824_v1 = vld [vmem:[%s7840_s1 + $0x80] ss:$8 sps:$4 sm:$0xff]  }
  0x24   : > { %1302 = vmatprep.subr.bf16.mxu0 %v5768_v24  ;;  %1494 = vmatpush1.bf16.msra.mxu1 %v5767_v25  ;;  %v5833_v2 = vld [vmem:[%s7840_s1 + $0x274] ss:$8 sps:$4 sm:$0xff]   ;;  %v5830_v3 = vld [vmem:[%s7840_s1 + $0x180] ss:$8 sps:$4 sm:$0xff]   ;;  %v5831_v6 = vld [vmem:[%s7840_s1 + $0x270] ss:$8 sps:$4 sm:$0xff]  }
  0x25   : > { %1495 = vmatprep.subr.bf16.mxu1 %v5771_v26  ;;  %v5827_v5 = vld [vmem:[%s6178_s8] ss:$20 sps:$4 sm:$0xff]   ;;  %v5834_v7 = vld [vmem:[%s6178_s8 + $0x8] ss:$20 sps:$4 sm:$0xff]   ;;  %v5848_v9 = vld [vmem:[%s7840_s1 + $0x264] ss:$8 sps:$4 sm:$0xff]  }
  0x26   : > { %v5837_v8 = vld [vmem:[%s6178_s8 + $0x2c] ss:$20 sps:$4 sm:$0xff]   ;;  %v5840_v10 = vld [vmem:[%s6178_s8 + $0x34] ss:$20 sps:$4 sm:$0xff]   ;;  %v5842_v14 = vld [vmem:[%s6178_s8 + $0x30] ss:$20 sps:$4 sm:$0xff]  }
  0x27   : > { %1303 = vmatpush1.bf16.msra.mxu0 %v5770_v27  ;;  %v5846_v11 = vld [vmem:[%s7840_s1 + $0x260] ss:$8 sps:$4 sm:$0xff]   ;;  %v5863_v12 = vld [vmem:[%s7840_s1 + $0x254] ss:$8 sps:$4 sm:$0xff]   ;;  %v5861_v16 = vld [vmem:[%s7840_s1 + $0x250] ss:$8 sps:$4 sm:$0xff]  }
  0x28   : > { %1304 = vmatprep.subr.bf16.mxu0 %v5774_v28  ;;  %1496 = vmatpush1.bf16.msra.mxu1 %v5773_v29  ;;  %v5839_v13 = vld [vmem:[%s6178_s8 + $0x28] ss:$20 sps:$4 sm:$0xff]   ;;  %v5878_v17 = vld [vmem:[%s7840_s1 + $0x244] ss:$8 sps:$4 sm:$0xff]   ;;  %v5891_v24 = vld [vmem:[%s7840_s1 + $0x230] ss:$8 sps:$4 sm:$0xff]  }
  0x29   : > { %1497 = vmatprep.subr.bf16.mxu1 %v5777_v30  ;;  %v5843_v15 = vld [vmem:[%s6178_s8 + $0x54] ss:$20 sps:$4 sm:$0xff]   ;;  %v5849_v18 = vld [vmem:[%s6178_s8 + $0x5c] ss:$20 sps:$4 sm:$0xff]   ;;  %v5851_v22 = vld [vmem:[%s6178_s8 + $0x58] ss:$20 sps:$4 sm:$0xff]  }
  0x2a   : > { %v5876_v19 = vld [vmem:[%s7840_s1 + $0x240] ss:$8 sps:$4 sm:$0xff]   ;;  %v5893_v20 = vld [vmem:[%s7840_s1 + $0x234] ss:$8 sps:$4 sm:$0xff]   ;;  %v5845_v21 = vld [vmem:[%s6178_s8 + $0x50] ss:$20 sps:$4 sm:$0xff]  }
  0x2b   : > { %1305 = vmatpush1.bf16.msra.mxu0 %v5776_v31  ;;  %v5852_v23 = vld [vmem:[%s6178_s8 + $0x7c] ss:$20 sps:$4 sm:$0xff]   ;;  %v5908_v25 = vld [vmem:[%s7840_s1 + $0x224] ss:$8 sps:$4 sm:$0xff]   ;;  %v5906_v27 = vld [vmem:[%s7840_s1 + $0x220] ss:$8 sps:$4 sm:$0xff]  }
  0x2c   : > { %1306 = vmatprep.subr.bf16.mxu0 %v5780_v32  ;;  %1498 = vmatpush1.bf16.msra.mxu1 %v5779_v33  ;;  %v5855_v26 = vld [vmem:[%s6178_s8 + $0x84] ss:$20 sps:$4 sm:$0xff]   ;;  %v5923_v28 = vld [vmem:[%s7840_s1 + $0x214] ss:$8 sps:$4 sm:$0xff]   ;;  %v5864_v33 = vld [vmem:[%s6178_s8 + $0xac] ss:$20 sps:$4 sm:$0xff]  }
  0x2d   : > { %1499 = vmatprep.subr.bf16.mxu1 %v5783_v34  ;;  %v5854_v29 = vld [vmem:[%s6178_s8 + $0x78] ss:$20 sps:$4 sm:$0xff]   ;;  %v5857_v32 = vld [vmem:[%s6178_s8 + $0x80] ss:$20 sps:$4 sm:$0xff]   ;;  %vm5190_vm3 = vcmask 326912   ;;  %vm5197_vm4 = vcmask 392512  }
  0x2e   : > { %v5858_v30 = vld [vmem:[%s6178_s8 + $0xa4] ss:$20 sps:$4 sm:$0xff]   ;;  %v5936_v34 = vld [vmem:[%s7840_s1 + $0x200] ss:$8 sps:$4 sm:$0xff]   ;;  %vm5204_vm5 = vcmask 458112   ;;  %vm5211_vm6 = vcmask 523712  }
  0x2f   : > { %1307 = vmatpush2.bf16.msra.mxu0 %v5782_v35  ;;  %v5921_v31 = vld [vmem:[%s7840_s1 + $0x210] ss:$8 sps:$4 sm:$0xff]   ;;  %v5938_v35 = vld [vmem:[%s7840_s1 + $0x204] ss:$8 sps:$4 sm:$0xff]   ;;  %v5890_v52 = vld [vmem:[%s6178_s8 + $0x140] ss:$20 sps:$4 sm:$0xff]  }
  0x30   : > { %1308 = vmatprep.subr.bf16.mxu0 %v5786_v36  ;;  %1500 = vmatpush2.bf16.msra.mxu1 %v5785_v37  ;;  %v5860_v36 = vld [vmem:[%s6178_s8 + $0xa0] ss:$20 sps:$4 sm:$0xff]   ;;  %v5884_v48 = vld [vmem:[%s6178_s8 + $0x118] ss:$20 sps:$4 sm:$0xff]   ;;  %vm5218_vm7 = vcmask 589312   ;;  %vm5225_vm8 = vcmask 654912  }
  0x31   : > { %1501 = vmatprep.subr.bf16.mxu1 %v5789_v38  ;;  %v5867_v37 = vld [vmem:[%s6178_s8 + $0xcc] ss:$20 sps:$4 sm:$0xff]   ;;  %v5866_v38 = vld [vmem:[%s6178_s8 + $0xa8] ss:$20 sps:$4 sm:$0xff]   ;;  %vm5232_vm9 = vcmask 720512   ;;  %vm5239_vm10 = vcmask 786112  }
  0x32   : > { %vm5246_vm11 = vcmask 851712   ;;  %vm5253_vm12 = vcmask 917312   ;;  %s5426_s13 = sshll.u32 %s5419_s27, 1  ;;  %vm5260_vm13 = vcmask 982912   ;;  %vm5267_vm14 = vcmask 1048512  }
  0x33   : > { %1309 = vmatpush2.bf16.msra.mxu0 %v5788_v39  ;;  %v5870_v39 = vld [vmem:[%s6178_s8 + $0xd4] ss:$20 sps:$4 sm:$0xff]   ;;  %p281_p4 = scmp.lt.s32.totalorder %s5426_s13, 7 }
  0x34   : > { %1310 = vmatprep.subr.bf16.mxu0 %v5792_v40  ;;  %1502 = vmatpush2.bf16.msra.mxu1 %v5791_v41  ;;  %v5869_v40 = vld [vmem:[%s6178_s8 + $0xc8] ss:$20 sps:$4 sm:$0xff]  }
  0x35   : > { %1503 = vmatprep.subr.bf16.mxu1 %v5795_v42  ;;  %v5873_v41 = vld [vmem:[%s6178_s8 + $0xf4] ss:$20 sps:$4 sm:$0xff]   ;;  %v5872_v42 = vld [vmem:[%s6178_s8 + $0xd0] ss:$20 sps:$4 sm:$0xff]   ;;  %s7963_s13 = smov (!%p281_p4, %s5426_s13), 7 }
  0x36   : > { %s283_s15 = scalar_lea.vmem %s7846_s7, %s7963_s13 }
  0x37   : > { %1311 = vmatpush2.bf16.msra.mxu0 %v5794_v43  ;;  %v5879_v43 = vld [vmem:[%s6178_s8 + $0xfc] ss:$20 sps:$4 sm:$0xff]  }
  0x38   : > { %1312 = vmatprep.subr.bf16.mxu0 %v5798_v44  ;;  %1504 = vmatpush2.bf16.msra.mxu1 %v5797_v45  ;;  %v5875_v44 = vld [vmem:[%s6178_s8 + $0xf0] ss:$20 sps:$4 sm:$0xff]  }
  0x39   : > { %1505 = vmatprep.subr.bf16.mxu1 %v5801_v46  ;;  %v5882_v45 = vld [vmem:[%s6178_s8 + $0x11c] ss:$20 sps:$4 sm:$0xff]   ;;  %v5881_v46 = vld [vmem:[%s6178_s8 + $0xf8] ss:$20 sps:$4 sm:$0xff]  }
  0x3b   : > { %1313 = vmatpush2.bf16.msra.mxu0 %v5800_v47  ;;  %v5885_v47 = vld [vmem:[%s6178_s8 + $0x124] ss:$20 sps:$4 sm:$0xff]  }
  0x3c   : > { %1314 = vmatprep.subr.bf16.mxu0 %v5804_v49  ;;  %1506 = vmatpush2.bf16.msra.mxu1 %v5803_v50  ;;  %v5888_v49 = vld [vmem:[%s6178_s8 + $0x144] ss:$20 sps:$4 sm:$0xff]   ;;  %v5887_v50 = vld [vmem:[%s6178_s8 + $0x120] ss:$20 sps:$4 sm:$0xff]  }
  0x3d   : > { %1507 = vmatprep.subr.bf16.mxu1 %v5807_v51  ;;  %v5894_v51 = vld [vmem:[%s6178_s8 + $0x14c] ss:$20 sps:$4 sm:$0xff]  }
  0x3f   : > { %1315 = vmatpush2.bf16.msra.mxu0 %v5806_v53  ;;  %v5897_v53 = vld [vmem:[%s6178_s8 + $0x16c] ss:$20 sps:$4 sm:$0xff]  }
  0x40   : > { %1316 = vmatprep.subr.bf16.mxu0 %v5810_v54  ;;  %1508 = vmatpush2.bf16.msra.mxu1 %v5809_v55  ;;  %v5896_v54 = vld [vmem:[%s6178_s8 + $0x148] ss:$20 sps:$4 sm:$0xff]  }
  0x41   : > { %1509 = vmatprep.subr.bf16.mxu1 %v5813_v56  ;;  %v5900_v55 = vld [vmem:[%s6178_s8 + $0x174] ss:$20 sps:$4 sm:$0xff]  }
  0x42   : > { %v5899_v56 = vld [vmem:[%s6178_s8 + $0x168] ss:$20 sps:$4 sm:$0xff]  }
  0x43   : > { %1317 = vmatpush2.bf16.msra.mxu0 %v5812_v57  ;;  %v5903_v57 = vld [vmem:[%s6178_s8 + $0x194] ss:$20 sps:$4 sm:$0xff]  }
  0x44   : > { %1318 = vmatprep.subr.bf16.mxu0 %v5816_v58  ;;  %1510 = vmatpush2.bf16.msra.mxu1 %v5815_v59  ;;  %v5902_v58 = vld [vmem:[%s6178_s8 + $0x170] ss:$20 sps:$4 sm:$0xff]  }
  0x45   : > { %1511 = vmatprep.subr.bf16.mxu1 %v5819_v60  ;;  %v5909_v59 = vld [vmem:[%s6178_s8 + $0x19c] ss:$20 sps:$4 sm:$0xff]  }
  0x46   : > { %v5905_v60 = vld [vmem:[%s6178_s8 + $0x190] ss:$20 sps:$4 sm:$0xff]  }
  0x47   : > { %1319 = vmatpush2.bf16.msra.mxu0 %v5818_v61  ;;  %v5912_v61 = vld [vmem:[%s6178_s8 + $0x1bc] ss:$20 sps:$4 sm:$0xff]  }
  0x48   : > { %1320 = vmatprep.subr.bf16.mxu0 %v5822_v62  ;;  %1512 = vmatpush2.bf16.msra.mxu1 %v5821_v63  ;;  %v5911_v62 = vld [vmem:[%s6178_s8 + $0x198] ss:$20 sps:$4 sm:$0xff]  }
  0x49   : > { %1513 = vmatprep.subr.bf16.mxu1 %v5825_v0  ;;  %v5915_v63 = vld [vmem:[%s6178_s8 + $0x1c4] ss:$20 sps:$4 sm:$0xff]  }
  0x4a   : > { %v5958_v0 = vld [vmem:[%s7842_s3 + $0x78] sm:$0xff]  }
  0x4b   : > { %1321 = vmatpush2.bf16.msra.mxu0 %v5824_v1  ;;  %v5959_v1 = vld [vmem:[%s7842_s3 + $0x38] sm:$0xff]  }
  0x4c   : > { %1676 = vmatprep.subr.bf16.mxu0 %v5833_v2  ;;  %1514 = vmatpush2.bf16.msra.mxu1 %v5830_v3  ;;  %v5914_v2 = vld [vmem:[%s6178_s8 + $0x1b8] ss:$20 sps:$4 sm:$0xff]  }
  0x4d   : > { %5607 = vmatprep.subr.bf16.mxu1 %v5958_v0  ;;  %v5918_v3 = vld [vmem:[%s6178_s8 + $0x1e4] ss:$20 sps:$4 sm:$0xff]  }
  0x4e   : > { %1323 = vmatmul.mubr.bf16.vlgmr.msra.gmra.mxu0 %v5827_v5  ;;  %v5917_v5 = vld [vmem:[%s6178_s8 + $0x1c0] ss:$20 sps:$4 sm:$0xff]  }
  0x4f   : > { %1677 = vmatpush1.bf16.msra.mxu0 %v5831_v6  ;;  %1332 = vmatprep.mubr.bf16.mxu0 %v5837_v8  ;;  %v5924_v6 = vld [vmem:[%s6178_s8 + $0x1ec] ss:$20 sps:$4 sm:$0xff]  }
  0x50   : > { %1516 = vmatmul.mubr.bf16.vlgmr.msra.gmra.mxu1 %v5834_v7  ;;  %1678 = vmatprep.subr.bf16.mxu0 %v5848_v9  ;;  %v5920_v7 = vld [vmem:[%s6178_s8 + $0x1e0] ss:$20 sps:$4 sm:$0xff]   ;;  %v5926_v9 = vld [vmem:[%s6178_s8 + $0x1e8] ss:$20 sps:$4 sm:$0xff]  }
  0x51   : > { %1525 = vmatprep.mubr.bf16.mxu1 %v5840_v10  ;;  %5608 = vmatpush3.bf16.msra.mxu1 %v5959_v1  ;;  %v5927_v8 = vld [vmem:[%s6178_s8 + $0x20c] ss:$20 sps:$4 sm:$0xff]   ;;  %v5930_v10 = vld [vmem:[%s6178_s8 + $0x214] ss:$20 sps:$4 sm:$0xff]  }
  0x53   : > { %1679 = vmatpush1.bf16.msra.mxu0 %v5846_v11  ;;  %v5962_v11 = vld [vmem:[%s7842_s3 + $0x70] sm:$0xff]  }
  0x54   : > { %1680 = vmatprep.subr.bf16.mxu0 %v5863_v12  ;;  %v5963_v12 = vld [vmem:[%s7842_s3 + $0x30] sm:$0xff]   ;;  %5609 = vmatprep.subr.bf16.mxu1 %v5962_v11 }
  0x55   : > { %5610 = vmatpush3.bf16.msra.mxu1 %v5963_v12 }
  0x56   : > { %1333 = vmatmul.mubr.bf16.gmra.mxu0 %v5839_v13  ;;  %v5929_v13 = vld [vmem:[%s6178_s8 + $0x208] ss:$20 sps:$4 sm:$0xff]  }
  0x57   : > { %1342 = vmatprep.mubr.bf16.mxu0 %v5843_v15  ;;  %1681 = vmatpush1.bf16.msra.mxu0 %v5861_v16  ;;  %v5932_v15 = vld [vmem:[%s6178_s8 + $0x210] ss:$20 sps:$4 sm:$0xff]  }
  0x58   : > { %1526 = vmatmul.mubr.bf16.gmra.mxu1 %v5842_v14  ;;  %1682 = vmatprep.subr.bf16.mxu0 %v5878_v17  ;;  %v5933_v14 = vld [vmem:[%s6178_s8 + $0x234] ss:$20 sps:$4 sm:$0xff]   ;;  %v5939_v16 = vld [vmem:[%s6178_s8 + $0x23c] ss:$20 sps:$4 sm:$0xff]  }
  0x59   : > { %1535 = vmatprep.mubr.bf16.mxu1 %v5849_v18  ;;  %v5935_v17 = vld [vmem:[%s6178_s8 + $0x230] ss:$20 sps:$4 sm:$0xff]  }
  0x5a   : > { %v5942_v18 = vld [vmem:[%s6178_s8 + $0x25c] ss:$20 sps:$4 sm:$0xff]  }
  0x5b   : > { %1683 = vmatpush1.bf16.msra.mxu0 %v5876_v19  ;;  %v5941_v19 = vld [vmem:[%s6178_s8 + $0x238] ss:$20 sps:$4 sm:$0xff]  }
  0x5c   : > { %1684 = vmatprep.subr.bf16.mxu0 %v5893_v20  ;;  %v5945_v20 = vld [vmem:[%s6178_s8 + $0x264] ss:$20 sps:$4 sm:$0xff]  }
  0x5e   : > { %1343 = vmatmul.mubr.bf16.gmra.mxu0 %v5845_v21  ;;  %v5966_v21 = vld [vmem:[%s7842_s3 + $0x68] sm:$0xff]  }
  0x5f   : > { %1352 = vmatprep.mubr.bf16.mxu0 %v5852_v23  ;;  %1685 = vmatpush1.bf16.msra.mxu0 %v5891_v24  ;;  %v5944_v23 = vld [vmem:[%s6178_s8 + $0x258] ss:$20 sps:$4 sm:$0xff]   ;;  %v5947_v24 = vld [vmem:[%s6178_s8 + $0x260] ss:$20 sps:$4 sm:$0xff]  }
  0x60   : > { %1536 = vmatmul.mubr.bf16.gmra.mxu1 %v5851_v22  ;;  %1686 = vmatprep.subr.bf16.mxu0 %v5908_v25  ;;  %v5967_v22 = vld [vmem:[%s7842_s3 + $0x28] sm:$0xff]   ;;  %v5948_v25 = vld [vmem:[%s6178_s8 + $0x10] ss:$20 sps:$4 sm:$0xff]  }
  0x61   : > { %1545 = vmatprep.mubr.bf16.mxu1 %v5855_v26  ;;  %5611 = vmatprep.subr.bf16.mxu1 %v5966_v21  ;;  %v5970_v26 = vld [vmem:[%s7842_s3 + $0x60] sm:$0xff]  }
  0x62   : > { %5612 = vmatpush3.bf16.msra.mxu1 %v5967_v22  ;;  %v5968_v21 = vld [vmem:[%s6178_s8 + $0x240] ss:$20 sps:$4 sm:$0xff]  }
  0x63   : > { %1687 = vmatpush1.bf16.msra.mxu0 %v5906_v27  ;;  %v5971_v27 = vld [vmem:[%s7842_s3 + $0x20] sm:$0xff]   ;;  %5613 = vmatprep.subr.bf16.mxu1 %v5970_v26 }
  0x64   : > { %1688 = vmatprep.subr.bf16.mxu0 %v5923_v28  ;;  %v5949_v28 = vld [vmem:[%s6178_s8 + $0x38] ss:$20 sps:$4 sm:$0xff]  }
  0x66   : > { %1353 = vmatmul.mubr.bf16.gmra.mxu0 %v5854_v29  ;;  %5614 = vmatpush3.bf16.msra.mxu1 %v5971_v27  ;;  %v5950_v29 = vld [vmem:[%s6178_s8 + $0x60] ss:$20 sps:$4 sm:$0xff]  }
  0x67   : > { %1362 = vmatprep.mubr.bf16.mxu0 %v5858_v30  ;;  %1689 = vmatpush1.bf16.msra.mxu0 %v5921_v31  ;;  %v5972_v30 = vld [vmem:[%s7842_s3 + $0x58] sm:$0xff]  }
  0x68   : > { %1546 = vmatmul.mubr.bf16.gmra.mxu1 %v5857_v32  ;;  %1690 = vmatprep.subr.bf16.mxu0 %v5938_v35  ;;  %v5973_v31 = vld [vmem:[%s7842_s3 + $0x18] sm:$0xff]   ;;  %v5975_v35 = vld [vmem:[%s7842_s3 + $0x10] sm:$0xff]  }
  0x69   : > { %1555 = vmatprep.mubr.bf16.mxu1 %v5864_v33  ;;  %5615 = vmatprep.subr.bf16.mxu1 %v5972_v30  ;;  %v5951_v32 = vld [vmem:[%s6178_s8 + $0x88] ss:$20 sps:$4 sm:$0xff]   ;;  %v5952_v33 = vld [vmem:[%s6178_s8 + $0xb0] ss:$20 sps:$4 sm:$0xff]  }
  0x6a   : > { %5616 = vmatpush3.bf16.msra.mxu1 %v5973_v31 }
  0x6b   : > { %1691 = vmatpush1.bf16.msra.mxu0 %v5936_v34  ;;  %v5974_v34 = vld [vmem:[%s7842_s3 + $0x50] sm:$0xff]  }
  0x6c   : > { %5617 = vmatprep.subr.bf16.mxu1 %v5974_v34 }
  0x6e   : > { %1363 = vmatmul.mubr.bf16.gmra.mxu0 %v5860_v36  ;;  %5618 = vmatpush3.bf16.msra.mxu1 %v5975_v35  ;;  %v5953_v36 = vld [vmem:[%s6178_s8 + $0xd8] ss:$20 sps:$4 sm:$0xff]  }
  0x6f   : > { %1372 = vmatprep.mubr.bf16.mxu0 %v5867_v37  ;;  %v5954_v37 = vld [vmem:[%s6178_s8 + $0x100] ss:$20 sps:$4 sm:$0xff]  }
  0x70   : > { %1556 = vmatmul.mubr.bf16.gmra.mxu1 %v5866_v38  ;;  %v5976_v38 = vld [vmem:[%s7842_s3 + $0x48] sm:$0xff]  }
  0x71   : > { %1565 = vmatprep.mubr.bf16.mxu1 %v5870_v39  ;;  %v5977_v39 = vld [vmem:[%s7842_s3 + $0x8] sm:$0xff]   ;;  %5619 = vmatprep.subr.bf16.mxu1 %v5976_v38 }
  0x72   : > { %5620 = vmatpush3.bf16.msra.mxu1 %v5977_v39 }
  0x76   : > { %1373 = vmatmul.mubr.bf16.gmra.mxu0 %v5869_v40  ;;  %v5955_v40 = vld [vmem:[%s6178_s8 + $0x128] ss:$20 sps:$4 sm:$0xff]  }
  0x77   : > { %1382 = vmatprep.mubr.bf16.mxu0 %v5873_v41  ;;  %v5956_v41 = vld [vmem:[%s6178_s8 + $0x150] ss:$20 sps:$4 sm:$0xff]  }
  0x78   : > { %1566 = vmatmul.mubr.bf16.gmra.mxu1 %v5872_v42  ;;  %v5978_v42 = vld [vmem:[%s7842_s3 + $0x40] sm:$0xff]  }
  0x79   : > { %1575 = vmatprep.mubr.bf16.mxu1 %v5879_v43  ;;  %v5979_v43 = vld [vmem:[%s7842_s3] sm:$0xff]   ;;  %5621 = vmatprep.subr.bf16.mxu1 %v5978_v42 }
  0x7a   : > { %5622 = vmatpush3.bf16.msra.mxu1 %v5979_v43 }
  0x7e   : > { %1383 = vmatmul.mubr.bf16.gmra.mxu0 %v5875_v44 }
  0x7f   : > { %1392 = vmatprep.mubr.bf16.mxu0 %v5882_v45 }
  0x80   : > { %1576 = vmatmul.mubr.bf16.gmra.mxu1 %v5881_v46 }
  0x81   : > { %1585 = vmatprep.mubr.bf16.mxu1 %v5885_v47 }
  0x86   : > { %1393 = vmatmul.mubr.bf16.gmra.mxu0 %v5884_v48 }
  0x87   : > { %1402 = vmatprep.mubr.bf16.mxu0 %v5888_v49  ;;  %v5957_v49 = vld [vmem:[%s6178_s8 + $0x178] ss:$20 sps:$4 sm:$0xff]  }
  0x88   : > { %1586 = vmatmul.mubr.bf16.gmra.mxu1 %v5887_v50 }
  0x89   : > { %1595 = vmatprep.mubr.bf16.mxu1 %v5894_v51 }
  0x8e   : > { %1403 = vmatmul.mubr.bf16.gmra.mxu0 %v5890_v52 }
  0x8f   : > { %1412 = vmatprep.mubr.bf16.mxu0 %v5897_v53 }
  0x90   : > { %1596 = vmatmul.mubr.bf16.gmra.mxu1 %v5896_v54 }
  0x91   : > { %1605 = vmatprep.mubr.bf16.mxu1 %v5900_v55 }
  0x96   : > { %1413 = vmatmul.mubr.bf16.gmra.mxu0 %v5899_v56  ;;  %v5960_v56 = vld [vmem:[%s6178_s8 + $0x1a0] ss:$20 sps:$4 sm:$0xff]  }
  0x97   : > { %1422 = vmatprep.mubr.bf16.mxu0 %v5903_v57 }
  0x98   : > { %1606 = vmatmul.mubr.bf16.gmra.mxu1 %v5902_v58 }
  0x99   : > { %1615 = vmatprep.mubr.bf16.mxu1 %v5909_v59 }
  0x9e   : > { %1423 = vmatmul.mubr.bf16.gmra.mxu0 %v5905_v60 }
  0x9f   : > { %1432 = vmatprep.mubr.bf16.mxu0 %v5912_v61 }
  0xa0   : > { %1616 = vmatmul.mubr.bf16.gmra.mxu1 %v5911_v62 }
  0xa1   : > { %1625 = vmatprep.mubr.bf16.mxu1 %v5915_v63  ;;  %v5961_v63 = vld [vmem:[%s6178_s8 + $0x1c8] ss:$20 sps:$4 sm:$0xff]  }
  0xa6   : > { %1433 = vmatmul.mubr.bf16.gmra.mxu0 %v5914_v2 }
  0xa7   : > { %1442 = vmatprep.mubr.bf16.mxu0 %v5918_v3 }
  0xa8   : > { %1626 = vmatmul.mubr.bf16.gmra.mxu1 %v5917_v5 }
  0xa9   : > { %1635 = vmatprep.mubr.bf16.mxu1 %v5924_v6 }
  0xae   : > { %1443 = vmatmul.mubr.bf16.gmra.mxu0 %v5920_v7  ;;  %v5964_v7 = vld [vmem:[%s6178_s8 + $0x1f0] ss:$20 sps:$4 sm:$0xff]  }
  0xaf   : > { %1452 = vmatprep.mubr.bf16.mxu0 %v5927_v8 }
  0xb0   : > { %1636 = vmatmul.mubr.bf16.gmra.mxu1 %v5926_v9 }
  0xb1   : > { %1645 = vmatprep.mubr.bf16.mxu1 %v5930_v10 }
  0xb6   : > { %1453 = vmatmul.mubr.bf16.gmra.mxu0 %v5929_v13 }
  0xb7   : > { %1462 = vmatprep.mubr.bf16.mxu0 %v5933_v14  ;;  %v5965_v14 = vld [vmem:[%s6178_s8 + $0x218] ss:$20 sps:$4 sm:$0xff]  }
  0xb8   : > { %1646 = vmatmul.mubr.bf16.gmra.mxu1 %v5932_v15 }
  0xb9   : > { %1655 = vmatprep.mubr.bf16.mxu1 %v5939_v16 }
  0xbe   : > { %1463 = vmatmul.mubr.bf16.gmra.mxu0 %v5935_v17 }
  0xbf   : > { %1472 = vmatprep.mubr.bf16.mxu0 %v5942_v18 }
  0xc0   : > { %1656 = vmatmul.mubr.bf16.gmra.mxu1 %v5941_v19 }
  0xc1   : > { %1665 = vmatprep.mubr.bf16.mxu1 %v5945_v20 }
  0xc6   : > { %1473 = vmatmul.mubr.bf16.gmra.mxu0 %v5944_v23 }
  0xc7   : > { %1708 = vmatprep.mubr.bf16.mxu0 %v5988_v4 }
  0xc8   : > { %1666 = vmatmul.mubr.bf16.gmra.mxu1 %v5947_v24 }
  0xce   : > { %1709 = vmatmul.mubr.bf16.vlgmr.msra.gmra.mxu0 %v5948_v25 }
  0xcf   : > { %1718 = vmatprep.mubr.bf16.mxu0 %v5988_v4 }
  0xd6   : > { %1719 = vmatmul.mubr.bf16.gmra.mxu0 %v5949_v28  ;;  %v5969_v28 = vld [vmem:[%s6178_s8 + $0x268] ss:$20 sps:$4 sm:$0xff]  }
  0xd7   : > { %1728 = vmatprep.mubr.bf16.mxu0 %v5988_v4 }
  0xde   : > { %1729 = vmatmul.mubr.bf16.gmra.mxu0 %v5950_v29 }
  0xdf   : > { %1738 = vmatprep.mubr.bf16.mxu0 %v5988_v4 }
  0xe6   : > { %1739 = vmatmul.mubr.bf16.gmra.mxu0 %v5951_v32 }
  0xe7   : > { %1748 = vmatprep.mubr.bf16.mxu0 %v5988_v4 }
  0xee   : > { %1749 = vmatmul.mubr.bf16.gmra.mxu0 %v5952_v33 }
  0xef   : > { %1758 = vmatprep.mubr.bf16.mxu0 %v5988_v4 }
  0xf6   : > { %1759 = vmatmul.mubr.bf16.gmra.mxu0 %v5953_v36 }
  0xf7   : > { %1768 = vmatprep.mubr.bf16.mxu0 %v5988_v4 }
  0xfe   : > { %1769 = vmatmul.mubr.bf16.gmra.mxu0 %v5954_v37 }
  0xff   : > { %1778 = vmatprep.mubr.bf16.mxu0 %v5988_v4 }
 0x106   : > { %1779 = vmatmul.mubr.bf16.gmra.mxu0 %v5955_v40 }
 0x107   : > { %1788 = vmatprep.mubr.bf16.mxu0 %v5988_v4 }
 0x10e   : > { %v6420_v44 = vpop.f32.mrf.mxu0  ;;  %1789 = vmatmul.mubr.bf16.gmra.mxu0 %v5956_v41 }
 0x10f   : > { %1798 = vmatprep.mubr.bf16.mxu0 %v5988_v4 }
 0x110   : > { %v6423_v45 = vpop.f32.mrf.mxu0  ;;  %v6425_v46 = vpop.f32.mrf.mxu1 }
 0x112   : > { %v6427_v47 = vpop.f32.mrf.mxu0  ;;  %v6429_v48 = vpop.f32.mrf.mxu1 }
 0x114   : > { %v6432_v50 = vpop.f32.mrf.mxu0  ;;  %v6434_v51 = vpop.f32.mrf.mxu1 }
 0x116   : > { %v6436_v52 = vpop.f32.mrf.mxu0  ;;  %1799 = vmatmul.mubr.bf16.gmra.mxu0 %v5957_v49  ;;  %v6439_v53 = vpop.f32.mrf.mxu1 }
 0x117   : > { %1808 = vmatprep.mubr.bf16.mxu0 %v5988_v4 }
 0x118   : > { %v6441_v54 = vpop.f32.mrf.mxu0  ;;  %v6446_v57 = vpop.f32.mrf.mxu1 }
 0x11a   : > { %v6443_v55 = vpop.f32.mrf.mxu0  ;;  %v6453_v60 = vpop.f32.mrf.mxu1 }
 0x11c   : > { %v6448_v58 = vpop.f32.mrf.mxu0  ;;  %v6460_v0 = vpop.f32.mrf.mxu1 }
 0x11e   : > { %v6450_v59 = vpop.f32.mrf.mxu0  ;;  %1809 = vmatmul.mubr.bf16.gmra.mxu0 %v5960_v56  ;;  %v6467_v3 = vpop.f32.mrf.mxu1 }
 0x11f   : > { %1818 = vmatprep.mubr.bf16.mxu0 %v5988_v4 }
 0x120   : > { %v6455_v61 = vpop.f32.mrf.mxu0  ;;  %v6474_v8 = vpop.f32.mrf.mxu1 }
 0x122   : > { %v6457_v62 = vpop.f32.mrf.mxu0  ;;  %v6481_v11 = vpop.f32.mrf.mxu1 }
 0x124   : > { %v6462_v1 = vpop.f32.mrf.mxu0  ;;  %v6488_v15 = vpop.f32.mrf.mxu1 }
 0x126   : > { %v6464_v2 = vpop.f32.mrf.mxu0  ;;  %1819 = vmatmul.mubr.bf16.gmra.mxu0 %v5961_v63  ;;  %v6495_v18 = vpop.f32.mrf.mxu1 }
 0x127   : > { %1828 = vmatprep.mubr.bf16.mxu0 %v5988_v4 }
 0x128   : > { %v6469_v5 = vpop.f32.mrf.mxu0  ;;  %v6502_v22 = vpop.f32.mrf.mxu1 }
 0x12a   : > { %v6471_v6 = vpop.f32.mrf.mxu0  ;;  %v6509_v25 = vpop.f32.mrf.mxu1 }
 0x12c   : > { %v6476_v9 = vpop.f32.mrf.mxu0  ;;  %v6516_v29 = vpop.f32.mrf.mxu1 }
 0x12e   : > { %v6478_v10 = vpop.f32.mrf.mxu0  ;;  %1829 = vmatmul.mubr.bf16.gmra.mxu0 %v5964_v7  ;;  %v6522_v32 = vpop.f32.mrf.mxu1 }
 0x12f   : > { %1838 = vmatprep.mubr.bf16.mxu0 %v5988_v4 }
 0x130   : > { %v6483_v12 = vpop.f32.mrf.mxu0 }
 0x132   : > { %v6485_v13 = vpop.f32.mrf.mxu0 }
 0x134   : > { %v6490_v16 = vpop.f32.mrf.mxu0 }
 0x136   : > { %v6492_v17 = vpop.f32.mrf.mxu0  ;;  %1839 = vmatmul.mubr.bf16.gmra.mxu0 %v5965_v14 }
 0x137   : > { %1848 = vmatprep.mubr.bf16.mxu0 %v5988_v4 }
 0x138   : > { %v6497_v19 = vpop.f32.mrf.mxu0 }
 0x13a   : > { %v6499_v20 = vpop.f32.mrf.mxu0 }
 0x13c   : > { %v6504_v23 = vpop.f32.mrf.mxu0 }
 0x13e   : > { %v6506_v24 = vpop.f32.mrf.mxu0  ;;  %1849 = vmatmul.mubr.bf16.gmra.mxu0 %v5968_v21 }
 0x13f   : > { %1858 = vmatprep.mubr.bf16.mxu0 %v5988_v4  ;;  %v6528_v4 = vpop.f32.mrf.mxu1 }
 0x140   : > { %v6511_v26 = vpop.f32.mrf.mxu0 }
 0x141   : > { %7855 = vst [vmem:[#allocation3_spill] sm:$0xff] %v6511_v26  ;;  %v6534_v37 = vpop.f32.mrf.mxu1 }
 0x142   : > { %v6513_v27 = vpop.f32.mrf.mxu0 }
 0x143   : > { %7856 = vst [vmem:[#allocation4_spill] sm:$0xff] %v6513_v27  ;;  %v6540_v40 = vpop.f32.mrf.mxu1 }
 0x144   : > { %v6518_v30 = vpop.f32.mrf.mxu0 }
 0x145   : > { %7857 = vst [vmem:[#allocation5_spill] sm:$0xff] %v6518_v30  ;;  %v6546_v43 = vpop.f32.mrf.mxu1 }
 0x146   : > { %v6520_v31 = vpop.f32.mrf.mxu0  ;;  %1859 = vmatmul.mubr.bf16.gmra.mxu0 %v5969_v28 }
 0x147   : > { %7858 = vst [vmem:[#allocation6_spill] sm:$0xff] %v6520_v31  ;;  %v6552_v63 = vpop.f32.mrf.mxu1 }
 0x148   : > { %v6524_v33 = vpop.f32.mrf.mxu0 }
 0x149   : > { %7859 = vst [vmem:[#allocation7_spill] sm:$0xff] %v6524_v33  ;;  %v6558_v21 = vpop.f32.mrf.mxu1 }
 0x14a   : > { %v6526_v34 = vpop.f32.mrf.mxu0 }
 0x14b   : > { %7860 = vst [vmem:[#allocation8_spill] sm:$0xff] %v6526_v34 }
 0x14c   : > { %v6530_v35 = vpop.f32.mrf.mxu0 }
 0x14d   : > { %7861 = vst [vmem:[#allocation9_spill] sm:$0xff] %v6530_v35 }
 0x14e   : > { %v6532_v36 = vpop.f32.mrf.mxu0 }
 0x14f   : > { %7862 = vst [vmem:[#allocation10_spill] sm:$0xff] %v6532_v36 }
 0x150   : > { %v6536_v38 = vpop.f32.mrf.mxu0 }
 0x151   : > { %7863 = vst [vmem:[#allocation11_spill] sm:$0xff] %v6536_v38 }
 0x152   : > { %v6538_v39 = vpop.f32.mrf.mxu0 }
 0x153   : > { %7864 = vst [vmem:[#allocation12_spill] sm:$0xff] %v6538_v39 }
 0x154   : > { %v6542_v41 = vpop.f32.mrf.mxu0 }
 0x155   : > { %7865 = vst [vmem:[#allocation13_spill] sm:$0xff] %v6542_v41  ;;  %v6564_v41 = vpop.f32.mrf.mxu1 }
 0x156   : > { %v6544_v42 = vpop.f32.mrf.mxu0 }
 0x157   : > { %7866 = vst [vmem:[#allocation14_spill] sm:$0xff] %v6544_v42 }
 0x158   : > { %v6548_v49 = vpop.f32.mrf.mxu0 }
 0x159   : > { %7867 = vst [vmem:[#allocation15_spill] sm:$0xff] %v6548_v49  ;;  %v6570_v49 = vpop.f32.mrf.mxu1 }
 0x15a   : > { %v6550_v56 = vpop.f32.mrf.mxu0 }
 0x15b   : > { %7868 = vst [vmem:[#allocation16_spill] sm:$0xff] %v6550_v56 }
 0x15c   : > { %v6554_v7 = vpop.f32.mrf.mxu0 }
 0x15d   : > { %7869 = vst [vmem:[#allocation17_spill] sm:$0xff] %v6554_v7  ;;  %v6576_v7 = vpop.f32.mrf.mxu1 }
 0x15e   : > { %v6556_v14 = vpop.f32.mrf.mxu0  ;;  %7877 = vst [vmem:[#allocation25_spill] sm:$0xff] %v6576_v7 }
 0x15f   : > { %7870 = vst [vmem:[#allocation18_spill] sm:$0xff] %v6556_v14 }
 0x160   : > { %v6560_v28 = vpop.f32.mrf.mxu0 }
 0x161   : > { %7871 = vst [vmem:[#allocation19_spill] sm:$0xff] %v6560_v28  ;;  %v6582_v28 = vpop.f32.mrf.mxu1 }
 0x162   : > { %v6562_v39 = vpop.f32.mrf.mxu0  ;;  %7880 = vst [vmem:[#allocation28_spill] sm:$0xff] %v6582_v28 }
 0x163   : > { %7872 = vst [vmem:[#allocation20_spill] sm:$0xff] %v6562_v39 }
 0x164   : > { %v6566_v42 = vpop.f32.mrf.mxu0 }
 0x165   : > { %7873 = vst [vmem:[#allocation21_spill] sm:$0xff] %v6566_v42  ;;  %v6588_v42 = vpop.f32.mrf.mxu1 }
 0x166   : > { %v6568_v38 = vpop.f32.mrf.mxu0  ;;  %7883 = vst [vmem:[#allocation31_spill] sm:$0xff] %v6588_v42 }
 0x167   : > { %7874 = vst [vmem:[#allocation22_spill] sm:$0xff] %v6568_v38 }
 0x168   : > { %v6572_v56 = vpop.f32.mrf.mxu0 }
 0x169   : > { %7875 = vst [vmem:[#allocation23_spill] sm:$0xff] %v6572_v56  ;;  %v6594_v56 = vpop.f32.mrf.mxu1 }
 0x16a   : > { %v6574_v36 = vpop.f32.mrf.mxu0  ;;  %7886 = vst [vmem:[#allocation34_spill] sm:$0xff] %v6594_v56 }
 0x16b   : > { %7876 = vst [vmem:[#allocation24_spill] sm:$0xff] %v6574_v36 }
 0x16c   : > { %v6578_v14 = vpop.f32.mrf.mxu0 }
 0x16d   : > { %7878 = vst [vmem:[#allocation26_spill] sm:$0xff] %v6578_v14  ;;  %v7847_v14 = vlaneseq }
 0x16e   : > { %v6580_v35 = vpop.f32.mrf.mxu0 }
 0x16f   : > { %7879 = vst [vmem:[#allocation27_spill] sm:$0xff] %v6580_v35  ;;  %v6600_v35 = vpop.f32.mrf.mxu1 }
 0x170   : > { %v6584_v39 = vpop.f32.mrf.mxu0  ;;  %7889 = vst [vmem:[#allocation37_spill] sm:$0xff] %v6600_v35 }
 0x171   : > { %7881 = vst [vmem:[#allocation29_spill] sm:$0xff] %v6584_v39  ;;  %v6609_v42 = vpop.f32.mrf.mxu1 }
 0x172   : > { %v6586_v34 = vpop.f32.mrf.mxu0  ;;  %7893 = vst [vmem:[#allocation41_spill] sm:$0xff] %v6609_v42 }
 0x173   : > { %7882 = vst [vmem:[#allocation30_spill] sm:$0xff] %v6586_v34  ;;  %v6607_v34 = vshrl.u32 %v7847_v14, 7  ;;  %v6621_v35 = vpop.f32.mrf.mxu1 }
 0x174   : > { %v6590_v38 = vpop.f32.mrf.mxu0  ;;  %7897 = vst [vmem:[#allocation45_spill] sm:$0xff] %v6621_v35 }
 0x175   : > { %7884 = vst [vmem:[#allocation32_spill] sm:$0xff] %v6590_v38  ;;  %7892 = vst [vmem:[#allocation40_spill] sm:$0xff] %v6607_v34  ;;  %v6626_v14 = vsub.s32 1, %v6607_v34 }
 0x176   : > { %v6592_v33 = vpop.f32.mrf.mxu0 }
 0x177   : > { %7885 = vst [vmem:[#allocation33_spill] sm:$0xff] %v6592_v33  ;;  %7899 = vst [vmem:[#allocation47_spill] sm:$0xff] %v6626_v14 }
 0x178   : > { %v6596_v36 = vpop.f32.mrf.mxu0 }
 0x179   : > { %7887 = vst [vmem:[#allocation35_spill] sm:$0xff] %v6596_v36  ;;  %v6616_v36 = vsub.s32 0, %v6607_v34 }
 0x17a   : > { %v6598_v31 = vpop.f32.mrf.mxu0 }
 0x17b   : > { %7888 = vst [vmem:[#allocation36_spill] sm:$0xff] %v6598_v31  ;;  %7896 = vst [vmem:[#allocation44_spill] sm:$0xff] %v6616_v36  ;;  %v462_v31 = vld [vmem:[%s7841_s2] sm:$0x3] }
 0x17c   : > { %v6602_v28 = vpop.f32.mrf.mxu0  ;;  %v6638_v56 = vrot.slane %v462_v31, %v6626_v14 }
 0x17d   : > { %7890 = vst [vmem:[#allocation38_spill] sm:$0xff] %v6602_v28 }
 0x17e   : > { %v6604_v39 = vpop.f32.mrf.mxu0 }
 0x17f   : > { %7891 = vst [vmem:[#allocation39_spill] sm:$0xff] %v6604_v39 }
 0x180   : > { %v6611_v38 = vpop.f32.mrf.mxu0 }
 0x181   : > { %7894 = vst [vmem:[#allocation42_spill] sm:$0xff] %v6611_v38  ;;  %v6631_v38 = vrot.slane %v462_v31, %v6616_v36  ;;  %v1327_v36 = vadd.f32 %v6423_v45, %v6638_v56  ;;  %v1331_v31 = vadd.f32 %v6432_v50, %v6638_v56 }
 0x182   : > { %v6613_v33 = vpop.f32.mrf.mxu0 }
 0x183   : > { %7895 = vst [vmem:[#allocation43_spill] sm:$0xff] %v6613_v33  ;;  %v6633_v33 = vpop.f32.mrf.mxu1  ;;  %v1335_v45 = vadd.f32 %v6436_v52, %v6631_v38 }
 0x184   : > { %v6623_v28 = vpop.f32.mrf.mxu0  ;;  %7901 = vst [vmem:[#allocation49_spill] sm:$0xff] %v6633_v33 }
 0x185   : > { %7898 = vst [vmem:[#allocation46_spill] sm:$0xff] %v6623_v28  ;;  %v1325_v28 = vadd.f32 %v6420_v44, %v6631_v38  ;;  %v6644_v35 = vpop.f32.mrf.mxu1  ;;  %v1520_v44 = vadd.f32 %v6429_v48, %v1327_v36  ;;  %v1339_v48 = vadd.f32 %v6443_v55, %v6631_v38  ;;  %v1528_v52 = vadd.f32 %v6446_v57, %v1335_v45 }
 0x186   : > { %v6628_v39 = vpop.f32.mrf.mxu0  ;;  %7904 = vst [vmem:[#allocation52_spill] sm:$0xff] %v6644_v35 }
 0x187   : > { %7900 = vst [vmem:[#allocation48_spill] sm:$0xff] %v6628_v39  ;;  %v1329_v39 = vadd.f32 %v6427_v47, %v6631_v38  ;;  %v6655_v14 = vpop.f32.mrf.mxu1  ;;  %v1524_v47 = vadd.f32 %v6439_v53, %v1331_v31  ;;  %v1341_v53 = vadd.f32 %v6448_v58, %v6638_v56  ;;  %v1532_v55 = vadd.f32 %v6460_v0, %v1339_v48 }
 0x188   : > { %v6635_v42 = vpop.f32.mrf.mxu0  ;;  %7906 = vst [vmem:[#allocation54_spill] sm:$0xff] %v6655_v14  ;;  %v2396_v14 = vld [vmem:[#allocation2] sm:$0x1] }
 0x189   : > { %7902 = vst [vmem:[#allocation50_spill] sm:$0xff] %v6635_v42  ;;  %v1518_v42 = vadd.f32 %v6425_v46, %v1325_v28  ;;  %v1522_v35 = vadd.f32 %v6434_v51, %v1329_v39  ;;  %v1337_v46 = vadd.f32 %v6441_v54, %v6638_v56  ;;  %v6664_v50 = vpop.f32.mrf.mxu1  ;;  %2399 = vperm.xlu1 %5730, %v2396_v14  }
 0x18a   : > { %v6640_v30 = vpop.f32.mrf.mxu0  ;;  %v1345_v14 = vadd.f32 %v6450_v59, %v6631_v38 }
 0x18b   : > { %7903 = vst [vmem:[#allocation51_spill] sm:$0xff] %v6640_v30  ;;  %v1530_v31 = vadd.f32 %v6453_v60, %v1337_v46  ;;  %v1349_v60 = vadd.f32 %v6457_v62, %v6631_v38 }
 0x18c   : > { %v6646_v34 = vpop.f32.mrf.mxu0  ;;  %v1538_v59 = vadd.f32 %v6474_v8, %v1345_v14 }
 0x18d   : > { %7905 = vst [vmem:[#allocation53_spill] sm:$0xff] %v6646_v34 }
 0x18e   : > { %v1710_v33 = vpop.f32.mrf.mxu0 }
 0x18f   : > { %v1711_v34 = vadd.f32 %v1710_v33, %v1518_v42  ;;  %v6671_v42 = vpop.f32.mrf.mxu1 }
 0x190   : > { %v1712_v30 = vpop.f32.mrf.mxu0 }
 0x191   : > { %v1713_v27 = vadd.f32 %v1712_v30, %v1520_v44  ;;  %v1869_v51 = vmax.f32 %v1711_v34, 0.0  ;;  %v1534_v44 = vadd.f32 %v6467_v3, %v1341_v53  ;;  %v1351_v3 = vadd.f32 %v6462_v1, %v6638_v56 }
 0x192   : > { %v1714_v7 = vpop.f32.mrf.mxu0 }
 0x193   : > { %v1715_v26 = vadd.f32 %v1714_v7, %v1522_v35  ;;  %v1870_v30 = vmax.f32 %v1713_v27, 0.0  ;;  %v1347_v27 = vadd.f32 %v6455_v61, %v6638_v56 }
 0x194   : > { %v1716_v28 = vpop.f32.mrf.mxu0 }
 0x195   : > { %v1871_v33 = vmax.f32 %v1715_v26, 0.0  ;;  %v1717_v36 = vadd.f32 %v1716_v28, %v1524_v47  ;;  %v6680_v47 = vpop.f32.mrf.mxu1  ;;  %v1540_v53 = vadd.f32 %v6481_v11, %v1347_v27  ;;  %v1359_v11 = vadd.f32 %v6471_v6, %v6631_v38 }
 0x196   : > { %v1720_v39 = vpop.f32.mrf.mxu0 }
 0x197   : > { %v1933_v35 = vpack.c.bf16 %v1871_v33, %v1869_v51  ;;  %v1872_v54 = vmax.f32 %v1717_v36, 0.0  ;;  %v1721_v26 = vadd.f32 %v1720_v39, %v1528_v52  ;;  %v6687_v61 = vpop.f32.mrf.mxu1 }
 0x198   : > { %v1722_v7 = vpop.f32.mrf.mxu0 }
 0x199   : > { %v1934_v34 = vpack.c.bf16 %v1872_v54, %v1870_v30  ;;  %v1723_v45 = vadd.f32 %v1722_v7, %v1530_v31  ;;  %v1873_v0 = vmax.f32 %v1721_v26, 0.0  ;;  %v1542_v30 = vadd.f32 %v6488_v15, %v1349_v60 }
 0x19a   : > { %v1724_v57 = vpop.f32.mrf.mxu0  ;;  %v1355_v54 = vadd.f32 %v6464_v2, %v6631_v38  ;;  %v1544_v7 = vadd.f32 %v6495_v18, %v1351_v3  ;;  %v1361_v18 = vadd.f32 %v6476_v9, %v6638_v56  ;;  %v1367_v3 = vadd.f32 %v6483_v12, %v6638_v56 }
 0x19b   : > { %v1725_v58 = vadd.f32 %v1724_v57, %v1532_v55  ;;  %2132 = vmatprep.mubr.bf16.mxu1 %v1934_v34  ;;  %v1874_v33 = vmax.f32 %v1723_v45, 0.0  ;;  %v1357_v55 = vadd.f32 %v6469_v5, %v6638_v56  ;;  %v6696_v34 = vpop.f32.mrf.mxu1 }
 0x19c   : > { %v1726_v28 = vpop.f32.mrf.mxu0  ;;  %2133 = vmatmul.mubr.bf16.vlgmr.msra.gmra.mxu1 %v1933_v35  ;;  %v1548_v2 = vadd.f32 %v6502_v22, %v1355_v54 }
 0x19d   : > { %v1875_v46 = vmax.f32 %v1725_v58, 0.0  ;;  %v1727_v48 = vadd.f32 %v1726_v28, %v1534_v44  ;;  %v6703_v5 = vpop.f32.mrf.mxu1  ;;  %v1550_v60 = vadd.f32 %v6509_v25, %v1357_v55  ;;  %v1369_v25 = vadd.f32 %v6485_v13, %v6631_v38 }
 0x19e   : > { %v1730_v51 = vpop.f32.mrf.mxu0 }
 0x19f   : > { %v1935_v36 = vpack.c.bf16 %v1875_v46, %v1873_v0  ;;  %v1876_v52 = vmax.f32 %v1727_v48, 0.0  ;;  %v1731_v35 = vadd.f32 %v1730_v51, %v1538_v59  ;;  %v1552_v0 = vadd.f32 %v6516_v29, %v1359_v11 }
 0x1a0   : > { %v1732_v39 = vpop.f32.mrf.mxu0  ;;  %v1365_v48 = vadd.f32 %v6478_v10, %v6631_v38  ;;  %v1554_v59 = vadd.f32 %v6522_v32, %v1361_v18  ;;  %v1371_v32 = vadd.f32 %v6490_v16, %v6638_v56  ;;  %v1377_v11 = vadd.f32 %v6497_v19, %v6638_v56 }
 0x1a1   : > { %v1936_v62 = vpack.c.bf16 %v1876_v52, %v1874_v33  ;;  %v1733_v31 = vadd.f32 %v1732_v39, %v1540_v53  ;;  %v1877_v15 = vmax.f32 %v1731_v35, 0.0  ;;  %v6712_v33 = vpop.f32.mrf.mxu1 }
 0x1a2   : > { %v1734_v8 = vpop.f32.mrf.mxu0  ;;  %v1558_v10 = vadd.f32 %v6528_v4, %v1365_v48  ;;  %v1564_v55 = vadd.f32 %v6546_v43, %v1371_v32  ;;  %v1381_v43 = vadd.f32 %v6504_v23, %v6638_v56 }
 0x1a3   : > { %v1735_v1 = vadd.f32 %v1734_v8, %v1542_v30  ;;  %2140 = vmatprep.mubr.bf16.mxu1 %v1936_v62  ;;  %v1878_v45 = vmax.f32 %v1733_v31, 0.0  ;;  %v6719_v12 = vpop.f32.mrf.mxu1  ;;  %v1560_v8 = vadd.f32 %v6534_v37, %v1367_v3  ;;  %v1379_v37 = vadd.f32 %v6499_v20, %v6631_v38 }
 0x1a4   : > { %v1736_v26 = vpop.f32.mrf.mxu0  ;;  %2141 = vmatmul.mubr.bf16.gmra.mxu1 %v1935_v36 }
 0x1a5   : > { %v1879_v14 = vmax.f32 %v1735_v1, 0.0  ;;  %v1737_v57 = vadd.f32 %v1736_v26, %v1544_v7  ;;  %v1562_v7 = vadd.f32 %v6540_v40, %v1369_v25  ;;  %v1375_v1 = vadd.f32 %v6492_v17, %v6631_v38 }
 0x1a6   : > { %v1740_v44 = vpop.f32.mrf.mxu0 }
 0x1a7   : > { %v1937_v58 = vpack.c.bf16 %v1879_v14, %v1877_v15  ;;  %v1880_v27 = vmax.f32 %v1737_v57, 0.0  ;;  %v1741_v46 = vadd.f32 %v1740_v44, %v1548_v2  ;;  %v6728_v15 = vpop.f32.mrf.mxu1  ;;  %v1568_v17 = vadd.f32 %v6552_v63, %v1375_v1  ;;  %v7913_v1 = vld [vmem:[#allocation6_spill] sm:$0xff] }
 0x1a8   : > { %v1742_v28 = vpop.f32.mrf.mxu0 }
 0x1a9   : > { %v1938_v6 = vpack.c.bf16 %v1880_v27, %v1878_v45  ;;  %v1743_v51 = vadd.f32 %v1742_v28, %v1550_v60  ;;  %v1881_v29 = vmax.f32 %v1741_v46, 0.0  ;;  %v6735_v19 = vpop.f32.mrf.mxu1  ;;  %v1570_v28 = vadd.f32 %v6558_v21, %v1377_v11 }
 0x1aa   : > { %v1744_v22 = vpop.f32.mrf.mxu0  ;;  %v1572_v60 = vadd.f32 %v6564_v41, %v1379_v37  ;;  %v1574_v46 = vadd.f32 %v6570_v49, %v1381_v43  ;;  %v7908_v41 = vld [vmem:[#allocation4_spill] sm:$0xff]  ;;  %v7910_v49 = vld [vmem:[#allocation5_spill] sm:$0xff]  ;;  %v7915_v37 = vld [vmem:[#allocation7_spill] sm:$0xff] }
 0x1ab   : > { %v1745_v9 = vadd.f32 %v1744_v22, %v1552_v0  ;;  %2148 = vmatprep.mubr.bf16.mxu1 %v1938_v6  ;;  %v1882_v30 = vmax.f32 %v1743_v51, 0.0  ;;  %v1385_v6 = vadd.f32 %v6506_v24, %v6631_v38  ;;  %v7907_v22 = vld [vmem:[#allocation3_spill] sm:$0xff]  ;;  %v6744_v51 = vpop.f32.mrf.mxu1  ;;  %v1389_v21 = vadd.f32 %v7908_v41, %v6631_v38  ;;  %v7909_v24 = vld [vmem:[#allocation25_spill] sm:$0xff] }
 0x1ac   : > { %v1746_v36 = vpop.f32.mrf.mxu0  ;;  %2149 = vmatmul.mubr.bf16.gmra.mxu1 %v1937_v58 }
 0x1ad   : > { %v1883_v52 = vmax.f32 %v1745_v9, 0.0  ;;  %v1747_v39 = vadd.f32 %v1746_v36, %v1554_v59  ;;  %v1387_v59 = vadd.f32 %v7907_v22, %v6638_v56 }
 0x1ae   : > { %v1750_v53 = vpop.f32.mrf.mxu0 }
 0x1af   : > { %v1939_v62 = vpack.c.bf16 %v1883_v52, %v1881_v29  ;;  %v1884_v35 = vmax.f32 %v1747_v39, 0.0  ;;  %v1751_v31 = vadd.f32 %v1750_v53, %v1558_v10  ;;  %v1578_v29 = vadd.f32 %v7909_v24, %v1385_v6  ;;  %v7922_v24 = vld [vmem:[#allocation49_spill] sm:$0xff] }
 0x1b0   : > { %v1752_v54 = vpop.f32.mrf.mxu0  ;;  %v1391_v39 = vadd.f32 %v7910_v49, %v6638_v56 }
 0x1b1   : > { %v1940_v13 = vpack.c.bf16 %v1884_v35, %v1882_v30  ;;  %v1753_v26 = vadd.f32 %v1752_v54, %v1560_v8  ;;  %v1885_v40 = vmax.f32 %v1751_v31, 0.0  ;;  %v6751_v30 = vpop.f32.mrf.mxu1  ;;  %v7911_v35 = vld [vmem:[#allocation28_spill] sm:$0xff]  ;;  %v7912_v8 = vld [vmem:[#allocation31_spill] sm:$0xff] }
 0x1b2   : > { %v1754_v4 = vpop.f32.mrf.mxu0  ;;  %v1580_v54 = vadd.f32 %v7911_v35, %v1387_v59  ;;  %v7920_v59 = vld [vmem:[#allocation45_spill] sm:$0xff] }
 0x1b3   : > { %v1755_v16 = vadd.f32 %v1754_v4, %v1562_v7  ;;  %2156 = vmatprep.mubr.bf16.mxu1 %v1940_v13  ;;  %v1886_v18 = vmax.f32 %v1753_v26, 0.0  ;;  %v1582_v7 = vadd.f32 %v7912_v8, %v1389_v21  ;;  %v1395_v4 = vadd.f32 %v7913_v1, %v6631_v38  ;;  %v7914_v26 = vld [vmem:[#allocation34_spill] sm:$0xff] }
 0x1b4   : > { %v1756_v14 = vpop.f32.mrf.mxu0  ;;  %2157 = vmatmul.mubr.bf16.gmra.mxu1 %v1939_v62 }
 0x1b5   : > { %v1887_v57 = vmax.f32 %v1755_v16, 0.0  ;;  %v1757_v2 = vadd.f32 %v1756_v14, %v1564_v55  ;;  %v1584_v16 = vadd.f32 %v7914_v26, %v1391_v39  ;;  %v7923_v39 = vld [vmem:[#allocation11_spill] sm:$0xff] }
 0x1b6   : > { %v1760_v44 = vpop.f32.mrf.mxu0 }
 0x1b7   : > { %v1941_v45 = vpack.c.bf16 %v1887_v57, %v1885_v40  ;;  %v1888_v58 = vmax.f32 %v1757_v2, 0.0  ;;  %v1761_v0 = vadd.f32 %v1760_v44, %v1568_v17  ;;  %v1397_v40 = vadd.f32 %v7915_v37, %v6638_v56  ;;  %v6760_v57 = vpop.f32.mrf.mxu1  ;;  %v7916_v17 = vld [vmem:[#allocation8_spill] sm:$0xff] }
 0x1b8   : > { %v1762_v27 = vpop.f32.mrf.mxu0  ;;  %v1399_v44 = vadd.f32 %v7916_v17, %v6631_v38 }
 0x1b9   : > { %v1942_v20 = vpack.c.bf16 %v1888_v58, %v1886_v18  ;;  %v1763_v48 = vadd.f32 %v1762_v27, %v1570_v28  ;;  %v1889_v3 = vmax.f32 %v1761_v0, 0.0  ;;  %v7917_v58 = vld [vmem:[#allocation37_spill] sm:$0xff] }
 0x1ba   : > { %v1764_v63 = vpop.f32.mrf.mxu0  ;;  %v1588_v27 = vadd.f32 %v7917_v58, %v1395_v4  ;;  %v7926_v4 = vld [vmem:[#allocation13_spill] sm:$0xff] }
 0x1bb   : > { %v1765_v23 = vadd.f32 %v1764_v63, %v1572_v60  ;;  %2164 = vmatprep.mubr.bf16.mxu1 %v1942_v20  ;;  %v1890_v10 = vmax.f32 %v1763_v48, 0.0  ;;  %v7918_v60 = vld [vmem:[#allocation9_spill] sm:$0xff] }
 0x1bc   : > { %v1766_v9 = vpop.f32.mrf.mxu0  ;;  %2165 = vmatmul.mubr.bf16.gmra.mxu1 %v1941_v45  ;;  %v1401_v20 = vadd.f32 %v7918_v60, %v6638_v56 }
 0x1bd   : > { %v1891_v36 = vmax.f32 %v1765_v23, 0.0  ;;  %v1767_v25 = vadd.f32 %v1766_v9, %v1574_v46  ;;  %v6767_v46 = vpop.f32.mrf.mxu1  ;;  %v7919_v23 = vld [vmem:[#allocation41_spill] sm:$0xff]  ;;  %v1592_v9 = vadd.f32 %v7920_v59, %v1399_v44 }
 0x1be   : > { %v1770_v52 = vpop.f32.mrf.mxu0  ;;  %v1590_v22 = vadd.f32 %v7919_v23, %v1397_v40  ;;  %v7927_v40 = vld [vmem:[#allocation54_spill] sm:$0xff] }
 0x1bf   : > { %v1943_v53 = vpack.c.bf16 %v1891_v36, %v1889_v3  ;;  %v1892_v32 = vmax.f32 %v1767_v25, 0.0  ;;  %v1771_v31 = vadd.f32 %v1770_v52, %v1578_v29  ;;  %v7921_v3 = vld [vmem:[#allocation10_spill] sm:$0xff]  ;;  %v1594_v29 = vadd.f32 %v7922_v24, %v1401_v20  ;;  %v7929_v20 = vld [vmem:[#allocation15_spill] sm:$0xff] }
 0x1c0   : > { %v1772_v62 = vpop.f32.mrf.mxu0  ;;  %v1405_v36 = vadd.f32 %v7921_v3, %v6631_v38 }
 0x1c1   : > { %v1944_v13 = vpack.c.bf16 %v1892_v32, %v1890_v10  ;;  %v1773_v11 = vadd.f32 %v1772_v62, %v1580_v54  ;;  %v1893_v43 = vmax.f32 %v1771_v31, 0.0  ;;  %v1407_v10 = vadd.f32 %v7923_v39, %v6638_v56  ;;  %v7924_v62 = vld [vmem:[#allocation12_spill] sm:$0xff] }
 0x1c2   : > { %v1774_v55 = vpop.f32.mrf.mxu0  ;;  %v1409_v35 = vadd.f32 %v7924_v62, %v6631_v38 }
 0x1c3   : > { %v1775_v14 = vadd.f32 %v1774_v55, %v1582_v7  ;;  %2172 = vmatprep.mubr.bf16.mxu1 %v1944_v13  ;;  %v1894_v0 = vmax.f32 %v1773_v11, 0.0  ;;  %v7925_v13 = vld [vmem:[#allocation52_spill] sm:$0xff]  ;;  %v1411_v55 = vadd.f32 %v7926_v4, %v6638_v56 }
 0x1c4   : > { %v1776_v2 = vpop.f32.mrf.mxu0  ;;  %2173 = vmatmul.mubr.bf16.gmra.mxu1 %v1943_v53  ;;  %v6776_v53 = vpop.f32.mrf.mxu1  ;;  %v1598_v31 = vadd.f32 %v7925_v13, %v1405_v36  ;;  %v1602_v17 = vadd.f32 %v6664_v50, %v1409_v35  ;;  %v7930_v50 = vld [vmem:[#allocation16_spill] sm:$0xff] }
 0x1c5   : > { %v1895_v18 = vmax.f32 %v1775_v14, 0.0  ;;  %v1777_v45 = vadd.f32 %v1776_v2, %v1584_v16  ;;  %v1600_v2 = vadd.f32 %v7927_v40, %v1407_v10 }
 0x1c6   : > { %v1780_v28 = vpop.f32.mrf.mxu0  ;;  %v6783_v14 = vpop.f32.mrf.mxu1 }
 0x1c7   : > { %v1945_v6 = vpack.c.bf16 %v1895_v18, %v1893_v43  ;;  %v1896_v63 = vmax.f32 %v1777_v45, 0.0  ;;  %v1781_v21 = vadd.f32 %v1780_v28, %v1588_v27  ;;  %v7928_v18 = vld [vmem:[#allocation14_spill] sm:$0xff]  ;;  %v1604_v27 = vadd.f32 %v6671_v42, %v1411_v55  ;;  %v7931_v42 = vld [vmem:[#allocation17_spill] sm:$0xff] }
 0x1c8   : > { %v1782_v48 = vpop.f32.mrf.mxu0  ;;  %v1415_v45 = vadd.f32 %v7928_v18, %v6631_v38 }
 0x1c9   : > { %v1946_v41 = vpack.c.bf16 %v1896_v63, %v1894_v0  ;;  %v1783_v52 = vadd.f32 %v1782_v48, %v1590_v22  ;;  %v1897_v54 = vmax.f32 %v1781_v21, 0.0  ;;  %v1417_v0 = vadd.f32 %v7929_v20, %v6638_v56 }
 0x1ca   : > { %v1784_v25 = vpop.f32.mrf.mxu0  ;;  %v1419_v48 = vadd.f32 %v7930_v50, %v6631_v38  ;;  %v1421_v21 = vadd.f32 %v7931_v42, %v6638_v56  ;;  %v7937_v50 = vld [vmem:[#allocation23_spill] sm:$0xff] }
 0x1cb   : > { %v1785_v49 = vadd.f32 %v1784_v25, %v1592_v9  ;;  %2180 = vmatprep.mubr.bf16.mxu1 %v1946_v41  ;;  %v1898_v26 = vmax.f32 %v1783_v52, 0.0  ;;  %v1608_v9 = vadd.f32 %v6680_v47, %v1415_v45  ;;  %v1610_v52 = vadd.f32 %v6687_v61, %v1417_v0  ;;  %v7934_v61 = vld [vmem:[#allocation20_spill] sm:$0xff] }
 0x1cc   : > { %v1786_v32 = vpop.f32.mrf.mxu0  ;;  %2181 = vmatmul.mubr.bf16.gmra.mxu1 %v1945_v6  ;;  %v6792_v6 = vpop.f32.mrf.mxu1  ;;  %v1614_v35 = vadd.f32 %v6703_v5, %v1421_v21  ;;  %v7935_v5 = vld [vmem:[#allocation21_spill] sm:$0xff] }
 0x1cd   : > { %v1899_v8 = vmax.f32 %v1785_v49, 0.0  ;;  %v1787_v7 = vadd.f32 %v1786_v32, %v1594_v29  ;;  %v1612_v49 = vadd.f32 %v6696_v34, %v1419_v48  ;;  %v7932_v32 = vld [vmem:[#allocation18_spill] sm:$0xff]  ;;  %v1429_v34 = vadd.f32 %v7934_v61, %v6631_v38 }
 0x1ce   : > { %v1790_v1 = vpop.f32.mrf.mxu0  ;;  %v6799_v24 = vpop.f32.mrf.mxu1  ;;  %v1425_v62 = vadd.f32 %v7932_v32, %v6631_v38  ;;  %v1437_v48 = vadd.f32 %v7937_v50, %v6638_v56 }
 0x1cf   : > { %v1947_v16 = vpack.c.bf16 %v1899_v8, %v1897_v54  ;;  %v1900_v11 = vmax.f32 %v1787_v7, 0.0  ;;  %v1791_v43 = vadd.f32 %v1790_v1, %v1598_v31  ;;  %v7933_v7 = vld [vmem:[#allocation19_spill] sm:$0xff]  ;;  %v1622_v45 = vadd.f32 %v6728_v15, %v1429_v34 }
 0x1d0   : > { %v1792_v37 = vpop.f32.mrf.mxu0  ;;  %v1427_v13 = vadd.f32 %v7933_v7, %v6638_v56  ;;  %v6808_v31 = vpop.f32.mrf.mxu1 }
 0x1d1   : > { %v1948_v44 = vpack.c.bf16 %v1900_v11, %v1898_v26  ;;  %v1793_v28 = vadd.f32 %v1792_v37, %v1600_v2  ;;  %v1901_v23 = vmax.f32 %v1791_v43, 0.0  ;;  %v1431_v37 = vadd.f32 %v7935_v5, %v6638_v56 }
 0x1d2   : > { %v1794_v58 = vpop.f32.mrf.mxu0  ;;  %v1620_v18 = vadd.f32 %v6719_v12, %v1427_v13  ;;  %v7938_v12 = vld [vmem:[#allocation24_spill] sm:$0xff]  ;;  %v7941_v13 = vld [vmem:[#allocation29_spill] sm:$0xff] }
 0x1d3   : > { %v1795_v60 = vadd.f32 %v1794_v58, %v1602_v17  ;;  %2188 = vmatprep.mubr.bf16.mxu1 %v1948_v44  ;;  %v1902_v3 = vmax.f32 %v1793_v28, 0.0  ;;  %v6815_v44 = vpop.f32.mrf.mxu1  ;;  %v7936_v28 = vld [vmem:[#allocation22_spill] sm:$0xff]  ;;  %v1624_v20 = vadd.f32 %v6735_v19, %v1431_v37  ;;  %v1439_v15 = vadd.f32 %v7938_v12, %v6631_v38 }
 0x1d4   : > { %v1796_v63 = vpop.f32.mrf.mxu0  ;;  %2189 = vmatmul.mubr.bf16.gmra.mxu1 %v1947_v16  ;;  %v1618_v16 = vadd.f32 %v6712_v33, %v1425_v62  ;;  %v7939_v19 = vld [vmem:[#allocation26_spill] sm:$0xff] }
 0x1d5   : > { %v1903_v22 = vmax.f32 %v1795_v60, 0.0  ;;  %v1797_v59 = vadd.f32 %v1796_v63, %v1604_v27  ;;  %v1435_v60 = vadd.f32 %v7936_v28, %v6631_v38  ;;  %v7944_v28 = vld [vmem:[#allocation33_spill] sm:$0xff] }
 0x1d6   : > { %v1800_v41 = vpop.f32.mrf.mxu0 }
 0x1d7   : > { %v1949_v36 = vpack.c.bf16 %v1903_v22, %v1901_v23  ;;  %v1904_v25 = vmax.f32 %v1797_v59, 0.0  ;;  %v1801_v10 = vadd.f32 %v1800_v41, %v1608_v9  ;;  %v6824_v23 = vpop.f32.mrf.mxu1  ;;  %v1628_v42 = vadd.f32 %v6744_v51, %v1435_v60 }
 0x1d8   : > { %v1802_v29 = vpop.f32.mrf.mxu0  ;;  %v1455_v60 = vadd.f32 %v7944_v28, %v6631_v38 }
 0x1d9   : > { %v1950_v39 = vpack.c.bf16 %v1904_v25, %v1902_v3  ;;  %v1803_v54 = vadd.f32 %v1802_v29, %v1610_v52  ;;  %v1905_v4 = vmax.f32 %v1801_v10, 0.0  ;;  %v1441_v3 = vadd.f32 %v7939_v19, %v6638_v56  ;;  %v1653_v52 = vpop.f32.mrf.mxu1 }
 0x1da   : > { %v1804_v47 = vpop.f32.mrf.mxu0  ;;  %v1632_v10 = vadd.f32 %v6760_v57, %v1439_v15 }
 0x1db   : > { %v1805_v8 = vadd.f32 %v1804_v47, %v1612_v49  ;;  %2196 = vmatprep.mubr.bf16.mxu1 %v1950_v39  ;;  %v1906_v40 = vmax.f32 %v1803_v54, 0.0  ;;  %v1630_v39 = vadd.f32 %v6751_v30, %v1437_v48  ;;  %v7940_v47 = vld [vmem:[#allocation27_spill] sm:$0xff]  ;;  %v1634_v51 = vadd.f32 %v6767_v46, %v1441_v3  ;;  %v1657_v61 = vpop.f32.mrf.mxu1  ;;  %v7942_v30 = vld [vmem:[#allocation30_spill] sm:$0xff]  ;;  %v7943_v46 = vld [vmem:[#allocation32_spill] sm:$0xff] }
 0x1dc   : > { %v1806_v1 = vpop.f32.mrf.mxu0  ;;  %2197 = vmatmul.mubr.bf16.gmra.mxu1 %v1949_v36  ;;  %v1449_v57 = vadd.f32 %v7942_v30, %v6631_v38  ;;  %v1451_v5 = vadd.f32 %v7943_v46, %v6638_v56 }
 0x1dd   : > { %v1907_v55 = vmax.f32 %v1805_v8, 0.0  ;;  %v1807_v26 = vadd.f32 %v1806_v1, %v1614_v35  ;;  %v1445_v35 = vadd.f32 %v7940_v47, %v6631_v38  ;;  %v1447_v1 = vadd.f32 %v7941_v13, %v6638_v56 }
 0x1de   : > { %v1810_v11 = vpop.f32.mrf.mxu0 }
 0x1df   : > { %v1951_v2 = vpack.c.bf16 %v1907_v55, %v1905_v4  ;;  %v1908_v17 = vmax.f32 %v1807_v26, 0.0  ;;  %v1811_v27 = vadd.f32 %v1810_v11, %v1618_v16  ;;  %v1638_v16 = vadd.f32 %v6776_v53, %v1445_v35 }
 0x1e0   : > { %v1812_v43 = vpop.f32.mrf.mxu0  ;;  %v1644_v53 = vadd.f32 %v6799_v24, %v1451_v5  ;;  %v7947_v24 = vld [vmem:[#allocation38_spill] sm:$0xff] }
 0x1e1   : > { %v1952_v58 = vpack.c.bf16 %v1908_v17, %v1906_v40  ;;  %v1813_v0 = vadd.f32 %v1812_v43, %v1620_v18  ;;  %v1909_v59 = vmax.f32 %v1811_v27, 0.0  ;;  %v1659_v17 = vpop.f32.mrf.mxu1  ;;  %v1640_v18 = vadd.f32 %v6783_v14, %v1447_v1  ;;  %v7946_v14 = vld [vmem:[#allocation36_spill] sm:$0xff] }
 0x1e2   : > { %v1814_v33 = vpop.f32.mrf.mxu0 }
 0x1e3   : > { %v1815_v63 = vadd.f32 %v1814_v33, %v1622_v45  ;;  %2204 = vmatprep.mubr.bf16.mxu1 %v1952_v58  ;;  %v1910_v36 = vmax.f32 %v1813_v0, 0.0  ;;  %v1642_v45 = vadd.f32 %v6792_v6, %v1449_v57  ;;  %v1661_v48 = vpop.f32.mrf.mxu1  ;;  %v1459_v6 = vadd.f32 %v7946_v14, %v6631_v38 }
 0x1e4   : > { %v1816_v22 = vpop.f32.mrf.mxu0  ;;  %2205 = vmatmul.mubr.bf16.gmra.mxu1 %v1951_v2 }
 0x1e5   : > { %v1911_v9 = vmax.f32 %v1815_v63, 0.0  ;;  %v1817_v41 = vadd.f32 %v1816_v22, %v1624_v20  ;;  %v7945_v63 = vld [vmem:[#allocation35_spill] sm:$0xff] }
 0x1e6   : > { %v1820_v21 = vpop.f32.mrf.mxu0  ;;  %v1457_v50 = vadd.f32 %v7945_v63, %v6638_v56 }
 0x1e7   : > { %v1953_v25 = vpack.c.bf16 %v1911_v9, %v1909_v59  ;;  %v1912_v29 = vmax.f32 %v1817_v41, 0.0  ;;  %v1821_v62 = vadd.f32 %v1820_v21, %v1628_v42  ;;  %v1648_v9 = vadd.f32 %v6808_v31, %v1455_v60  ;;  %v7953_v60 = vld [vmem:[#allocation50_spill] sm:$0xff] }
 0x1e8   : > { %v1822_v49 = vpop.f32.mrf.mxu0  ;;  %v1461_v42 = vadd.f32 %v7947_v24, %v6638_v56 }
 0x1e9   : > { %v1954_v32 = vpack.c.bf16 %v1912_v29, %v1910_v36  ;;  %v1823_v8 = vadd.f32 %v1822_v49, %v1630_v39  ;;  %v1913_v4 = vmax.f32 %v1821_v62, 0.0  ;;  %v1663_v36 = vpop.f32.mrf.mxu1  ;;  %v1650_v29 = vadd.f32 %v6815_v44, %v1457_v50  ;;  %v7950_v44 = vld [vmem:[#allocation43_spill] sm:$0xff] }
 0x1ea   : > { %v1824_v54 = vpop.f32.mrf.mxu0  ;;  %v1652_v49 = vadd.f32 %v6824_v23, %v1459_v6  ;;  %v1654_v31 = vadd.f32 %v1653_v52, %v1461_v42  ;;  %v1469_v1 = vadd.f32 %v7950_v44, %v6631_v38  ;;  %v7955_v6 = vld [vmem:[#allocation53_spill] sm:$0xff] }
 0x1eb   : > { %v1825_v7 = vadd.f32 %v1824_v54, %v1632_v10  ;;  %2212 = vmatprep.mubr.bf16.mxu1 %v1954_v32  ;;  %v1914_v37 = vmax.f32 %v1823_v8, 0.0  ;;  %v7948_v32 = vld [vmem:[#allocation39_spill] sm:$0xff] }
 0x1ec   : > { %v1826_v34 = vpop.f32.mrf.mxu0  ;;  %2213 = vmatmul.mubr.bf16.gmra.mxu1 %v1953_v25  ;;  %v1465_v62 = vadd.f32 %v7948_v32, %v6631_v38 }
 0x1ed   : > { %v1915_v55 = vmax.f32 %v1825_v7, 0.0  ;;  %v1827_v26 = vadd.f32 %v1826_v34, %v1634_v51  ;;  %v7949_v51 = vld [vmem:[#allocation42_spill] sm:$0xff]  ;;  %v1667_v7 = vpop.f32.mrf.mxu1 }
 0x1ee   : > { %v1830_v11 = vpop.f32.mrf.mxu0  ;;  %v1467_v8 = vadd.f32 %v7949_v51, %v6638_v56  ;;  %v1658_v57 = vadd.f32 %v1657_v61, %v1465_v62  ;;  %v6876_v51 = vld [vmem:[%s7843_s4] ss:$0 sm:$0xff] }
 0x1ef   : > { %v1955_v40 = vpack.c.bf16 %v1915_v55, %v1913_v4  ;;  %v1916_v2 = vmax.f32 %v1827_v26, 0.0  ;;  %v1831_v27 = vadd.f32 %v1830_v11, %v1638_v16  ;;  %v7951_v55 = vld [vmem:[#allocation46_spill] sm:$0xff]  ;;  %v1669_v46 = vpop.f32.mrf.mxu1 }
 0x1f0   : > { %v1832_v43 = vpop.f32.mrf.mxu0  ;;  %v1471_v52 = vadd.f32 %v7951_v55, %v6638_v56 }
 0x1f1   : > { %v1956_v58 = vpack.c.bf16 %v1916_v2, %v1914_v37  ;;  %v1833_v20 = vadd.f32 %v1832_v43, %v1640_v18  ;;  %v1917_v12 = vmax.f32 %v1831_v27, 0.0  ;;  %v1660_v37 = vadd.f32 %v1659_v17, %v1467_v8  ;;  %v7952_v18 = vld [vmem:[#allocation48_spill] sm:$0xff] }
 0x1f2   : > { %v1834_v33 = vpop.f32.mrf.mxu0  ;;  %v1664_v27 = vadd.f32 %v1663_v36, %v1471_v52 }
 0x1f3   : > { %v1835_v0 = vadd.f32 %v1834_v33, %v1642_v45  ;;  %2220 = vmatprep.mubr.bf16.mxu1 %v1956_v58  ;;  %v1918_v21 = vmax.f32 %v1833_v20, 0.0  ;;  %v1475_v45 = vadd.f32 %v7952_v18, %v6631_v38  ;;  %v1477_v33 = vadd.f32 %v7953_v60, %v6638_v56 }
 0x1f4   : > { %v1836_v22 = vpop.f32.mrf.mxu0  ;;  %2221 = vmatmul.mubr.bf16.gmra.mxu1 %v1955_v40  ;;  %v1662_v40 = vadd.f32 %v1661_v48, %v1469_v1  ;;  %v6882_v1 = vld [vmem:[%s7844_s5] ss:$0 sm:$0xff] }
 0x1f5   : > { %v1919_v15 = vmax.f32 %v1835_v0, 0.0  ;;  %v1837_v59 = vadd.f32 %v1836_v22, %v1644_v53  ;;  %v1671_v53 = vpop.f32.mrf.mxu1  ;;  %v7954_v0 = vld [vmem:[#allocation51_spill] sm:$0xff]  ;;  %v1668_v22 = vadd.f32 %v1667_v7, %v1475_v45  ;;  %v1670_v42 = vadd.f32 %v1669_v46, %v1477_v33 }
 0x1f6   : > { %v1840_v41 = vpop.f32.mrf.mxu0  ;;  %v1479_v17 = vadd.f32 %v7954_v0, %v6631_v38 }
 0x1f7   : > { %v1957_v19 = vpack.c.bf16 %v1919_v15, %v1917_v12  ;;  %v1920_v3 = vmax.f32 %v1837_v59, 0.0  ;;  %v1841_v10 = vadd.f32 %v1840_v41, %v1648_v9  ;;  %v1481_v12 = vadd.f32 %v7955_v6, %v6638_v56  ;;  %v1673_v41 = vpop.f32.mrf.mxu1 }
 0x1f8   : > { %v1842_v25 = vpop.f32.mrf.mxu0 }
 0x1f9   : > { %v1958_v39 = vpack.c.bf16 %v1920_v3, %v1918_v21  ;;  %v1843_v35 = vadd.f32 %v1842_v25, %v1650_v29  ;;  %v1921_v23 = vmax.f32 %v1841_v10, 0.0  ;;  %v1672_v21 = vadd.f32 %v1671_v53, %v1479_v17 }
 0x1fa   : > { %v1844_v47 = vpop.f32.mrf.mxu0  ;;  %v1674_v25 = vadd.f32 %v1673_v41, %v1481_v12 }
 0x1fb   : > { %v1845_v54 = vadd.f32 %v1844_v47, %v1652_v49  ;;  %2228 = vmatprep.mubr.bf16.mxu1 %v1958_v39  ;;  %v1922_v26 = vmax.f32 %v1843_v35, 0.0 }
 0x1fc   : > { %v1846_v13 = vpop.f32.mrf.mxu0  ;;  %2229 = vmatmul.mubr.bf16.gmra.mxu1 %v1957_v19 }
 0x1fd   : > { %v1923_v34 = vmax.f32 %v1845_v54, 0.0  ;;  %v1847_v30 = vadd.f32 %v1846_v13, %v1654_v31 }
 0x1fe   : > { %v1850_v4 = vpop.f32.mrf.mxu0 }
 0x1ff   : > { %v1959_v16 = vpack.c.bf16 %v1923_v34, %v1921_v23  ;;  %v1924_v11 = vmax.f32 %v1847_v30, 0.0  ;;  %v1851_v43 = vadd.f32 %v1850_v4, %v1658_v57 }
 0x200   : > { %v1852_v5 = vpop.f32.mrf.mxu0 }
 0x201   : > { %v1960_v2 = vpack.c.bf16 %v1924_v11, %v1922_v26  ;;  %v1853_v28 = vadd.f32 %v1852_v5, %v1660_v37  ;;  %v1925_v63 = vmax.f32 %v1851_v43, 0.0 }
 0x202   : > { %v1854_v58 = vpop.f32.mrf.mxu0 }
 0x203   : > { %v1855_v61 = vadd.f32 %v1854_v58, %v1662_v40  ;;  %2236 = vmatprep.mubr.bf16.mxu1 %v1960_v2  ;;  %v1926_v15 = vmax.f32 %v1853_v28, 0.0 }
 0x204   : > { %v1856_v20 = vpop.f32.mrf.mxu0  ;;  %2237 = vmatmul.mubr.bf16.gmra.mxu1 %v1959_v16 }
 0x205   : > { %v1927_v50 = vmax.f32 %v1855_v61, 0.0  ;;  %v1857_v48 = vadd.f32 %v1856_v20, %v1664_v27 }
 0x206   : > { %v1860_v14 = vpop.f32.mrf.mxu0 }
 0x207   : > { %v1961_v59 = vpack.c.bf16 %v1927_v50, %v1925_v63  ;;  %v1928_v9 = vmax.f32 %v1857_v48, 0.0  ;;  %v1861_v3 = vadd.f32 %v1860_v14, %v1668_v22 }
 0x208   : > { %v1862_v24 = vpop.f32.mrf.mxu0 }
 0x209   : > { %v1962_v19 = vpack.c.bf16 %v1928_v9, %v1926_v15  ;;  %v1863_v38 = vadd.f32 %v1862_v24, %v1670_v42  ;;  %v1929_v39 = vmax.f32 %v1861_v3, 0.0 }
 0x20a   : > { %v1864_v36 = vpop.f32.mrf.mxu0 }
 0x20b   : > { %v1865_v29 = vadd.f32 %v1864_v36, %v1672_v21  ;;  %2244 = vmatprep.mubr.bf16.mxu1 %v1962_v19  ;;  %v1930_v56 = vmax.f32 %v1863_v38, 0.0 }
 0x20c   : > { %v1866_v49 = vpop.f32.mrf.mxu0  ;;  %2245 = vmatmul.mubr.bf16.gmra.mxu1 %v1961_v59 }
 0x20d   : > { %v1931_v10 = vmax.f32 %v1865_v29, 0.0  ;;  %v1867_v32 = vadd.f32 %v1866_v49, %v1674_v25 }
 0x20f   : > { %v1963_v62 = vpack.c.bf16 %v1931_v10, %v1929_v39  ;;  %v1932_v47 = vmax.f32 %v1867_v32, 0.0 }
 0x211   : > { %v1964_v31 = vpack.c.bf16 %v1932_v47, %v1930_v56 }
 0x213   : > { %2252 = vmatprep.mubr.bf16.mxu1 %v1964_v31 }
 0x214   : > { %2253 = vmatmul.mubr.bf16.gmra.mxu1 %v1963_v62 }
 0x25c   : > { %v5623_v35 = vpop.f32.mrf.mxu1 }
 0x25e   : > { %v5624_v54 = vpop.f32.mrf.mxu1 }
 0x25f   : > { %v5625_v8 = vadd.f32 %v5624_v54, %v5623_v35 }
 0x260   : > { %v5626_v7 = vpop.f32.mrf.mxu1 }
 0x261   : > { %v2135_v13 = vadd.f32 %v5625_v8, %v6876_v51 }
 0x262   : > { %v5627_v44 = vpop.f32.mrf.mxu1 }
 0x263   : > { %v5628_v23 = vadd.f32 %v5627_v44, %v5626_v7  ;;  %v2261_v34 = vmax.f32 %v2135_v13, 0.0 }
 0x264   : > { %v5629_v30 = vpop.f32.mrf.mxu1 }
 0x265   : > { %v2138_v57 = vadd.f32 %v5628_v23, %v6876_v51  ;;  %v2300_v4 = vmul.f32 %v6882_v1, %v2261_v34 }
 0x266   : > { %v5630_v55 = vpop.f32.mrf.mxu1 }
 0x267   : > { %v2262_v52 = vmax.f32 %v2138_v57, 0.0  ;;  %v5631_v26 = vadd.f32 %v5630_v55, %v5629_v30  ;;  %2332 = vadd.xlane.f32.xlu0 %v2300_v4 }
 0x268   : > { %v5632_v16 = vpop.f32.mrf.mxu1 }
 0x269   : > { %v2143_v11 = vadd.f32 %v5631_v26, %v6876_v51  ;;  %v2301_v46 = vmul.f32 %v6882_v1, %v2262_v52 }
 0x26a   : > { %v5633_v5 = vpop.f32.mrf.mxu1 }
 0x26b   : > { %v2263_v37 = vmax.f32 %v2143_v11, 0.0  ;;  %v5634_v40 = vadd.f32 %v5633_v5, %v5632_v16  ;;  %2334 = vadd.xlane.f32.xlu0 %v2301_v46 }
 0x26c   : > { %v5635_v2 = vpop.f32.mrf.mxu1 }
 0x26d   : > { %v2146_v43 = vadd.f32 %v5634_v40, %v6876_v51  ;;  %v2302_v18 = vmul.f32 %v6882_v1, %v2263_v37 }
 0x26e   : > { %v5636_v45 = vpop.f32.mrf.mxu1 }
 0x26f   : > { %v2264_v58 = vmax.f32 %v2146_v43, 0.0  ;;  %v5637_v27 = vadd.f32 %v5636_v45, %v5635_v2  ;;  %2336 = vadd.xlane.f32.xlu1 %v2302_v18 }
 0x270   : > { %v5638_v28 = vpop.f32.mrf.mxu1 }
 0x271   : > { %v2151_v61 = vadd.f32 %v5637_v27, %v6876_v51  ;;  %v2303_v60 = vmul.f32 %v6882_v1, %v2264_v58 }
 0x272   : > { %v5639_v33 = vpop.f32.mrf.mxu1 }
 0x273   : > { %v2265_v53 = vmax.f32 %v2151_v61, 0.0  ;;  %v5640_v20 = vadd.f32 %v5639_v33, %v5638_v28  ;;  %2338 = vadd.xlane.f32.xlu1 %v2303_v60 }
 0x274   : > { %v5641_v0 = vpop.f32.mrf.mxu1 }
 0x275   : > { %v2154_v17 = vadd.f32 %v5640_v20, %v6876_v51  ;;  %v2304_v63 = vmul.f32 %v6882_v1, %v2265_v53 }
 0x276   : > { %v5642_v50 = vpop.f32.mrf.mxu1 }
 0x277   : > { %v2266_v48 = vmax.f32 %v2154_v17, 0.0  ;;  %v5643_v22 = vadd.f32 %v5642_v50, %v5641_v0  ;;  %2340 = vadd.xlane.f32.xlu0 %v2304_v63 }
 0x278   : > { %v5644_v14 = vpop.f32.mrf.mxu1 }
 0x279   : > { %v2159_v6 = vadd.f32 %v5643_v22, %v6876_v51  ;;  %v2305_v12 = vmul.f32 %v6882_v1, %v2266_v48 }
 0x27a   : > { %v5645_v15 = vpop.f32.mrf.mxu1 }
 0x27b   : > { %v2267_v59 = vmax.f32 %v2159_v6, 0.0  ;;  %v5646_v9 = vadd.f32 %v5645_v15, %v5644_v14  ;;  %2342 = vadd.xlane.f32.xlu1 %v2305_v12 }
 0x27c   : > { %v5647_v41 = vpop.f32.mrf.mxu1 }
 0x27d   : > { %v2162_v24 = vadd.f32 %v5646_v9, %v6876_v51  ;;  %v2306_v42 = vmul.f32 %v6882_v1, %v2267_v59 }
 0x27e   : > { %v5648_v21 = vpop.f32.mrf.mxu1 }
 0x27f   : > { %v2268_v19 = vmax.f32 %v2162_v24, 0.0  ;;  %v5649_v3 = vadd.f32 %v5648_v21, %v5647_v41  ;;  %2344 = vadd.xlane.f32.xlu0 %v2306_v42 }
 0x280   : > { %v5650_v36 = vpop.f32.mrf.mxu1 }
 0x281   : > { %v2167_v25 = vadd.f32 %v5649_v3, %v6876_v51  ;;  %v2307_v38 = vmul.f32 %v6882_v1, %v2268_v19 }
 0x282   : > { %v5651_v29 = vpop.f32.mrf.mxu1 }
 0x283   : > { %v2269_v49 = vmax.f32 %v2167_v25, 0.0  ;;  %v5652_v39 = vadd.f32 %v5651_v29, %v5650_v36  ;;  %2346 = vadd.xlane.f32.xlu1 %v2307_v38 }
 0x284   : > { %v5653_v10 = vpop.f32.mrf.mxu1 }
 0x285   : > { %v2170_v32 = vadd.f32 %v5652_v39, %v6876_v51  ;;  %v2308_v56 = vmul.f32 %v6882_v1, %v2269_v49 }
 0x286   : > { %v5654_v62 = vpop.f32.mrf.mxu1 }
 0x287   : > { %v2270_v47 = vmax.f32 %v2170_v32, 0.0  ;;  %v5655_v31 = vadd.f32 %v5654_v62, %v5653_v10  ;;  %2348 = vadd.xlane.f32.xlu0 %v2308_v56 }
 0x288   : > { %v5656_v35 = vpop.f32.mrf.mxu1 }
 0x289   : > { %v2175_v54 = vadd.f32 %v5655_v31, %v6876_v51  ;;  %v2309_v8 = vmul.f32 %v6882_v1, %v2270_v47 }
 0x28a   : > { %v5657_v7 = vpop.f32.mrf.mxu1 }
 0x28b   : > { %v2271_v13 = vmax.f32 %v2175_v54, 0.0  ;;  %v5658_v44 = vadd.f32 %v5657_v7, %v5656_v35  ;;  %2350 = vadd.xlane.f32.xlu1 %v2309_v8 }
 0x28c   : > { %v5659_v23 = vpop.f32.mrf.mxu1 }
 0x28d   : > { %v2178_v34 = vadd.f32 %v5658_v44, %v6876_v51  ;;  %v2310_v30 = vmul.f32 %v6882_v1, %v2271_v13 }
 0x28e   : > { %v5660_v57 = vpop.f32.mrf.mxu1 }
 0x28f   : > { %v2272_v4 = vmax.f32 %v2178_v34, 0.0  ;;  %v5661_v55 = vadd.f32 %v5660_v57, %v5659_v23  ;;  %2352 = vadd.xlane.f32.xlu0 %v2310_v30 }
 0x290   : > { %v5662_v52 = vpop.f32.mrf.mxu1 }
 0x291   : > { %v2183_v26 = vadd.f32 %v5661_v55, %v6876_v51  ;;  %v2311_v16 = vmul.f32 %v6882_v1, %v2272_v4 }
 0x292   : > { %v5663_v11 = vpop.f32.mrf.mxu1 }
 0x293   : > { %v2273_v46 = vmax.f32 %v2183_v26, 0.0  ;;  %v5664_v5 = vadd.f32 %v5663_v11, %v5662_v52  ;;  %2354 = vadd.xlane.f32.xlu1 %v2311_v16 }
 0x294   : > { %v5665_v37 = vpop.f32.mrf.mxu1 }
 0x295   : > { %v2186_v40 = vadd.f32 %v5664_v5, %v6876_v51  ;;  %v2312_v2 = vmul.f32 %v6882_v1, %v2273_v46 }
 0x296   : > { %v5666_v43 = vpop.f32.mrf.mxu1 }
 0x297   : > { %v2274_v18 = vmax.f32 %v2186_v40, 0.0  ;;  %v5667_v45 = vadd.f32 %v5666_v43, %v5665_v37  ;;  %2356 = vadd.xlane.f32.xlu0 %v2312_v2 }
 0x298   : > { %v5668_v58 = vpop.f32.mrf.mxu1 }
 0x299   : > { %v2191_v27 = vadd.f32 %v5667_v45, %v6876_v51  ;;  %v2313_v28 = vmul.f32 %v6882_v1, %v2274_v18 }
 0x29a   : > { %v5669_v61 = vpop.f32.mrf.mxu1 }
 0x29b   : > { %v2275_v60 = vmax.f32 %v2191_v27, 0.0  ;;  %v5670_v33 = vadd.f32 %v5669_v61, %v5668_v58  ;;  %2358 = vadd.xlane.f32.xlu1 %v2313_v28 }
 0x29c   : > { %v5671_v53 = vpop.f32.mrf.mxu1 }
 0x29d   : > { %v2194_v20 = vadd.f32 %v5670_v33, %v6876_v51  ;;  %v2314_v0 = vmul.f32 %v6882_v1, %v2275_v60 }
 0x29e   : > { %v5672_v17 = vpop.f32.mrf.mxu1 }
 0x29f   : > { %v2276_v63 = vmax.f32 %v2194_v20, 0.0  ;;  %v5673_v50 = vadd.f32 %v5672_v17, %v5671_v53  ;;  %2360 = vadd.xlane.f32.xlu0 %v2314_v0 }
 0x2a0   : > { %v5674_v48 = vpop.f32.mrf.mxu1 }
 0x2a1   : > { %v2199_v22 = vadd.f32 %v5673_v50, %v6876_v51  ;;  %v2315_v14 = vmul.f32 %v6882_v1, %v2276_v63 }
 0x2a2   : > { %v5675_v6 = vpop.f32.mrf.mxu1 }
 0x2a3   : > { %v2277_v12 = vmax.f32 %v2199_v22, 0.0  ;;  %v5676_v15 = vadd.f32 %v5675_v6, %v5674_v48  ;;  %2362 = vadd.xlane.f32.xlu1 %v2315_v14 }
 0x2a4   : > { %v5677_v59 = vpop.f32.mrf.mxu1 }
 0x2a5   : > { %v2202_v9 = vadd.f32 %v5676_v15, %v6876_v51  ;;  %v2316_v41 = vmul.f32 %v6882_v1, %v2277_v12 }
 0x2a6   : > { %v5678_v24 = vpop.f32.mrf.mxu1 }
 0x2a7   : > { %v2278_v42 = vmax.f32 %v2202_v9, 0.0  ;;  %v5679_v21 = vadd.f32 %v5678_v24, %v5677_v59  ;;  %2364 = vadd.xlane.f32.xlu0 %v2316_v41 }
 0x2a8   : > { %v5680_v19 = vpop.f32.mrf.mxu1 }
 0x2a9   : > { %v2207_v3 = vadd.f32 %v5679_v21, %v6876_v51  ;;  %v2317_v36 = vmul.f32 %v6882_v1, %v2278_v42 }
 0x2aa   : > { %v5681_v25 = vpop.f32.mrf.mxu1 }
 0x2ab   : > { %v2279_v38 = vmax.f32 %v2207_v3, 0.0  ;;  %v5682_v29 = vadd.f32 %v5681_v25, %v5680_v19  ;;  %2366 = vadd.xlane.f32.xlu1 %v2317_v36 }
 0x2ac   : > { %v5683_v49 = vpop.f32.mrf.mxu1 }
 0x2ad   : > { %v2210_v39 = vadd.f32 %v5682_v29, %v6876_v51  ;;  %v2318_v10 = vmul.f32 %v6882_v1, %v2279_v38 }
 0x2ae   : > { %v5684_v32 = vpop.f32.mrf.mxu1 }
 0x2af   : > { %v2280_v56 = vmax.f32 %v2210_v39, 0.0  ;;  %v5685_v62 = vadd.f32 %v5684_v32, %v5683_v49  ;;  %2368 = vadd.xlane.f32.xlu0 %v2318_v10 }
 0x2b0   : > { %v5686_v47 = vpop.f32.mrf.mxu1 }
 0x2b1   : > { %v2215_v31 = vadd.f32 %v5685_v62, %v6876_v51  ;;  %v2319_v35 = vmul.f32 %v6882_v1, %v2280_v56 }
 0x2b2   : > { %v5687_v54 = vpop.f32.mrf.mxu1 }
 0x2b3   : > { %v2281_v8 = vmax.f32 %v2215_v31, 0.0  ;;  %v5688_v7 = vadd.f32 %v5687_v54, %v5686_v47  ;;  %2370 = vadd.xlane.f32.xlu1 %v2319_v35 }
 0x2b4   : > { %v5689_v13 = vpop.f32.mrf.mxu1 }
 0x2b5   : > { %v2218_v44 = vadd.f32 %v5688_v7, %v6876_v51  ;;  %v2320_v23 = vmul.f32 %v6882_v1, %v2281_v8 }
 0x2b6   : > { %v5690_v34 = vpop.f32.mrf.mxu1 }
 0x2b7   : > { %v2282_v30 = vmax.f32 %v2218_v44, 0.0  ;;  %v5691_v57 = vadd.f32 %v5690_v34, %v5689_v13  ;;  %2372 = vadd.xlane.f32.xlu0 %v2320_v23  ;;  %v5989_v23 = vmov 1966171168  }
 0x2b8   : > { %v5692_v4 = vpop.f32.mrf.mxu1  ;;  %v3499_v34 = vunpack.c.l.s4 %v5989_v23 }
 0x2b9   : > { %v2223_v55 = vadd.f32 %v5691_v57, %v6876_v51  ;;  %v2321_v52 = vmul.f32 %v6882_v1, %v2282_v30  ;;  %v2400_v30 = vpop.permute.xlu1 %2399 }
 0x2ba   : > { %v5693_v26 = vpop.f32.mrf.mxu1  ;;  %v3500_v57 = vunpack.c.0.s8 %v3499_v34 }
 0x2bb   : > { %v2283_v16 = vmax.f32 %v2223_v55, 0.0  ;;  %v5694_v11 = vadd.f32 %v5693_v26, %v5692_v4  ;;  %2374 = vadd.xlane.f32.xlu1 %v2321_v52  ;;  %v7956_v4 = vld [vmem:[#allocation44_spill] sm:$0xff] }
 0x2bc   : > { %v5695_v46 = vpop.f32.mrf.mxu1  ;;  %v6948_v55 = vrot.slane %v2400_v30, %v7956_v4  ;;  %v7957_v52 = vld [vmem:[#allocation40_spill] sm:$0xff] }
 0x2bd   : > { %v2226_v5 = vadd.f32 %v5694_v11, %v6876_v51  ;;  %v2322_v37 = vmul.f32 %v6882_v1, %v2283_v16  ;;  %v6951_v26 = vsub.s32 2, %v7957_v52  ;;  %v6954_v16 = vsub.s32 3, %v7957_v52 }
 0x2be   : > { %v5696_v40 = vpop.f32.mrf.mxu1  ;;  %v6957_v11 = vsub.s32 4, %v7957_v52 }
 0x2bf   : > { %v2284_v2 = vmax.f32 %v2226_v5, 0.0  ;;  %v5697_v43 = vadd.f32 %v5696_v40, %v5695_v46  ;;  %2376 = vadd.xlane.f32.xlu0 %v2322_v37  ;;  %v6963_v46 = vsub.s32 6, %v7957_v52  ;;  %v6966_v5 = vsub.s32 7, %v7957_v52 }
 0x2c0   : > { %v5698_v18 = vpop.f32.mrf.mxu1  ;;  %v6970_v40 = vsub.s32 %v3500_v57, %v7957_v52 }
 0x2c1   : > { %v2231_v45 = vadd.f32 %v5697_v43, %v6876_v51  ;;  %v2323_v58 = vmul.f32 %v6882_v1, %v2284_v2  ;;  %v7958_v43 = vld [vmem:[#allocation47_spill] sm:$0xff] }
 0x2c2   : > { %v5699_v27 = vpop.f32.mrf.mxu1 }
 0x2c3   : > { %v2285_v28 = vmax.f32 %v2231_v45, 0.0  ;;  %v5700_v61 = vadd.f32 %v5699_v27, %v5698_v18  ;;  %2378 = vadd.xlane.f32.xlu1 %v2323_v58 }
 0x2c4   : > { %v5701_v60 = vpop.f32.mrf.mxu1 }
 0x2c5   : > { %v2234_v33 = vadd.f32 %v5700_v61, %v6876_v51  ;;  %v2324_v53 = vmul.f32 %v6882_v1, %v2285_v28 }
 0x2c6   : > { %v5702_v20 = vpop.f32.mrf.mxu1 }
 0x2c7   : > { %v2286_v0 = vmax.f32 %v2234_v33, 0.0  ;;  %v5703_v17 = vadd.f32 %v5702_v20, %v5701_v60  ;;  %2380 = vadd.xlane.f32.xlu0 %v2324_v53 }
 0x2c8   : > { %v5704_v63 = vpop.f32.mrf.mxu1 }
 0x2c9   : > { %v2239_v50 = vadd.f32 %v5703_v17, %v6876_v51  ;;  %v2325_v48 = vmul.f32 %v6882_v1, %v2286_v0 }
 0x2ca   : > { %v5705_v22 = vpop.f32.mrf.mxu1 }
 0x2cb   : > { %v2287_v14 = vmax.f32 %v2239_v50, 0.0  ;;  %v5706_v6 = vadd.f32 %v5705_v22, %v5704_v63  ;;  %2382 = vadd.xlane.f32.xlu0 %v2325_v48 }
 0x2cc   : > { %v5707_v12 = vpop.f32.mrf.mxu1 }
 0x2cd   : > { %v2242_v15 = vadd.f32 %v5706_v6, %v6876_v51  ;;  %v2326_v59 = vmul.f32 %v6882_v1, %v2287_v14 }
 0x2ce   : > { %v5708_v9 = vpop.f32.mrf.mxu1 }
 0x2cf   : > { %v2288_v41 = vmax.f32 %v2242_v15, 0.0  ;;  %v5709_v24 = vadd.f32 %v5708_v9, %v5707_v12  ;;  %2384 = vadd.xlane.f32.xlu0 %v2326_v59 }
 0x2d0   : > { %v5710_v42 = vpop.f32.mrf.mxu1 }
 0x2d1   : > { %v2247_v21 = vadd.f32 %v5709_v24, %v6876_v51  ;;  %v2327_v19 = vmul.f32 %v6882_v1, %v2288_v41 }
 0x2d2   : > { %v5711_v3 = vpop.f32.mrf.mxu1 }
 0x2d3   : > { %v2289_v36 = vmax.f32 %v2247_v21, 0.0  ;;  %v5712_v25 = vadd.f32 %v5711_v3, %v5710_v42  ;;  %2386 = vadd.xlane.f32.xlu0 %v2327_v19 }
 0x2d4   : > { %v5713_v38 = vpop.f32.mrf.mxu1 }
 0x2d5   : > { %v2250_v29 = vadd.f32 %v5712_v25, %v6876_v51  ;;  %v2328_v49 = vmul.f32 %v6882_v1, %v2289_v36 }
 0x2d6   : > { %v5714_v39 = vpop.f32.mrf.mxu1 }
 0x2d7   : > { %v2290_v10 = vmax.f32 %v2250_v29, 0.0  ;;  %v5715_v32 = vadd.f32 %v5714_v39, %v5713_v38  ;;  %2388 = vadd.xlane.f32.xlu0 %v2328_v49 }
 0x2d8   : > { %v5716_v56 = vpop.f32.mrf.mxu1 }
 0x2d9   : > { %v2255_v62 = vadd.f32 %v5715_v32, %v6876_v51  ;;  %v2329_v47 = vmul.f32 %v6882_v1, %v2290_v10 }
 0x2da   : > { %v5717_v31 = vpop.f32.mrf.mxu1 }
 0x2db   : > { %v2291_v35 = vmax.f32 %v2255_v62, 0.0  ;;  %v5718_v54 = vadd.f32 %v5717_v31, %v5716_v56  ;;  %2390 = vadd.xlane.f32.xlu1 %v2329_v47 }
 0x2dd   : > { %v2258_v8 = vadd.f32 %v5718_v54, %v6876_v51  ;;  %v2330_v7 = vmul.f32 %v6882_v1, %v2291_v35 }
 0x2df   : > { %v2292_v13 = vmax.f32 %v2258_v8, 0.0  ;;  %2392 = vadd.xlane.f32.xlu0 %v2330_v7 }
 0x2e1   : > { %v2331_v44 = vmul.f32 %v6882_v1, %v2292_v13  ;;  %v6960_v1 = vsub.s32 5, %v7957_v52 }
 0x2e3   : > { %2394 = vadd.xlane.f32.xlu0 %v2331_v44 }
 0x2f0   : > { %v2333_v51 = vpop.xlane.xlu0 %2332 }
 0x2f1   : > { %v2406_v37 = vadd.f32 %v6948_v55, %v2333_v51 }
 0x2f3   : > { %v2473_v2 = vrot.slane %v2406_v37, %v7956_v4  ;;  %v2477_v18 = vrot.slane %v2406_v37, %v7958_v43  ;;  %v2481_v45 = vrot.slane %v2406_v37, %v6951_v26  ;;  %v2485_v58 = vrot.slane %v2406_v37, %v6954_v16 }
 0x2f4   : > { %v2335_v27 = vpop.xlane.xlu0 %2334  ;;  %v2489_v28 = vrot.slane %v2406_v37, %v6957_v11  ;;  %v2493_v61 = vrot.slane %v2406_v37, %v6960_v1  ;;  %v2497_v60 = vrot.slane %v2406_v37, %v6963_v46  ;;  %v2501_v33 = vrot.slane %v2406_v37, %v6966_v5 }
 0x2f5   : > { %v2407_v53 = vadd.f32 %v6948_v55, %v2335_v27  ;;  %v3494_v20 = vcombine.low %v2473_v2, %v2477_v18  ;;  %v3495_v0 = vcombine.low %v2481_v45, %v2485_v58 }
 0x2f6   : > { %v3496_v17 = vcombine.low %v2489_v28, %v2493_v61  ;;  %v3497_v63 = vcombine.low %v2497_v60, %v2501_v33 }
 0x2f7   : > { %v3504_v50 = vrot.slane %v3494_v20, %v6970_v40  ;;  %v3511_v48 = vrot.slane %v3495_v0, %v6970_v40  ;;  %v2505_v22 = vrot.slane %v2407_v53, %v7956_v4  ;;  %v2509_v14 = vrot.slane %v2407_v53, %v7958_v43 }
 0x2f8   : > { %v2337_v6 = vpop.xlane.xlu1 %2336  ;;  %v3518_v12 = vrot.slane %v3496_v17, %v6970_v40  ;;  %v3525_v15 = vrot.slane %v3497_v63, %v6970_v40  ;;  %v2513_v59 = vrot.slane %v2407_v53, %v6951_v26  ;;  %v2517_v9 = vrot.slane %v2407_v53, %v6954_v16 }
 0x2f9   : > { %v2408_v41 = vadd.f32 %v6948_v55, %v2337_v6  ;;  %v3526_v24 = vcombine.low %v3504_v50, %v3511_v48  ;;  %v2521_v42 = vrot.slane %v2407_v53, %v6957_v11  ;;  %v2525_v21 = vrot.slane %v2407_v53, %v6960_v1 }
 0x2fa   : > { %v3527_v19 = vcombine.low %v3518_v12, %v3525_v15  ;;  %v2529_v3 = vrot.slane %v2407_v53, %v6963_v46  ;;  %v2533_v36 = vrot.slane %v2407_v53, %v6966_v5  ;;  %v3543_v25 = vcombine.low %v2505_v22, %v2509_v14 }
 0x2fb   : > { %v3534_v38 = vrot.slane %v3526_v24, %v6970_v40  ;;  %v3544_v29 = vcombine.low %v2513_v59, %v2517_v9  ;;  %v3545_v49 = vcombine.low %v2521_v42, %v2525_v21  ;;  %v2537_v39 = vrot.slane %v2408_v41, %v7956_v4 }
 0x2fc   : > { %v2339_v10 = vpop.xlane.xlu1 %2338  ;;  %v3541_v32 = vrot.slane %v3527_v19, %v6970_v40  ;;  %v3546_v56 = vcombine.low %v2529_v3, %v2533_v36  ;;  %v3553_v62 = vrot.slane %v3543_v25, %v6970_v40  ;;  %v2541_v47 = vrot.slane %v2408_v41, %v7958_v43 }
 0x2fd   : > { %v2409_v31 = vadd.f32 %v6948_v55, %v2339_v10  ;;  %v3560_v35 = vrot.slane %v3544_v29, %v6970_v40  ;;  %v3567_v54 = vrot.slane %v3545_v49, %v6970_v40  ;;  %v2545_v8 = vrot.slane %v2408_v41, %v6951_v26 }
 0x2fe   : > { %v3542_v7 = vcombine.low %v3534_v38, %v3541_v32  ;;  %v3574_v13 = vrot.slane %v3546_v56, %v6970_v40  ;;  %v2549_v44 = vrot.slane %v2408_v41, %v6954_v16  ;;  %v2553_v23 = vrot.slane %v2408_v41, %v6957_v11 }
 0x2ff   : > { %v3575_v34 = vcombine.low %v3553_v62, %v3560_v35  ;;  %v2557_v30 = vrot.slane %v2408_v41, %v6960_v1  ;;  %v2561_v57 = vrot.slane %v2408_v41, %v6963_v46  ;;  %v2565_v51 = vrot.slane %v2408_v41, %v6966_v5 }
 0x300   : > { %5063 = vperm.xlu0 %5731, %v3542_v7   ;;  %v2341_v37 = vpop.xlane.xlu0 %2340  ;;  %v3576_v2 = vcombine.low %v3567_v54, %v3574_v13  ;;  %v3592_v18 = vcombine.low %v2537_v39, %v2541_v47  ;;  %v3593_v45 = vcombine.low %v2545_v8, %v2549_v44  ;;  %v2569_v58 = vrot.slane %v2409_v31, %v7956_v4 }
 0x301   : > { %v2410_v27 = vadd.f32 %v6948_v55, %v2341_v37  ;;  %v3583_v28 = vrot.slane %v3575_v34, %v6970_v40  ;;  %v3594_v61 = vcombine.low %v2553_v23, %v2557_v30  ;;  %v3595_v60 = vcombine.low %v2561_v57, %v2565_v51 }
 0x302   : > { %v3590_v33 = vrot.slane %v3576_v2, %v6970_v40  ;;  %v3602_v53 = vrot.slane %v3592_v18, %v6970_v40  ;;  %v3609_v20 = vrot.slane %v3593_v45, %v6970_v40  ;;  %v2573_v0 = vrot.slane %v2409_v31, %v7958_v43 }
 0x303   : > { %v3616_v17 = vrot.slane %v3594_v61, %v6970_v40  ;;  %v3623_v63 = vrot.slane %v3595_v60, %v6970_v40  ;;  %v2577_v50 = vrot.slane %v2409_v31, %v6951_v26  ;;  %v2581_v48 = vrot.slane %v2409_v31, %v6954_v16 }
 0x304   : > { %v3591_v22 = vcombine.low %v3583_v28, %v3590_v33  ;;  %v2343_v14 = vpop.xlane.xlu1 %2342  ;;  %v3624_v6 = vcombine.low %v3602_v53, %v3609_v20  ;;  %v2585_v12 = vrot.slane %v2409_v31, %v6957_v11  ;;  %v2589_v15 = vrot.slane %v2409_v31, %v6960_v1 }
 0x305   : > { %v2411_v59 = vadd.f32 %v6948_v55, %v2343_v14  ;;  %v3625_v9 = vcombine.low %v3616_v17, %v3623_v63  ;;  %v2593_v41 = vrot.slane %v2409_v31, %v6963_v46  ;;  %v2597_v24 = vrot.slane %v2409_v31, %v6966_v5 }
 0x306   : > { %5066 = vperm.xlu1 %5730, %v3591_v22   ;;  %v3632_v42 = vrot.slane %v3624_v6, %v6970_v40  ;;  %v3641_v21 = vcombine.low %v2569_v58, %v2573_v0  ;;  %v3642_v19 = vcombine.low %v2577_v50, %v2581_v48  ;;  %v3643_v3 = vcombine.low %v2585_v12, %v2589_v15 }
 0x307   : > { %v3639_v36 = vrot.slane %v3625_v9, %v6970_v40  ;;  %v3644_v25 = vcombine.low %v2593_v41, %v2597_v24  ;;  %v2601_v38 = vrot.slane %v2410_v27, %v7956_v4  ;;  %v2605_v29 = vrot.slane %v2410_v27, %v7958_v43 }
 0x308   : > { %v2345_v49 = vpop.xlane.xlu0 %2344  ;;  %v3651_v39 = vrot.slane %v3641_v21, %v6970_v40  ;;  %v3658_v10 = vrot.slane %v3642_v19, %v6970_v40  ;;  %v3665_v32 = vrot.slane %v3643_v3, %v6970_v40  ;;  %v2609_v56 = vrot.slane %v2410_v27, %v6951_v26 }
 0x309   : > { %v3640_v62 = vcombine.low %v3632_v42, %v3639_v36  ;;  %v7034_v47 = vadd.f32 %v6948_v55, %v2345_v49  ;;  %v3672_v31 = vrot.slane %v3644_v25, %v6970_v40  ;;  %v2613_v35 = vrot.slane %v2410_v27, %v6954_v16 }
 0x30a   : > { %v3673_v54 = vcombine.low %v3651_v39, %v3658_v10  ;;  %v2617_v8 = vrot.slane %v2410_v27, %v6957_v11  ;;  %v2621_v7 = vrot.slane %v2410_v27, %v6960_v1  ;;  %v2625_v13 = vrot.slane %v2410_v27, %v6963_v46 }
 0x30b   : > { %5069 = vperm.xlu1 %5730, %v3640_v62   ;;  %v3674_v44 = vcombine.low %v3665_v32, %v3672_v31  ;;  %v2629_v23 = vrot.slane %v2410_v27, %v6966_v5  ;;  %v3690_v34 = vcombine.low %v2601_v38, %v2605_v29  ;;  %v3691_v30 = vcombine.low %v2609_v56, %v2613_v35 }
 0x30c   : > { %v3681_v57 = vrot.slane %v3673_v54, %v6970_v40  ;;  %v2347_v51 = vpop.xlane.xlu1 %2346  ;;  %v3692_v37 = vcombine.low %v2617_v8, %v2621_v7  ;;  %v2633_v2 = vrot.slane %v2411_v59, %v7956_v4  ;;  %v2637_v18 = vrot.slane %v2411_v59, %v7958_v43 }
 0x30d   : > { %v3688_v45 = vrot.slane %v3674_v44, %v6970_v40  ;;  %v7047_v58 = vadd.f32 %v6948_v55, %v2347_v51  ;;  %v3693_v28 = vcombine.low %v2625_v13, %v2629_v23  ;;  %v3700_v61 = vrot.slane %v3690_v34, %v6970_v40 }
 0x30e   : > { %v3707_v27 = vrot.slane %v3691_v30, %v6970_v40  ;;  %v3714_v60 = vrot.slane %v3692_v37, %v6970_v40  ;;  %v2641_v33 = vrot.slane %v2411_v59, %v6951_v26  ;;  %v2645_v53 = vrot.slane %v2411_v59, %v6954_v16 }
 0x30f   : > { %v3689_v20 = vcombine.low %v3681_v57, %v3688_v45  ;;  %v3721_v0 = vrot.slane %v3693_v28, %v6970_v40  ;;  %v2649_v17 = vrot.slane %v2411_v59, %v6957_v11  ;;  %v2653_v63 = vrot.slane %v2411_v59, %v6960_v1 }
 0x310   : > { %v3722_v50 = vcombine.low %v3700_v61, %v3707_v27  ;;  %v2349_v48 = vpop.xlane.xlu0 %2348  ;;  %v2657_v22 = vrot.slane %v2411_v59, %v6963_v46  ;;  %v2661_v14 = vrot.slane %v2411_v59, %v6966_v5  ;;  %v3739_v6 = vcombine.low %v2633_v2, %v2637_v18 }
 0x311   : > { %5072 = vperm.xlu1 %5730, %v3689_v20   ;;  %v3723_v12 = vcombine.low %v3714_v60, %v3721_v0  ;;  %v7060_v15 = vadd.f32 %v6948_v55, %v2349_v48  ;;  %v3740_v9 = vcombine.low %v2641_v33, %v2645_v53  ;;  %v3741_v41 = vcombine.low %v2649_v17, %v2653_v63 }
 0x312   : > { %v3730_v24 = vrot.slane %v3722_v50, %v6970_v40  ;;  %v3742_v42 = vcombine.low %v2657_v22, %v2661_v14  ;;  %v3749_v21 = vrot.slane %v3739_v6, %v6970_v40  ;;  %v2665_v19 = vrot.slane %v7034_v47, %v7956_v4 }
 0x313   : > { %v3737_v3 = vrot.slane %v3723_v12, %v6970_v40  ;;  %v3756_v59 = vrot.slane %v3740_v9, %v6970_v40  ;;  %v3763_v36 = vrot.slane %v3741_v41, %v6970_v40  ;;  %v2669_v25 = vrot.slane %v7034_v47, %v7958_v43 }
 0x314   : > { %v3770_v38 = vrot.slane %v3742_v42, %v6970_v40  ;;  %v2351_v29 = vpop.xlane.xlu1 %2350  ;;  %v2673_v49 = vrot.slane %v7034_v47, %v6951_v26  ;;  %v2677_v39 = vrot.slane %v7034_v47, %v6954_v16  ;;  %v2681_v10 = vrot.slane %v7034_v47, %v6957_v11 }
 0x315   : > { %v3738_v32 = vcombine.low %v3730_v24, %v3737_v3  ;;  %v3771_v56 = vcombine.low %v3749_v21, %v3756_v59  ;;  %v7079_v62 = vadd.f32 %v6948_v55, %v2351_v29  ;;  %v2685_v31 = vrot.slane %v7034_v47, %v6960_v1 }
 0x316   : > { %v3772_v35 = vcombine.low %v3763_v36, %v3770_v38  ;;  %v2689_v54 = vrot.slane %v7034_v47, %v6963_v46  ;;  %v2693_v8 = vrot.slane %v7034_v47, %v6966_v5  ;;  %v3788_v7 = vcombine.low %v2665_v19, %v2669_v25 }
 0x317   : > { %5075 = vperm.xlu1 %5730, %v3738_v32   ;;  %v3779_v13 = vrot.slane %v3771_v56, %v6970_v40  ;;  %v3789_v44 = vcombine.low %v2673_v49, %v2677_v39  ;;  %v3790_v23 = vcombine.low %v2681_v10, %v2685_v31  ;;  %v2697_v34 = vrot.slane %v7047_v58, %v7956_v4 }
 0x318   : > { %v3786_v30 = vrot.slane %v3772_v35, %v6970_v40  ;;  %v3791_v57 = vcombine.low %v2689_v54, %v2693_v8  ;;  %v3798_v51 = vrot.slane %v3788_v7, %v6970_v40  ;;  %v2353_v37 = vpop.xlane.xlu0 %2352  ;;  %v2701_v2 = vrot.slane %v7047_v58, %v7958_v43 }
 0x319   : > { %v3805_v47 = vrot.slane %v3789_v44, %v6970_v40  ;;  %v3812_v18 = vrot.slane %v3790_v23, %v6970_v40  ;;  %v7097_v45 = vadd.f32 %v6948_v55, %v2353_v37  ;;  %v2705_v28 = vrot.slane %v7047_v58, %v6951_v26 }
 0x31a   : > { %v3787_v61 = vcombine.low %v3779_v13, %v3786_v30  ;;  %v3819_v27 = vrot.slane %v3791_v57, %v6970_v40  ;;  %v2709_v60 = vrot.slane %v7047_v58, %v6954_v16  ;;  %v2713_v33 = vrot.slane %v7047_v58, %v6957_v11 }
 0x31b   : > { %v3820_v53 = vcombine.low %v3798_v51, %v3805_v47  ;;  %v2717_v20 = vrot.slane %v7047_v58, %v6960_v1  ;;  %v2721_v0 = vrot.slane %v7047_v58, %v6963_v46  ;;  %v2725_v17 = vrot.slane %v7047_v58, %v6966_v5 }
 0x31c   : > { %5078 = vperm.xlu1 %5730, %v3787_v61   ;;  %v3821_v63 = vcombine.low %v3812_v18, %v3819_v27  ;;  %v3837_v50 = vcombine.low %v2697_v34, %v2701_v2  ;;  %v3838_v48 = vcombine.low %v2705_v28, %v2709_v60  ;;  %v2355_v22 = vpop.xlane.xlu1 %2354  ;;  %v2729_v14 = vrot.slane %v7060_v15, %v7956_v4 }
 0x31d   : > { %v3828_v6 = vrot.slane %v3820_v53, %v6970_v40  ;;  %v3839_v12 = vcombine.low %v2713_v33, %v2717_v20  ;;  %v3840_v9 = vcombine.low %v2721_v0, %v2725_v17  ;;  %v7116_v41 = vadd.f32 %v6948_v55, %v2355_v22 }
 0x31e   : > { %v3835_v24 = vrot.slane %v3821_v63, %v6970_v40  ;;  %v3847_v42 = vrot.slane %v3837_v50, %v6970_v40  ;;  %v3854_v58 = vrot.slane %v3838_v48, %v6970_v40  ;;  %v2733_v21 = vrot.slane %v7060_v15, %v7958_v43 }
 0x31f   : > { %v3861_v19 = vrot.slane %v3839_v12, %v6970_v40  ;;  %v3868_v3 = vrot.slane %v3840_v9, %v6970_v40  ;;  %v2737_v59 = vrot.slane %v7060_v15, %v6951_v26  ;;  %v2741_v36 = vrot.slane %v7060_v15, %v6954_v16 }
 0x320   : > { %v3836_v25 = vcombine.low %v3828_v6, %v3835_v24  ;;  %v3869_v38 = vcombine.low %v3847_v42, %v3854_v58  ;;  %v2745_v29 = vrot.slane %v7060_v15, %v6957_v11  ;;  %v2749_v49 = vrot.slane %v7060_v15, %v6960_v1  ;;  %v2357_v39 = vpop.xlane.xlu0 %2356 }
 0x321   : > { %v3870_v10 = vcombine.low %v3861_v19, %v3868_v3  ;;  %v2753_v32 = vrot.slane %v7060_v15, %v6963_v46  ;;  %v2757_v56 = vrot.slane %v7060_v15, %v6966_v5  ;;  %v3886_v31 = vcombine.low %v2729_v14, %v2733_v21 }
 0x322   : > { %5081 = vperm.xlu1 %5730, %v3836_v25   ;;  %v3877_v35 = vrot.slane %v3869_v38, %v6970_v40  ;;  %v3887_v54 = vcombine.low %v2737_v59, %v2741_v36  ;;  %v3888_v8 = vcombine.low %v2745_v29, %v2749_v49  ;;  %v7139_v7 = vadd.f32 %v6948_v55, %v2357_v39 }
 0x323   : > { %v3884_v13 = vrot.slane %v3870_v10, %v6970_v40  ;;  %v3889_v44 = vcombine.low %v2753_v32, %v2757_v56  ;;  %v3896_v23 = vrot.slane %v3886_v31, %v6970_v40  ;;  %v2761_v34 = vrot.slane %v7079_v62, %v7956_v4 }
 0x324   : > { %v3903_v30 = vrot.slane %v3887_v54, %v6970_v40  ;;  %v3910_v15 = vrot.slane %v3888_v8, %v6970_v40  ;;  %v2765_v57 = vrot.slane %v7079_v62, %v7958_v43  ;;  %v2769_v51 = vrot.slane %v7079_v62, %v6951_v26  ;;  %v2359_v37 = vpop.xlane.xlu1 %2358 }
 0x325   : > { %v3885_v2 = vcombine.low %v3877_v35, %v3884_v13  ;;  %v3917_v47 = vrot.slane %v3889_v44, %v6970_v40  ;;  %v2773_v18 = vrot.slane %v7079_v62, %v6954_v16  ;;  %v2777_v28 = vrot.slane %v7079_v62, %v6957_v11 }
 0x326   : > { %v3918_v61 = vcombine.low %v3896_v23, %v3903_v30  ;;  %v2781_v27 = vrot.slane %v7079_v62, %v6960_v1  ;;  %v2785_v60 = vrot.slane %v7079_v62, %v6963_v46  ;;  %v2789_v33 = vrot.slane %v7079_v62, %v6966_v5 }
 0x327   : > { %5084 = vperm.xlu1 %5730, %v3885_v2   ;;  %v3919_v53 = vcombine.low %v3910_v15, %v3917_v47  ;;  %v3935_v20 = vcombine.low %v2761_v34, %v2765_v57  ;;  %v3936_v0 = vcombine.low %v2769_v51, %v2773_v18  ;;  %v7163_v17 = vadd.f32 %v6948_v55, %v2359_v37 }
 0x328   : > { %v3926_v63 = vrot.slane %v3918_v61, %v6970_v40  ;;  %v3937_v50 = vcombine.low %v2777_v28, %v2781_v27  ;;  %v3938_v48 = vcombine.low %v2785_v60, %v2789_v33  ;;  %v2793_v22 = vrot.slane %v7097_v45, %v7956_v4  ;;  %v2361_v21 = vpop.xlane.xlu0 %2360 }
 0x329   : > { %v3933_v14 = vrot.slane %v3919_v53, %v6970_v40  ;;  %v3945_v6 = vrot.slane %v3935_v20, %v6970_v40  ;;  %v3952_v62 = vrot.slane %v3936_v0, %v6970_v40  ;;  %v2797_v12 = vrot.slane %v7097_v45, %v7958_v43 }
 0x32a   : > { %v3959_v9 = vrot.slane %v3937_v50, %v6970_v40  ;;  %v3966_v24 = vrot.slane %v3938_v48, %v6970_v40  ;;  %v2801_v42 = vrot.slane %v7097_v45, %v6951_v26  ;;  %v2805_v58 = vrot.slane %v7097_v45, %v6954_v16 }
 0x32b   : > { %v3934_v19 = vcombine.low %v3926_v63, %v3933_v14  ;;  %v3967_v3 = vcombine.low %v3945_v6, %v3952_v62  ;;  %v2809_v59 = vrot.slane %v7097_v45, %v6957_v11  ;;  %v2813_v36 = vrot.slane %v7097_v45, %v6960_v1 }
 0x32c   : > { %v3968_v25 = vcombine.low %v3959_v9, %v3966_v24  ;;  %v2817_v38 = vrot.slane %v7097_v45, %v6963_v46  ;;  %v2821_v29 = vrot.slane %v7097_v45, %v6966_v5  ;;  %v3984_v49 = vcombine.low %v2793_v22, %v2797_v12  ;;  %v2363_v34 = vpop.xlane.xlu1 %2362 }
 0x32d   : > { %5087 = vperm.xlu1 %5730, %v3934_v19   ;;  %v3975_v39 = vrot.slane %v3967_v3, %v6970_v40  ;;  %v3985_v10 = vcombine.low %v2801_v42, %v2805_v58  ;;  %v3986_v32 = vcombine.low %v2809_v59, %v2813_v36  ;;  %v7189_v56 = vadd.f32 %v6948_v55, %v2361_v21 }
 0x32e   : > { %v3982_v31 = vrot.slane %v3968_v25, %v6970_v40  ;;  %v3987_v35 = vcombine.low %v2817_v38, %v2821_v29  ;;  %v3994_v54 = vrot.slane %v3984_v49, %v6970_v40  ;;  %v2825_v8 = vrot.slane %v7116_v41, %v7956_v4 }
 0x32f   : > { %v4001_v13 = vrot.slane %v3985_v10, %v6970_v40  ;;  %v4008_v45 = vrot.slane %v3986_v32, %v6970_v40  ;;  %v2829_v44 = vrot.slane %v7116_v41, %v7958_v43  ;;  %v2833_v23 = vrot.slane %v7116_v41, %v6951_v26 }
 0x330   : > { %v3983_v30 = vcombine.low %v3975_v39, %v3982_v31  ;;  %v4015_v15 = vrot.slane %v3987_v35, %v6970_v40  ;;  %v2837_v57 = vrot.slane %v7116_v41, %v6954_v16  ;;  %v2841_v51 = vrot.slane %v7116_v41, %v6957_v11  ;;  %v2365_v37 = vpop.xlane.xlu0 %2364 }
 0x331   : > { %v4016_v2 = vcombine.low %v3994_v54, %v4001_v13  ;;  %v2845_v47 = vrot.slane %v7116_v41, %v6960_v1  ;;  %v2849_v18 = vrot.slane %v7116_v41, %v6963_v46  ;;  %v2853_v28 = vrot.slane %v7116_v41, %v6966_v5 }
 0x332   : > { %5090 = vperm.xlu1 %5730, %v3983_v30   ;;  %v4017_v61 = vcombine.low %v4008_v45, %v4015_v15  ;;  %v4033_v27 = vcombine.low %v2825_v8, %v2829_v44  ;;  %v4034_v60 = vcombine.low %v2833_v23, %v2837_v57  ;;  %v7213_v33 = vadd.f32 %v6948_v55, %v2363_v34 }
 0x333   : > { %v4024_v53 = vrot.slane %v4016_v2, %v6970_v40  ;;  %v4035_v20 = vcombine.low %v2841_v51, %v2845_v47  ;;  %v4036_v0 = vcombine.low %v2849_v18, %v2853_v28  ;;  %v2422_v63 = vadd.f32 %v6948_v55, %v2365_v37 }
 0x334   : > { %v4031_v50 = vrot.slane %v4017_v61, %v6970_v40  ;;  %v4043_v48 = vrot.slane %v4033_v27, %v6970_v40  ;;  %v4050_v22 = vrot.slane %v4034_v60, %v6970_v40  ;;  %v2367_v41 = vpop.xlane.xlu1 %2366  ;;  %v2857_v14 = vrot.slane %v7139_v7, %v7956_v4 }
 0x335   : > { %v4057_v6 = vrot.slane %v4035_v20, %v6970_v40  ;;  %v4064_v62 = vrot.slane %v4036_v0, %v6970_v40  ;;  %v2423_v12 = vadd.f32 %v6948_v55, %v2367_v41  ;;  %v2985_v9 = vrot.slane %v2422_v63, %v7956_v4 }
 0x336   : > { %v4032_v24 = vcombine.low %v4024_v53, %v4031_v50  ;;  %v4065_v42 = vcombine.low %v4043_v48, %v4050_v22  ;;  %v2989_v58 = vrot.slane %v2422_v63, %v7958_v43  ;;  %v2993_v21 = vrot.slane %v2422_v63, %v6951_v26 }
 0x337   : > { %v4066_v19 = vcombine.low %v4057_v6, %v4064_v62  ;;  %v2997_v3 = vrot.slane %v2422_v63, %v6954_v16  ;;  %v3001_v59 = vrot.slane %v2422_v63, %v6957_v11  ;;  %v3005_v36 = vrot.slane %v2422_v63, %v6960_v1 }
 0x338   : > { %5093 = vperm.xlu1 %5730, %v4032_v24   ;;  %v4073_v25 = vrot.slane %v4065_v42, %v6970_v40  ;;  %v2369_v38 = vpop.xlane.xlu0 %2368  ;;  %v3009_v29 = vrot.slane %v2422_v63, %v6963_v46  ;;  %v3013_v49 = vrot.slane %v2422_v63, %v6966_v5  ;;  %v4278_v39 = vcombine.low %v2985_v9, %v2989_v58 }
 0x339   : > { %v4080_v10 = vrot.slane %v4066_v19, %v6970_v40  ;;  %v7236_v32 = vadd.f32 %v6948_v55, %v2369_v38  ;;  %v4279_v31 = vcombine.low %v2993_v21, %v2997_v3  ;;  %v4280_v35 = vcombine.low %v3001_v59, %v3005_v36 }
 0x33a   : > { %v4281_v54 = vcombine.low %v3009_v29, %v3013_v49  ;;  %v4288_v8 = vrot.slane %v4278_v39, %v6970_v40  ;;  %v3017_v13 = vrot.slane %v2423_v12, %v7956_v4  ;;  %v3021_v45 = vrot.slane %v2423_v12, %v7958_v43 }
 0x33b   : > { %v4081_v44 = vcombine.low %v4073_v25, %v4080_v10  ;;  %v4295_v23 = vrot.slane %v4279_v31, %v6970_v40  ;;  %v4302_v34 = vrot.slane %v4280_v35, %v6970_v40  ;;  %v3025_v30 = vrot.slane %v2423_v12, %v6951_v26 }
 0x33c   : > { %v2371_v15 = vpop.xlane.xlu1 %2370  ;;  %v4309_v57 = vrot.slane %v4281_v54, %v6970_v40  ;;  %v3029_v51 = vrot.slane %v2423_v12, %v6954_v16  ;;  %v3033_v37 = vrot.slane %v2423_v12, %v6957_v11  ;;  %v3037_v2 = vrot.slane %v2423_v12, %v6960_v1 }
 0x33d   : > { %5096 = vperm.xlu1 %5730, %v4081_v44   ;;  %v7249_v47 = vadd.f32 %v6948_v55, %v2371_v15  ;;  %v4310_v18 = vcombine.low %v4288_v8, %v4295_v23  ;;  %v3041_v28 = vrot.slane %v2423_v12, %v6963_v46  ;;  %v3045_v61 = vrot.slane %v2423_v12, %v6966_v5 }
 0x33e   : > { %v4311_v27 = vcombine.low %v4302_v34, %v4309_v57  ;;  %v4327_v60 = vcombine.low %v3017_v13, %v3021_v45  ;;  %v4328_v53 = vcombine.low %v3025_v30, %v3029_v51  ;;  %v4329_v20 = vcombine.low %v3033_v37, %v3037_v2 }
 0x33f   : > { %v4318_v0 = vrot.slane %v4310_v18, %v6970_v40  ;;  %v4330_v63 = vcombine.low %v3041_v28, %v3045_v61  ;;  %v2861_v50 = vrot.slane %v7139_v7, %v7958_v43  ;;  %v2865_v48 = vrot.slane %v7139_v7, %v6951_v26 }
 0x340   : > { %v4325_v22 = vrot.slane %v4311_v27, %v6970_v40  ;;  %v2373_v41 = vpop.xlane.xlu0 %2372  ;;  %v4337_v6 = vrot.slane %v4327_v60, %v6970_v40  ;;  %v4344_v62 = vrot.slane %v4328_v53, %v6970_v40  ;;  %v4351_v12 = vrot.slane %v4329_v20, %v6970_v40 }
 0x341   : > { %v7263_v9 = vadd.f32 %v6948_v55, %v2373_v41  ;;  %v4358_v24 = vrot.slane %v4330_v63, %v6970_v40  ;;  %v2869_v42 = vrot.slane %v7139_v7, %v6954_v16  ;;  %v2873_v58 = vrot.slane %v7139_v7, %v6957_v11 }
 0x342   : > { %v4326_v21 = vcombine.low %v4318_v0, %v4325_v22  ;;  %v4359_v19 = vcombine.low %v4337_v6, %v4344_v62  ;;  %v2877_v3 = vrot.slane %v7139_v7, %v6960_v1  ;;  %v2881_v59 = vrot.slane %v7139_v7, %v6963_v46 }
 0x343   : > { %v4360_v36 = vcombine.low %v4351_v12, %v4358_v24  ;;  %v2885_v25 = vrot.slane %v7139_v7, %v6966_v5  ;;  %v4082_v38 = vcombine.low %v2857_v14, %v2861_v50  ;;  %v4083_v29 = vcombine.low %v2865_v48, %v2869_v42 }
 0x344   : > { %5111 = vperm.xlu0 %5731, %v4326_v21   ;;  %v4367_v49 = vrot.slane %v4359_v19, %v6970_v40  ;;  %v2375_v39 = vpop.xlane.xlu1 %2374  ;;  %v4084_v10 = vcombine.low %v2873_v58, %v2877_v3  ;;  %v3049_v31 = vrot.slane %v7236_v32, %v7956_v4  ;;  %v3053_v35 = vrot.slane %v7236_v32, %v7958_v43 }
 0x345   : > { %v4374_v54 = vrot.slane %v4360_v36, %v6970_v40  ;;  %v7286_v8 = vadd.f32 %v6948_v55, %v2375_v39  ;;  %v4085_v13 = vcombine.low %v2881_v59, %v2885_v25  ;;  %v4092_v7 = vrot.slane %v4082_v38, %v6970_v40 }
 0x346   : > { %v4099_v14 = vrot.slane %v4083_v29, %v6970_v40  ;;  %v4106_v45 = vrot.slane %v4084_v10, %v6970_v40  ;;  %v3057_v44 = vrot.slane %v7236_v32, %v6951_v26  ;;  %v3061_v23 = vrot.slane %v7236_v32, %v6954_v16 }
 0x347   : > { %v4375_v34 = vcombine.low %v4367_v49, %v4374_v54  ;;  %v4113_v30 = vrot.slane %v4085_v13, %v6970_v40  ;;  %v3065_v15 = vrot.slane %v7236_v32, %v6957_v11  ;;  %v3069_v57 = vrot.slane %v7236_v32, %v6960_v1 }
 0x348   : > { %v4114_v51 = vcombine.low %v4092_v7, %v4099_v14  ;;  %v3073_v37 = vrot.slane %v7236_v32, %v6963_v46  ;;  %v3077_v2 = vrot.slane %v7236_v32, %v6966_v5  ;;  %v4376_v18 = vcombine.low %v3049_v31, %v3053_v35  ;;  %v2377_v28 = vpop.xlane.xlu0 %2376 }
 0x349   : > { %5114 = vperm.xlu1 %5730, %v4375_v34   ;;  %v4115_v61 = vcombine.low %v4106_v45, %v4113_v30  ;;  %v4377_v27 = vcombine.low %v3057_v44, %v3061_v23  ;;  %v4378_v60 = vcombine.low %v3065_v15, %v3069_v57  ;;  %v7305_v53 = vadd.f32 %v6948_v55, %v2377_v28 }
 0x34a   : > { %v4122_v20 = vrot.slane %v4114_v51, %v6970_v40  ;;  %v4379_v0 = vcombine.low %v3073_v37, %v3077_v2  ;;  %v4386_v63 = vrot.slane %v4376_v18, %v6970_v40  ;;  %v2889_v50 = vrot.slane %v7163_v17, %v7956_v4 }
 0x34b   : > { %v4129_v48 = vrot.slane %v4115_v61, %v6970_v40  ;;  %v4393_v32 = vrot.slane %v4377_v27, %v6970_v40  ;;  %v4400_v22 = vrot.slane %v4378_v60, %v6970_v40  ;;  %v2893_v41 = vrot.slane %v7163_v17, %v7958_v43 }
 0x34c   : > { %v4407_v6 = vrot.slane %v4379_v0, %v6970_v40  ;;  %v2897_v62 = vrot.slane %v7163_v17, %v6951_v26  ;;  %v2901_v12 = vrot.slane %v7163_v17, %v6954_v16  ;;  %v2905_v24 = vrot.slane %v7163_v17, %v6957_v11  ;;  %v2379_v45 = vpop.xlane.xlu1 %2378 }
 0x34d   : > { %v4130_v42 = vcombine.low %v4122_v20, %v4129_v48  ;;  %v4408_v58 = vcombine.low %v4386_v63, %v4393_v32  ;;  %v2909_v21 = vrot.slane %v7163_v17, %v6960_v1  ;;  %v2913_v19 = vrot.slane %v7163_v17, %v6963_v46 }
 0x34e   : > { %v4409_v3 = vcombine.low %v4400_v22, %v4407_v6  ;;  %v2917_v59 = vrot.slane %v7163_v17, %v6966_v5  ;;  %v4131_v36 = vcombine.low %v2889_v50, %v2893_v41  ;;  %v4132_v25 = vcombine.low %v2897_v62, %v2901_v12 }
 0x34f   : > { %5099 = vperm.xlu1 %5730, %v4130_v42   ;;  %v4416_v38 = vrot.slane %v4408_v58, %v6970_v40  ;;  %v4133_v29 = vcombine.low %v2905_v24, %v2909_v21  ;;  %v3081_v49 = vrot.slane %v7249_v47, %v7956_v4  ;;  %v3085_v39 = vrot.slane %v7249_v47, %v7958_v43 }
 0x350   : > { %v4423_v10 = vrot.slane %v4409_v3, %v6970_v40  ;;  %v4134_v31 = vcombine.low %v2913_v19, %v2917_v59  ;;  %v4141_v35 = vrot.slane %v4131_v36, %v6970_v40  ;;  %v4148_v54 = vrot.slane %v4132_v25, %v6970_v40 }
 0x351   : > { %v4155_v17 = vrot.slane %v4133_v29, %v6970_v40  ;;  %v3089_v13 = vrot.slane %v7249_v47, %v6951_v26  ;;  %v3093_v7 = vrot.slane %v7249_v47, %v6954_v16  ;;  %v3097_v14 = vrot.slane %v7249_v47, %v6957_v11 }
 0x352   : > { %v4424_v44 = vcombine.low %v4416_v38, %v4423_v10  ;;  %v4162_v23 = vrot.slane %v4134_v31, %v6970_v40  ;;  %v4163_v34 = vcombine.low %v4141_v35, %v4148_v54  ;;  %v3101_v30 = vrot.slane %v7249_v47, %v6960_v1 }
 0x353   : > { %v3105_v15 = vrot.slane %v7249_v47, %v6963_v46  ;;  %v3109_v57 = vrot.slane %v7249_v47, %v6966_v5  ;;  %v4425_v51 = vcombine.low %v3081_v49, %v3085_v39  ;;  %v4426_v37 = vcombine.low %v3089_v13, %v3093_v7 }
 0x354   : > { %5117 = vperm.xlu0 %5731, %v4424_v44   ;;  %v4164_v2 = vcombine.low %v4155_v17, %v4162_v23  ;;  %v4171_v18 = vrot.slane %v4163_v34, %v6970_v40  ;;  %v4427_v28 = vcombine.low %v3097_v14, %v3101_v30  ;;  %v7353_v61 = vadd.f32 %v6948_v55, %v2379_v45  ;;  %v2381_v17 = vpop.xlane.xlu0 %2380 }
 0x355   : > { %v4428_v27 = vcombine.low %v3105_v15, %v3109_v57  ;;  %v4435_v60 = vrot.slane %v4425_v51, %v6970_v40  ;;  %v4442_v20 = vrot.slane %v4426_v37, %v6970_v40  ;;  %v2921_v0 = vrot.slane %v7189_v56, %v7956_v4 }
 0x356   : > { %v4178_v47 = vrot.slane %v4164_v2, %v6970_v40  ;;  %v4449_v63 = vrot.slane %v4427_v28, %v6970_v40  ;;  %v2925_v50 = vrot.slane %v7189_v56, %v7958_v43  ;;  %v2929_v48 = vrot.slane %v7189_v56, %v6951_v26 }
 0x357   : > { %v4456_v32 = vrot.slane %v4428_v27, %v6970_v40  ;;  %v4457_v22 = vcombine.low %v4435_v60, %v4442_v20  ;;  %v2933_v41 = vrot.slane %v7189_v56, %v6954_v16  ;;  %v2937_v6 = vrot.slane %v7189_v56, %v6957_v11 }
 0x358   : > { %v4179_v62 = vcombine.low %v4171_v18, %v4178_v47  ;;  %v2941_v12 = vrot.slane %v7189_v56, %v6960_v1  ;;  %v2945_v24 = vrot.slane %v7189_v56, %v6963_v46  ;;  %v2949_v42 = vrot.slane %v7189_v56, %v6966_v5 }
 0x359   : > { %v4458_v58 = vcombine.low %v4449_v63, %v4456_v32  ;;  %v4465_v21 = vrot.slane %v4457_v22, %v6970_v40  ;;  %v4180_v19 = vcombine.low %v2921_v0, %v2925_v50  ;;  %v4181_v3 = vcombine.low %v2929_v48, %v2933_v41 }
 0x35a   : > { %5102 = vperm.xlu1 %5730, %v4179_v62   ;;  %v4182_v59 = vcombine.low %v2937_v6, %v2941_v12  ;;  %v4183_v36 = vcombine.low %v2945_v24, %v2949_v42  ;;  %v3113_v25 = vrot.slane %v7263_v9, %v7956_v4  ;;  %v3117_v38 = vrot.slane %v7263_v9, %v7958_v43 }
 0x35b   : > { %v4472_v29 = vrot.slane %v4458_v58, %v6970_v40  ;;  %v4190_v49 = vrot.slane %v4180_v19, %v6970_v40  ;;  %v4197_v56 = vrot.slane %v4181_v3, %v6970_v40  ;;  %v3121_v39 = vrot.slane %v7263_v9, %v6951_v26 }
 0x35c   : > { %v4204_v10 = vrot.slane %v4182_v59, %v6970_v40  ;;  %v4211_v31 = vrot.slane %v4183_v36, %v6970_v40  ;;  %v3125_v35 = vrot.slane %v7263_v9, %v6954_v16  ;;  %v3129_v54 = vrot.slane %v7263_v9, %v6957_v11  ;;  %v2383_v59 = vpop.xlane.xlu0 %2382 }
 0x35d   : > { %v4473_v13 = vcombine.low %v4465_v21, %v4472_v29  ;;  %v4212_v7 = vcombine.low %v4190_v49, %v4197_v56  ;;  %v3133_v14 = vrot.slane %v7263_v9, %v6960_v1  ;;  %v3137_v45 = vrot.slane %v7263_v9, %v6963_v46 }
 0x35e   : > { %v4213_v44 = vcombine.low %v4204_v10, %v4211_v31  ;;  %v3141_v23 = vrot.slane %v7263_v9, %v6966_v5  ;;  %v4474_v34 = vcombine.low %v3113_v25, %v3117_v38  ;;  %v4475_v30 = vcombine.low %v3121_v39, %v3125_v35 }
 0x35f   : > { %5120 = vperm.xlu0 %5731, %v4473_v13   ;;  %v4220_v15 = vrot.slane %v4212_v7, %v6970_v40  ;;  %v4476_v57 = vcombine.low %v3129_v54, %v3133_v14  ;;  %v7400_v51 = vadd.f32 %v6948_v55, %v2381_v17  ;;  %v2953_v37 = vrot.slane %v7213_v33, %v7956_v4 }
 0x360   : > { %v4227_v2 = vrot.slane %v4213_v44, %v6970_v40  ;;  %v4477_v18 = vcombine.low %v3137_v45, %v3141_v23  ;;  %v4484_v28 = vrot.slane %v4474_v34, %v6970_v40  ;;  %v4491_v27 = vrot.slane %v4475_v30, %v6970_v40 }
 0x361   : > { %v4498_v9 = vrot.slane %v4476_v57, %v6970_v40  ;;  %v2957_v60 = vrot.slane %v7213_v33, %v7958_v43  ;;  %v2961_v20 = vrot.slane %v7213_v33, %v6951_v26  ;;  %v2965_v0 = vrot.slane %v7213_v33, %v6954_v16 }
 0x362   : > { %v4228_v47 = vcombine.low %v4220_v15, %v4227_v2  ;;  %v4505_v63 = vrot.slane %v4477_v18, %v6970_v40  ;;  %v4506_v50 = vcombine.low %v4484_v28, %v4491_v27  ;;  %v2969_v48 = vrot.slane %v7213_v33, %v6957_v11 }
 0x363   : > { %v2973_v32 = vrot.slane %v7213_v33, %v6960_v1  ;;  %v2977_v22 = vrot.slane %v7213_v33, %v6963_v46  ;;  %v2981_v41 = vrot.slane %v7213_v33, %v6966_v5  ;;  %v4229_v6 = vcombine.low %v2953_v37, %v2957_v60  ;;  %v2385_v37 = vpop.xlane.xlu0 %2384 }
 0x364   : > { %5105 = vperm.xlu1 %5730, %v4228_v47   ;;  %v4507_v62 = vcombine.low %v4498_v9, %v4505_v63  ;;  %v4514_v12 = vrot.slane %v4506_v50, %v6970_v40  ;;  %v4230_v24 = vcombine.low %v2961_v20, %v2965_v0  ;;  %v3145_v42 = vrot.slane %v7286_v8, %v7956_v4 }
 0x365   : > { %v4231_v58 = vcombine.low %v2969_v48, %v2973_v32  ;;  %v4232_v21 = vcombine.low %v2977_v22, %v2981_v41  ;;  %v4239_v19 = vrot.slane %v4229_v6, %v6970_v40  ;;  %v3149_v3 = vrot.slane %v7286_v8, %v7958_v43 }
 0x366   : > { %v4521_v36 = vrot.slane %v4507_v62, %v6970_v40  ;;  %v4246_v33 = vrot.slane %v4230_v24, %v6970_v40  ;;  %v3153_v25 = vrot.slane %v7286_v8, %v6951_v26  ;;  %v3157_v38 = vrot.slane %v7286_v8, %v6954_v16 }
 0x367   : > { %v4253_v29 = vrot.slane %v4231_v58, %v6970_v40  ;;  %v4260_v49 = vrot.slane %v4232_v21, %v6970_v40  ;;  %v3161_v56 = vrot.slane %v7286_v8, %v6957_v11  ;;  %v3165_v39 = vrot.slane %v7286_v8, %v6960_v1 }
 0x368   : > { %v4522_v10 = vcombine.low %v4514_v12, %v4521_v36  ;;  %v4261_v31 = vcombine.low %v4239_v19, %v4246_v33  ;;  %v3169_v35 = vrot.slane %v7286_v8, %v6963_v46  ;;  %v3173_v54 = vrot.slane %v7286_v8, %v6966_v5 }
 0x369   : > { %v4262_v17 = vcombine.low %v4253_v29, %v4260_v49  ;;  %v4523_v13 = vcombine.low %v3145_v42, %v3149_v3  ;;  %v4524_v7 = vcombine.low %v3153_v25, %v3157_v38  ;;  %v4525_v14 = vcombine.low %v3161_v56, %v3165_v39  ;;  %v2387_v3 = vpop.xlane.xlu0 %2386 }
 0x36a   : > { %5123 = vperm.xlu0 %5731, %v4522_v10   ;;  %v4269_v45 = vrot.slane %v4261_v31, %v6970_v40  ;;  %v4526_v44 = vcombine.low %v3169_v35, %v3173_v54  ;;  %v7447_v23 = vadd.f32 %v6948_v55, %v2383_v59  ;;  %v3177_v34 = vrot.slane %v7305_v53, %v7956_v4 }
 0x36b   : > { %v4276_v30 = vrot.slane %v4262_v17, %v6970_v40  ;;  %v4533_v15 = vrot.slane %v4523_v13, %v6970_v40  ;;  %v4540_v8 = vrot.slane %v4524_v7, %v6970_v40  ;;  %v4547_v57 = vrot.slane %v4525_v14, %v6970_v40 }
 0x36c   : > { %v4554_v2 = vrot.slane %v4526_v44, %v6970_v40  ;;  %v3181_v18 = vrot.slane %v7305_v53, %v7958_v43  ;;  %v3185_v28 = vrot.slane %v7305_v53, %v6951_v26  ;;  %v3189_v27 = vrot.slane %v7305_v53, %v6954_v16 }
 0x36d   : > { %v4277_v9 = vcombine.low %v4269_v45, %v4276_v30  ;;  %v4555_v60 = vcombine.low %v4533_v15, %v4540_v8  ;;  %v3193_v20 = vrot.slane %v7305_v53, %v6957_v11  ;;  %v3197_v0 = vrot.slane %v7305_v53, %v6960_v1 }
 0x36e   : > { %v4556_v47 = vcombine.low %v4547_v57, %v4554_v2  ;;  %v3201_v63 = vrot.slane %v7305_v53, %v6963_v46  ;;  %v3205_v50 = vrot.slane %v7305_v53, %v6966_v5  ;;  %v4572_v48 = vcombine.low %v3177_v34, %v3181_v18  ;;  %v2389_v57 = vpop.xlane.xlu0 %2388 }
 0x36f   : > { %5108 = vperm.xlu1 %5730, %v4277_v9   ;;  %v4563_v32 = vrot.slane %v4555_v60, %v6970_v40  ;;  %v4573_v22 = vcombine.low %v3185_v28, %v3189_v27  ;;  %v4574_v41 = vcombine.low %v3193_v20, %v3197_v0  ;;  %v7472_v6 = vadd.f32 %v6948_v55, %v2385_v37 }
 0x370   : > { %v4570_v62 = vrot.slane %v4556_v47, %v6970_v40  ;;  %v4575_v12 = vcombine.low %v3201_v63, %v3205_v50  ;;  %v4582_v24 = vrot.slane %v4572_v48, %v6970_v40  ;;  %v3209_v42 = vrot.slane %v7353_v61, %v7956_v4 }
 0x371   : > { %v4589_v58 = vrot.slane %v4573_v22, %v6970_v40  ;;  %v4596_v53 = vrot.slane %v4574_v41, %v6970_v40  ;;  %v3213_v21 = vrot.slane %v7353_v61, %v7958_v43  ;;  %v3217_v19 = vrot.slane %v7353_v61, %v6951_v26 }
 0x372   : > { %v4571_v59 = vcombine.low %v4563_v32, %v4570_v62  ;;  %v4603_v36 = vrot.slane %v4575_v12, %v6970_v40  ;;  %v3221_v33 = vrot.slane %v7353_v61, %v6954_v16  ;;  %v3225_v25 = vrot.slane %v7353_v61, %v6957_v11 }
 0x373   : > { %v4604_v38 = vcombine.low %v4582_v24, %v4589_v58  ;;  %v3229_v29 = vrot.slane %v7353_v61, %v6960_v1  ;;  %v3233_v49 = vrot.slane %v7353_v61, %v6963_v46  ;;  %v3237_v56 = vrot.slane %v7353_v61, %v6966_v5 }
 0x374   : > { %5126 = vperm.xlu0 %5731, %v4571_v59   ;;  %v4605_v39 = vcombine.low %v4596_v53, %v4603_v36  ;;  %v4621_v10 = vcombine.low %v3209_v42, %v3213_v21  ;;  %v4622_v31 = vcombine.low %v3217_v19, %v3221_v33  ;;  %v7496_v35 = vadd.f32 %v6948_v55, %v2387_v3  ;;  %v2391_v42 = vpop.xlane.xlu1 %2390 }
 0x375   : > { %v4612_v54 = vrot.slane %v4604_v38, %v6970_v40  ;;  %v4623_v17 = vcombine.low %v3225_v25, %v3229_v29  ;;  %v4624_v13 = vcombine.low %v3233_v49, %v3237_v56  ;;  %v3241_v7 = vrot.slane %v7400_v51, %v7956_v4 }
 0x376   : > { %v4619_v14 = vrot.slane %v4605_v39, %v6970_v40  ;;  %v4631_v45 = vrot.slane %v4621_v10, %v6970_v40  ;;  %v4638_v61 = vrot.slane %v4622_v31, %v6970_v40  ;;  %v3245_v44 = vrot.slane %v7400_v51, %v7958_v43 }
 0x377   : > { %v4645_v34 = vrot.slane %v4623_v17, %v6970_v40  ;;  %v4652_v30 = vrot.slane %v4624_v13, %v6970_v40  ;;  %v3249_v15 = vrot.slane %v7400_v51, %v6951_v26  ;;  %v3253_v8 = vrot.slane %v7400_v51, %v6954_v16 }
 0x378   : > { %v4620_v37 = vcombine.low %v4612_v54, %v4619_v14  ;;  %v4653_v2 = vcombine.low %v4631_v45, %v4638_v61  ;;  %v3257_v18 = vrot.slane %v7400_v51, %v6957_v11  ;;  %v3261_v28 = vrot.slane %v7400_v51, %v6960_v1 }
 0x379   : > { %v4654_v27 = vcombine.low %v4645_v34, %v4652_v30  ;;  %v3265_v9 = vrot.slane %v7400_v51, %v6963_v46  ;;  %v3269_v60 = vrot.slane %v7400_v51, %v6966_v5  ;;  %v4670_v20 = vcombine.low %v3241_v7, %v3245_v44  ;;  %v2393_v7 = vpop.xlane.xlu0 %2392 }
 0x37a   : > { %5129 = vperm.xlu0 %5731, %v4620_v37   ;;  %v4661_v0 = vrot.slane %v4653_v2, %v6970_v40  ;;  %v4671_v47 = vcombine.low %v3249_v15, %v3253_v8  ;;  %v4672_v63 = vcombine.low %v3257_v18, %v3261_v28  ;;  %v7522_v50 = vadd.f32 %v6948_v55, %v2389_v57 }
 0x37b   : > { %v4668_v48 = vrot.slane %v4654_v27, %v6970_v40  ;;  %v4673_v32 = vcombine.low %v3265_v9, %v3269_v60  ;;  %v4680_v22 = vrot.slane %v4670_v20, %v6970_v40  ;;  %v3273_v41 = vrot.slane %v7447_v23, %v7956_v4 }
 0x37c   : > { %v4687_v62 = vrot.slane %v4671_v47, %v6970_v40  ;;  %v4694_v51 = vrot.slane %v4672_v63, %v6970_v40  ;;  %v3277_v12 = vrot.slane %v7447_v23, %v7958_v43  ;;  %v3281_v24 = vrot.slane %v7447_v23, %v6951_v26 }
 0x37d   : > { %v4669_v58 = vcombine.low %v4661_v0, %v4668_v48  ;;  %v4701_v53 = vrot.slane %v4673_v32, %v6970_v40  ;;  %v3285_v21 = vrot.slane %v7447_v23, %v6954_v16  ;;  %v3289_v19 = vrot.slane %v7447_v23, %v6957_v11 }
 0x37e   : > { %v4702_v3 = vcombine.low %v4680_v22, %v4687_v62  ;;  %v3293_v59 = vrot.slane %v7447_v23, %v6960_v1  ;;  %v3297_v36 = vrot.slane %v7447_v23, %v6963_v46  ;;  %v3301_v33 = vrot.slane %v7447_v23, %v6966_v5 }
 0x37f   : > { %5132 = vperm.xlu0 %5731, %v4669_v58   ;;  %v4703_v25 = vcombine.low %v4694_v51, %v4701_v53  ;;  %v4719_v38 = vcombine.low %v3273_v41, %v3277_v12  ;;  %v4720_v29 = vcombine.low %v3281_v24, %v3285_v21  ;;  %v7546_v49 = vadd.f32 %v6948_v55, %v2391_v42  ;;  %v2395_v41 = vpop.xlane.xlu0 %2394 }
 0x380   : > { %v4710_v56 = vrot.slane %v4702_v3, %v6970_v40  ;;  %v4721_v39 = vcombine.low %v3289_v19, %v3293_v59  ;;  %v4722_v10 = vcombine.low %v3297_v36, %v3301_v33  ;;  %v3305_v31 = vrot.slane %v7472_v6, %v7956_v4 }
 0x381   : > { %v4717_v54 = vrot.slane %v4703_v25, %v6970_v40  ;;  %v4729_v17 = vrot.slane %v4719_v38, %v6970_v40  ;;  %v4736_v23 = vrot.slane %v4720_v29, %v6970_v40  ;;  %v3309_v13 = vrot.slane %v7472_v6, %v7958_v43 }
 0x382   : > { %v4743_v14 = vrot.slane %v4721_v39, %v6970_v40  ;;  %v4750_v45 = vrot.slane %v4722_v10, %v6970_v40  ;;  %v3313_v61 = vrot.slane %v7472_v6, %v6951_v26  ;;  %v3317_v44 = vrot.slane %v7472_v6, %v6954_v16 }
 0x383   : > { %v4718_v34 = vcombine.low %v4710_v56, %v4717_v54  ;;  %v4751_v30 = vcombine.low %v4729_v17, %v4736_v23  ;;  %v3321_v15 = vrot.slane %v7472_v6, %v6957_v11  ;;  %v3325_v8 = vrot.slane %v7472_v6, %v6960_v1 }
 0x384   : > { %v4752_v57 = vcombine.low %v4743_v14, %v4750_v45  ;;  %v3329_v37 = vrot.slane %v7472_v6, %v6963_v46  ;;  %v3333_v2 = vrot.slane %v7472_v6, %v6966_v5  ;;  %v4768_v18 = vcombine.low %v3305_v31, %v3309_v13 }
 0x385   : > { %5135 = vperm.xlu0 %5731, %v4718_v34   ;;  %v4759_v28 = vrot.slane %v4751_v30, %v6970_v40  ;;  %v4769_v27 = vcombine.low %v3313_v61, %v3317_v44  ;;  %v4770_v9 = vcombine.low %v3321_v15, %v3325_v8  ;;  %v7572_v60 = vadd.f32 %v6948_v55, %v2393_v7 }
 0x386   : > { %v4766_v20 = vrot.slane %v4752_v57, %v6970_v40  ;;  %v4771_v0 = vcombine.low %v3329_v37, %v3333_v2  ;;  %v4778_v47 = vrot.slane %v4768_v18, %v6970_v40  ;;  %v3337_v63 = vrot.slane %v7496_v35, %v7956_v4 }
 0x387   : > { %v4785_v48 = vrot.slane %v4769_v27, %v6970_v40  ;;  %v4792_v6 = vrot.slane %v4770_v9, %v6970_v40  ;;  %v3341_v32 = vrot.slane %v7496_v35, %v7958_v43  ;;  %v3345_v22 = vrot.slane %v7496_v35, %v6951_v26 }
 0x388   : > { %v4767_v62 = vcombine.low %v4759_v28, %v4766_v20  ;;  %v4799_v51 = vrot.slane %v4771_v0, %v6970_v40  ;;  %v3349_v12 = vrot.slane %v7496_v35, %v6954_v16  ;;  %v3353_v24 = vrot.slane %v7496_v35, %v6957_v11 }
 0x389   : > { %v4800_v42 = vcombine.low %v4778_v47, %v4785_v48  ;;  %v3357_v58 = vrot.slane %v7496_v35, %v6960_v1  ;;  %v3361_v53 = vrot.slane %v7496_v35, %v6963_v46  ;;  %v3365_v21 = vrot.slane %v7496_v35, %v6966_v5 }
 0x38a   : > { %5138 = vperm.xlu0 %5731, %v4767_v62   ;;  %v4801_v19 = vcombine.low %v4792_v6, %v4799_v51  ;;  %v4817_v3 = vcombine.low %v3337_v63, %v3341_v32  ;;  %v4818_v59 = vcombine.low %v3345_v22, %v3349_v12  ;;  %v7596_v36 = vadd.f32 %v6948_v55, %v2395_v41 }
 0x38b   : > { %v4808_v33 = vrot.slane %v4800_v42, %v6970_v40  ;;  %v4819_v25 = vcombine.low %v3353_v24, %v3357_v58  ;;  %v4820_v38 = vcombine.low %v3361_v53, %v3365_v21  ;;  %v3369_v29 = vrot.slane %v7522_v50, %v7956_v4 }
 0x38c   : > { %v4815_v56 = vrot.slane %v4801_v19, %v6970_v40  ;;  %v4827_v39 = vrot.slane %v4817_v3, %v6970_v40  ;;  %v4834_v35 = vrot.slane %v4818_v59, %v6970_v40  ;;  %v3373_v10 = vrot.slane %v7522_v50, %v7958_v43 }
 0x38d   : > { %v4841_v31 = vrot.slane %v4819_v25, %v6970_v40  ;;  %v4848_v55 = vrot.slane %v4820_v38, %v6970_v40  ;;  %v3377_v54 = vrot.slane %v7522_v50, %v6951_v26  ;;  %v3381_v17 = vrot.slane %v7522_v50, %v6954_v16 }
 0x38e   : > { %v4816_v23 = vcombine.low %v4808_v33, %v4815_v56  ;;  %v4849_v13 = vcombine.low %v4827_v39, %v4834_v35  ;;  %v3385_v7 = vrot.slane %v7522_v50, %v6957_v11  ;;  %v3389_v14 = vrot.slane %v7522_v50, %v6960_v1 }
 0x38f   : > { %v4850_v45 = vcombine.low %v4841_v31, %v4848_v55  ;;  %v3393_v61 = vrot.slane %v7522_v50, %v6963_v46  ;;  %v3397_v44 = vrot.slane %v7522_v50, %v6966_v5  ;;  %v4866_v34 = vcombine.low %v3369_v29, %v3373_v10 }
 0x390   : > { %5141 = vperm.xlu0 %5731, %v4816_v23   ;;  %v4857_v30 = vrot.slane %v4849_v13, %v6970_v40  ;;  %v4867_v15 = vcombine.low %v3377_v54, %v3381_v17  ;;  %v4868_v8 = vcombine.low %v3385_v7, %v3389_v14  ;;  %v3401_v57 = vrot.slane %v7546_v49, %v7956_v4 }
 0x391   : > { %v4864_v37 = vrot.slane %v4850_v45, %v6970_v40  ;;  %v4869_v2 = vcombine.low %v3393_v61, %v3397_v44  ;;  %v4876_v18 = vrot.slane %v4866_v34, %v6970_v40  ;;  %v3405_v28 = vrot.slane %v7546_v49, %v7958_v43 }
 0x392   : > { %v4883_v27 = vrot.slane %v4867_v15, %v6970_v40  ;;  %v4890_v50 = vrot.slane %v4868_v8, %v6970_v40  ;;  %v3409_v9 = vrot.slane %v7546_v49, %v6951_v26  ;;  %v3413_v20 = vrot.slane %v7546_v49, %v6954_v16 }
 0x393   : > { %v4865_v0 = vcombine.low %v4857_v30, %v4864_v37  ;;  %v4897_v47 = vrot.slane %v4869_v2, %v6970_v40  ;;  %v3417_v63 = vrot.slane %v7546_v49, %v6957_v11  ;;  %v3421_v48 = vrot.slane %v7546_v49, %v6960_v1 }
 0x394   : > { %v4898_v6 = vcombine.low %v4876_v18, %v4883_v27  ;;  %v3425_v32 = vrot.slane %v7546_v49, %v6963_v46  ;;  %v3429_v22 = vrot.slane %v7546_v49, %v6966_v5  ;;  %v4915_v41 = vcombine.low %v3401_v57, %v3405_v28 }
 0x395   : > { %5144 = vperm.xlu0 %5731, %v4865_v0   ;;  %v4899_v62 = vcombine.low %v4890_v50, %v4897_v47  ;;  %v4916_v51 = vcombine.low %v3409_v9, %v3413_v20  ;;  %v4917_v12 = vcombine.low %v3417_v63, %v3421_v48  ;;  %v3433_v24 = vrot.slane %v7572_v60, %v7956_v4 }
 0x396   : > { %v4906_v42 = vrot.slane %v4898_v6, %v6970_v40  ;;  %v4918_v58 = vcombine.low %v3425_v32, %v3429_v22  ;;  %v4925_v53 = vrot.slane %v4915_v41, %v6970_v40  ;;  %v3437_v21 = vrot.slane %v7572_v60, %v7958_v43  ;;  %v5067_v6 = vpop.permute.xlu1 %5066  ;;  %v5064_v22 = vpop.permute.xlu0 %5063 }
 0x397   : > { %v4913_v19 = vrot.slane %v4899_v62, %v6970_v40  ;;  %v4932_v49 = vrot.slane %v4916_v51, %v6970_v40  ;;  %v4939_v3 = vrot.slane %v4917_v12, %v6970_v40  ;;  %v3441_v59 = vrot.slane %v7572_v60, %v6951_v26 }
 0x398   : > { %v4946_v33 = vrot.slane %v4918_v58, %v6970_v40  ;;  %v3445_v25 = vrot.slane %v7572_v60, %v6954_v16  ;;  %v3449_v38 = vrot.slane %v7572_v60, %v6957_v11  ;;  %v3453_v29 = vrot.slane %v7572_v60, %v6960_v1 }
 0x399   : > { %v4914_v56 = vcombine.low %v4906_v42, %v4913_v19  ;;  %v4947_v39 = vcombine.low %v4925_v53, %v4932_v49  ;;  %v3457_v35 = vrot.slane %v7572_v60, %v6963_v46  ;;  %v3461_v10 = vrot.slane %v7572_v60, %v6966_v5 }
 0x39a   : > { %v4948_v31 = vcombine.low %v4939_v3, %v4946_v33  ;;  %v4964_v55 = vcombine.low %v3433_v24, %v3437_v21  ;;  %v4965_v54 = vcombine.low %v3441_v59, %v3445_v25  ;;  %v4966_v17 = vcombine.low %v3449_v38, %v3453_v29  ;;  %v5070_v32 = vpop.permute.xlu1 %5069 }
 0x39b   : > { %5147 = vperm.xlu0 %5731, %v4914_v56   ;;  %v4955_v23 = vrot.slane %v4947_v39, %v6970_v40  ;;  %v4967_v13 = vcombine.low %v3457_v35, %v3461_v10  ;;  %v3465_v7 = vrot.slane %v7596_v36, %v7956_v4  ;;  %v3469_v34 = vrot.slane %v7596_v36, %v7958_v43 }
 0x39c   : > { %v4962_v14 = vrot.slane %v4948_v31, %v6970_v40  ;;  %v4974_v45 = vrot.slane %v4964_v55, %v6970_v40  ;;  %v4981_v61 = vrot.slane %v4965_v54, %v6970_v40  ;;  %v4988_v44 = vrot.slane %v4966_v17, %v6970_v40 }
 0x39d   : > { %v4995_v60 = vrot.slane %v4967_v13, %v6970_v40  ;;  %v3473_v30 = vrot.slane %v7596_v36, %v6951_v26  ;;  %v3477_v4 = vrot.slane %v7596_v36, %v6954_v16  ;;  %v3481_v57 = vrot.slane %v7596_v36, %v6957_v11 }
 0x39e   : > { %v4963_v15 = vcombine.low %v4955_v23, %v4962_v14  ;;  %v4996_v8 = vcombine.low %v4974_v45, %v4981_v61  ;;  %v3485_v2 = vrot.slane %v7596_v36, %v6960_v1  ;;  %v3489_v18 = vrot.slane %v7596_v36, %v6963_v46  ;;  %v5073_v41 = vpop.permute.xlu1 %5072 }
 0x39f   : > { %v4997_v37 = vcombine.low %v4988_v44, %v4995_v60  ;;  %v3493_v26 = vrot.slane %v7596_v36, %v6966_v5  ;;  %v5013_v28 = vcombine.low %v3465_v7, %v3469_v34  ;;  %v5014_v27 = vcombine.low %v3473_v30, %v3477_v4 }
 0x3a0   : > { %5150 = vperm.xlu0 %5731, %v4963_v15   ;;  %v5004_v43 = vrot.slane %v4996_v8, %v6970_v40  ;;  %v5015_v50 = vcombine.low %v3481_v57, %v3485_v2  ;;  %v7959_v56 = vlaneseq }
 0x3a1   : > { %v5011_v16 = vrot.slane %v4997_v37, %v6970_v40  ;;  %v5016_v9 = vcombine.low %v3489_v18, %v3493_v26  ;;  %v5023_v11 = vrot.slane %v5013_v28, %v6970_v40  ;;  %v5030_v20 = vrot.slane %v5014_v27, %v6970_v40 }
 0x3a2   : > { %v5037_v0 = vrot.slane %v5015_v50, %v6970_v40  ;;  %v5076_v51 = vpop.permute.xlu1 %5075  ;;  %v7721_v39 = vand.u32 127, %v7959_v56  ;;  %vm5366_vm15 = vcmp.lt.s32.totalorder %v7959_v56, 256 }
 0x3a3   : > { %v5012_v1 = vcombine.low %v5004_v43, %v5011_v16  ;;  %v5044_v46 = vrot.slane %v5016_v9, %v6970_v40  ;;  %v5045_v47 = vcombine.low %v5023_v11, %v5030_v20 }
 0x3a4   : > { %v5164_v10 = vadd.s32 4294967288, %v7721_v39  ;;  %v5171_v31 = vadd.s32 4294967280, %v7721_v39  ;;  %v5178_v55 = vadd.s32 4294967272, %v7721_v39  ;;  %v5185_v54 = vadd.s32 4294967264, %v7721_v39 }
 0x3a5   : > { %5153 = vperm.xlu0 %5731, %v5012_v1   ;;  %v5046_v63 = vcombine.low %v5037_v0, %v5044_v46  ;;  %v5053_v5 = vrot.slane %v5045_v47, %v6970_v40  ;;  %v5192_v7 = vadd.s32 4294967256, %v7721_v39  ;;  %v5199_v45 = vadd.s32 4294967248, %v7721_v39 }
 0x3a6   : > { %v5079_v24 = vpop.permute.xlu1 %5078  ;;  %v5167_v13 = vsub.s32 %v5164_v10, %v7957_v52  ;;  %v5174_v14 = vsub.s32 %v5171_v31, %v7957_v52  ;;  %v5162_v61 = vsub.s32 %v7721_v39, %v7957_v52  ;;  %v5181_v44 = vsub.s32 %v5178_v55, %v7957_v52 }
 0x3a7   : > { %v5060_v36 = vrot.slane %v5046_v63, %v6970_v40  ;;  %v5206_v60 = vadd.s32 4294967240, %v7721_v39  ;;  %v7740_v34 = vsub.s32 %v5185_v54, %v7957_v52  ;;  %v7743_v15 = vsub.s32 %v5192_v7, %v7957_v52 }
 0x3a8   : > { %v5168_v30 = vrot.slane %v5067_v6, %v5167_v13  ;;  %v5175_v4 = vrot.slane %v5070_v32, %v5174_v14  ;;  %v7748_v57 = vsub.s32 %v5199_v45, %v7957_v52  ;;  %v5163_v2 = vrot.slane %v5064_v22, %v5162_v61 }
 0x3a9   : > { %v5061_v48 = vcombine.low %v5053_v5, %v5060_v36  ;;  %v5182_v18 = vrot.slane %v5073_v41, %v5181_v44  ;;  %v7753_v43 = vsub.s32 %v5206_v60, %v7957_v52  ;;  %v5189_v26 = vrot.slane %v5076_v51, %v7740_v34 }
 0x3aa   : > { %v5082_v58 = vpop.permute.xlu1 %5081  ;;  %v5213_v28 = vadd.s32 4294967232, %v7721_v39  ;;  %v5170_v27 = vsel %vm5169_vm0, %v5168_v30, %v5163_v2  ;;  %v5196_v16 = vrot.slane %v5079_v24, %v7743_v15  ;;  %v5220_v11 = vadd.s32 4294967224, %v7721_v39 }
 0x3ab   : > { %5156 = vperm.xlu0 %5731, %v5061_v48   ;;  %v5177_v50 = vsel %vm5176_vm1, %v5175_v4, %v5170_v27  ;;  %v5203_v9 = vrot.slane %v5082_v58, %v7748_v57  ;;  %v5227_v63 = vadd.s32 4294967216, %v7721_v39  ;;  %v5234_v51 = vadd.s32 4294967208, %v7721_v39 }
 0x3ac   : > { %v5184_v20 = vsel %vm5183_vm2, %v5182_v18, %v5177_v50  ;;  %v5216_v47 = vsub.s32 %v5213_v28, %v7957_v52  ;;  %v5223_v32 = vsub.s32 %v5220_v11, %v7957_v52  ;;  %v5241_v31 = vadd.s32 4294967200, %v7721_v39 }
 0x3ad   : > { %v5191_v46 = vsel %vm5190_vm3, %v5189_v26, %v5184_v20  ;;  %v5230_v10 = vsub.s32 %v5227_v63, %v7957_v52 }
 0x3ae   : > { %v7702_v21 = vpop.permute.xlu1 %5084  ;;  %v5198_v36 = vsel %vm5197_vm4, %v5196_v16, %v5191_v46 }
 0x3af   : > { %v5210_v1 = vrot.slane %v7702_v21, %v7753_v43  ;;  %v5205_v6 = vsel %vm5204_vm5, %v5203_v9, %v5198_v36 }
 0x3b1   : > { %v5212_v41 = vsel %vm5211_vm6, %v5210_v1, %v5205_v6 }
 0x3b2   : > { %v7706_v49 = vpop.permute.xlu1 %5087 }
 0x3b3   : > { %v5217_v21 = vrot.slane %v7706_v49, %v5216_v47 }
 0x3b6   : > { %v7712_v33 = vpop.permute.xlu1 %5090 }
 0x3ba   : > { %v7716_v38 = vpop.permute.xlu1 %5093 }
 0x3be   : > { %v7723_v35 = vpop.permute.xlu1 %5096 }
 0x3bf   : > { %v7694_v62 = vpop.permute.xlu0 %5111 }
 0x3c0   : > { %v5272_v24 = vrot.slane %v7694_v62, %v5162_v61  ;;  %v5262_v61 = vadd.s32 4294967176, %v7721_v39 }
 0x3c2   : > { %v5265_v18 = vsub.s32 %v5262_v61, %v7957_v52 }
 0x3c4   : > { %v5115_v17 = vpop.permute.xlu1 %5114 }
 0x3c5   : > { %v5276_v48 = vrot.slane %v5115_v17, %v5167_v13  ;;  %v5248_v17 = vadd.s32 4294967192, %v7721_v39  ;;  %v5255_v13 = vadd.s32 4294967184, %v7721_v39  ;;  %v5231_v39 = vrot.slane %v7716_v38, %v5230_v10 }
 0x3ca   : > { %v7750_v37 = vpop.permute.xlu1 %5099 }
 0x3cf   : > { %v7696_v12 = vpop.permute.xlu0 %5117 }
 0x3d0   : > { %v5281_v22 = vrot.slane %v7696_v12, %v5174_v14  ;;  %v5277_v12 = vsel %vm5169_vm0, %v5276_v48, %v5272_v24 }
 0x3d2   : > { %v5282_v49 = vsel %vm5176_vm1, %v5281_v22, %v5277_v12 }
 0x3d5   : > { %v7770_v5 = vpop.permute.xlu1 %5102 }
 0x3da   : > { %v7698_v42 = vpop.permute.xlu0 %5120 }
 0x3db   : > { %v5286_v58 = vrot.slane %v7698_v42, %v5181_v44  ;;  %v5224_v42 = vrot.slane %v7712_v33, %v5223_v32 }
 0x3dd   : > { %v5287_v45 = vsel %vm5183_vm2, %v5286_v58, %v5282_v49 }
 0x3df   : > { %v5106_v7 = vpop.permute.xlu1 %5105 }
 0x3e5   : > { %v7700_v53 = vpop.permute.xlu0 %5123 }
 0x3e6   : > { %v5291_v55 = vrot.slane %v7700_v53, %v7740_v34  ;;  %v5237_v53 = vsub.s32 %v5234_v51, %v7957_v52  ;;  %v5219_v34 = vsel %vm5218_vm7, %v5217_v21, %v5212_v41 }
 0x3e8   : > { %v5292_v33 = vsel %vm5190_vm3, %v5291_v55, %v5287_v45 }
 0x3ef   : > { %v7704_v19 = vpop.permute.xlu0 %5126 }
 0x3f0   : > { %v5296_v62 = vrot.slane %v7704_v19, %v7743_v15  ;;  %v5244_v19 = vsub.s32 %v5241_v31, %v7957_v52 }
 0x3f2   : > { %v5297_v30 = vsel %vm5197_vm4, %v5296_v62, %v5292_v33  ;;  %v5245_v28 = vrot.slane %v7750_v37, %v5244_v19 }
 0x3f5   : > { %v7708_v3 = vpop.permute.xlu0 %5129 }
 0x3f6   : > { %v5301_v14 = vrot.slane %v7708_v3, %v7748_v57  ;;  %v5251_v3 = vsub.s32 %v5248_v17, %v7957_v52 }
 0x3f8   : > { %v5302_v4 = vsel %vm5204_vm5, %v5301_v14, %v5297_v30 }
 0x3fa   : > { %v7710_v59 = vpop.permute.xlu0 %5132 }
 0x3fb   : > { %v5306_v44 = vrot.slane %v7710_v59, %v7753_v43  ;;  %v5258_v59 = vsub.s32 %v5255_v13, %v7957_v52 }
 0x3fd   : > { %v5307_v43 = vsel %vm5211_vm6, %v5306_v44, %v5302_v4 }
 0x400   : > { %v7714_v25 = vpop.permute.xlu0 %5135 }
 0x401   : > { %v5311_v60 = vrot.slane %v7714_v25, %v5216_v47  ;;  %v5238_v25 = vrot.slane %v7723_v35, %v5237_v53  ;;  %v5252_v35 = vrot.slane %v7770_v5, %v5251_v3 }
 0x403   : > { %v5312_v38 = vsel %vm5218_vm7, %v5311_v60, %v5307_v43 }
 0x405   : > { %v7718_v29 = vpop.permute.xlu0 %5138 }
 0x406   : > { %v5316_v15 = vrot.slane %v7718_v29, %v5223_v32  ;;  %v5109_v29 = vpop.permute.xlu1 %5108 }
 0x407   : > { %v5266_v20 = vrot.slane %v5109_v29, %v5265_v18 }
 0x408   : > { %v5317_v52 = vsel %vm5225_vm8, %v5316_v15, %v5312_v38 }
 0x40b   : > { %v7729_v23 = vpop.permute.xlu0 %5141 }
 0x40c   : > { %v5321_v57 = vrot.slane %v7729_v23, %v5230_v10  ;;  %v5226_v23 = vsel %vm5225_vm8, %v5224_v42, %v5219_v34 }
 0x40d   : > { %v5233_v50 = vsel %vm5232_vm9, %v5231_v39, %v5226_v23 }
 0x40e   : > { %v5322_v37 = vsel %vm5232_vm9, %v5321_v57, %v5317_v52  ;;  %v5240_v11 = vsel %vm5239_vm10, %v5238_v25, %v5233_v50 }
 0x410   : > { %v7745_v8 = vpop.permute.xlu0 %5144 }
 0x411   : > { %v5326_v26 = vrot.slane %v7745_v8, %v5237_v53  ;;  %v5259_v8 = vrot.slane %v5106_v7, %v5258_v59 }
 0x413   : > { %v5327_v1 = vsel %vm5239_vm10, %v5326_v26, %v5322_v37 }
 0x416   : > { %v7765_v0 = vpop.permute.xlu0 %5147 }
 0x417   : > { %v5331_v27 = vrot.slane %v7765_v0, %v5244_v19  ;;  %v5247_v0 = vsel %vm5246_vm11, %v5245_v28, %v5240_v11 }
 0x418   : > { %v5254_v63 = vsel %vm5253_vm12, %v5252_v35, %v5247_v0 }
 0x419   : > { %v5332_v46 = vsel %vm5246_vm11, %v5331_v27, %v5327_v1  ;;  %v5261_v48 = vsel %vm5260_vm13, %v5259_v8, %v5254_v63 }
 0x41a   : > { %v5268_v32 = vsel %vm5267_vm14, %v5266_v20, %v5261_v48 }
 0x41b   : > { %v5151_v54 = vpop.permute.xlu0 %5150 }
 0x41c   : > { %v5336_v16 = vrot.slane %v5151_v54, %v5251_v3 }
 0x41e   : > { %v5337_v5 = vsel %vm5253_vm12, %v5336_v16, %v5332_v46 }
 0x420   : > { %v5154_v2 = vpop.permute.xlu0 %5153 }
 0x421   : > { %v5341_v9 = vrot.slane %v5154_v2, %v5258_v59 }
 0x423   : > { %v5342_v6 = vsel %vm5260_vm13, %v5341_v9, %v5337_v5 }
 0x426   : > { %v5157_v47 = vpop.permute.xlu0 %5156 }
 0x427   : > { %v5346_v36 = vrot.slane %v5157_v47, %v5265_v18 }
 0x429   : > { %v5347_v22 = vsel %vm5267_vm14, %v5346_v36, %v5342_v6 }
 0x42a   : > { %v5348_v41 = vcombine.low %v5268_v32, %v5347_v22 }
 0x42c   : > { %v5355_v51 = vrot.slane %v5348_v41, %v6970_v40 }
 0x42e   : > { %v5362_v24 = vrot.slane %v5355_v51, %v6970_v40 }
 0x430   : > { %5368 = vst.msk [vmem:[%s283_s15] sm:$0x3] %vm5366_vm15, %v5362_v24 }
 0x431 PF: > { %s19_s26 = sadd.s32 1, %s5986_s26  }
 0x432   : > { %p16_p5 = scmp.ge.s32.totalorder %s19_s26, 6  }
 0x434   :  { %18 = sbr.rel (!%p16_p5) target bundleno = 3 (0x3), region = 78 }

</bundles_post_ra>
